<compile_context>
chip_gen: v6e
topology: v6e:2x2x1
jax: 0.10.0
libtpu: 0.0.40
codegen_flags: <defaults>
</compile_context>

<pallas_src>
import functools
import math

import numpy as np
import jax
import jax.numpy as jnp
from jax import lax
from jax.experimental import pallas as pl
from jax.experimental.pallas import tpu as pltpu

HIDDEN = 32
NUM_RBF = 16
CUTOFF_LOWER = 0.0
CUTOFF_UPPER = 4.5
_VMEM_LIMIT = 64 * 1024 * 1024


def _silu(x):
    return x * jax.nn.sigmoid(x)


def _mm3(X, Y):
    """3x3 matrix product on lists of 9 [*, H] blocks, component c = 3a + b."""
    out = []
    for a in range(3):
        for b in range(3):
            out.append(X[3 * a + 0] * Y[b] + X[3 * a + 1] * Y[3 + b]
                       + X[3 * a + 2] * Y[6 + b])
    return out


# ----------------------------------------------------------------------------
# Fixed linear maps between the 9-component (c = 3a+b) and the 10 independent
# I/A/S channels, channel order k = [i, a1, a2, a5, s0, s1, s2, s4, s5, s8].
# ----------------------------------------------------------------------------
def _decompose_matrix():
    D = np.zeros((9, 10), np.float32)
    for c in (0, 4, 8):
        D[c, 0] = 1.0 / 3.0                       # i = trace/3
    D[1, 1], D[3, 1] = 0.5, -0.5                  # a1
    D[2, 2], D[6, 2] = 0.5, -0.5                  # a2
    D[5, 3], D[7, 3] = 0.5, -0.5                  # a5
    for c, k in ((0, 4), (4, 7), (8, 9)):         # s_diag = x_diag - i
        for cc in (0, 4, 8):
            D[cc, k] -= 1.0 / 3.0
        D[c, k] += 1.0
    D[1, 5] = D[3, 5] = 0.5                       # s1
    D[2, 6] = D[6, 6] = 0.5                       # s2
    D[5, 8] = D[7, 8] = 0.5                       # s5
    return D


def _recompose_matrix():
    R = np.zeros((10, 9), np.float32)
    R[0, 0] = R[0, 4] = R[0, 8] = 1.0             # i on the diagonal
    R[1, 1], R[1, 3] = 1.0, -1.0                  # a1
    R[2, 2], R[2, 6] = 1.0, -1.0                  # a2
    R[3, 5], R[3, 7] = 1.0, -1.0                  # a5
    R[4, 0] = 1.0                                 # s0
    R[5, 1] = R[5, 3] = 1.0                       # s1
    R[6, 2] = R[6, 6] = 1.0                       # s2
    R[7, 4] = 1.0                                 # s4
    R[8, 5] = R[8, 7] = 1.0                       # s5
    R[9, 8] = 1.0                                 # s8
    return R


# ----------------------------------------------------------------------------
# Kernel A: per-atom norm + decompose + linears_tensor[0..2] (fused matmul)
# ----------------------------------------------------------------------------
def _node_pre_kernel(x_ref, w1_ref, y_ref, inv_ref):
    H = HIDDEN
    xs = [x_ref[:, c * H:(c + 1) * H] for c in range(9)]
    nrm = xs[0] * xs[0]
    for c in range(1, 9):
        nrm = nrm + xs[c] * xs[c]
    inv = 1.0 / (nrm + 1.0)                       # exact divide (per review)
    inv_ref[...] = inv
    xn = jnp.concatenate([x * inv for x in xs], axis=1)            # [tm, 9H]
    # fused decompose(3x3 -> I/A/S channels) + per-symmetry linears, K = 9H
    y_ref[...] = jnp.dot(xn, w1_ref[...], preferred_element_type=jnp.float32)


# ----------------------------------------------------------------------------
# Kernel B: edge scalar MLP + index-driven gather / weight / scatter-add
# ----------------------------------------------------------------------------
def _message_kernel(src_ref, dst_ref, ea_ref, c_ref,
                    ws1_ref, bs1_ref, ws2_ref, bs2_ref, ws3_ref, bs3_ref,
                    y_ref, m_ref, eslab):
    f32 = jnp.float32
    te = ea_ref.shape[0]
    g = pl.program_id(0)
    base = g * te

    @pl.when(g == 0)
    def _():
        m_ref[...] = jnp.zeros_like(m_ref)

    # gather the 10-channel node slab row of every edge's source node
    def gather(e, carry):
        s = src_ref[base + e]
        eslab[pl.ds(e, 1), :] = y_ref[pl.ds(s, 1), :]
        return carry
    lax.fori_loop(0, te, gather, 0)

    # edge scalar MLP; third linear is pre-expanded so the result is already
    # the lane-dense per-channel factor slab [te, 10H]
    h = _silu(jnp.dot(ea_ref[...], ws1_ref[...], preferred_element_type=f32) + bs1_ref[...])
    h = _silu(jnp.dot(h, ws2_ref[...], preferred_element_type=f32) + bs2_ref[...])
    F = _silu(jnp.dot(h, ws3_ref[...], preferred_element_type=f32) + bs3_ref[...])
    eslab[...] = eslab[...] * (F * c_ref[...])    # padded edges have C == 0

    # scatter-accumulate into the resident [N, 10H] node accumulator
    def scatter(e, carry):
        d = dst_ref[base + e]
        m_ref[pl.ds(d, 1), :] = m_ref[pl.ds(d, 1), :] + eslab[pl.ds(e, 1), :]
        return carry
    lax.fori_loop(0, te, scatter, 0)


# ----------------------------------------------------------------------------
# Kernel C: O(3) product, linears_tensor[3..5] (fused matmul), residual
# ----------------------------------------------------------------------------
def _node_post_kernel(x_ref, inv_ref, y_ref, m_ref, w2_ref, o_ref):
    H = HIDDEN

    def recon(slab):
        i = slab[:, 0:H]
        a1 = slab[:, H:2 * H]; a2 = slab[:, 2 * H:3 * H]; a5 = slab[:, 3 * H:4 * H]
        s0 = slab[:, 4 * H:5 * H]; s1 = slab[:, 5 * H:6 * H]; s2 = slab[:, 6 * H:7 * H]
        s4 = slab[:, 7 * H:8 * H]; s5 = slab[:, 8 * H:9 * H]; s8 = slab[:, 9 * H:10 * H]
        return [i + s0, a1 + s1, a2 + s2,
                -a1 + s1, i + s4, a5 + s5,
                -a2 + s2, -a5 + s5, i + s8]

    Y = recon(y_ref[...])
    M = recon(m_ref[...])

    # T = msg @ Y + Y @ msg
    Ta = _mm3(M, Y)
    Tb = _mm3(Y, M)
    T = [Ta[c] + Tb[c] for c in range(9)]
    nrm = T[0] * T[0]
    for c in range(1, 9):
        nrm = nrm + T[c] * T[c]                   # norm(I+A+S) == norm(T)
    inv2 = 1.0 / (nrm + 1.0)

    tslab = jnp.concatenate([t * inv2 for t in T], axis=1)          # [tm, 9H]
    # fused decompose + linears_tensor[3..5] + recompose, K = 9H
    dslab = jnp.dot(tslab, w2_ref[...], preferred_element_type=jnp.float32)
    dX = [dslab[:, c * H:(c + 1) * H] for c in range(9)]
    dX2 = _mm3(dX, dX)

    inv = inv_ref[...]
    for c in range(9):                            # Xn recomputed here (short live range)
        o_ref[:, c * H:(c + 1) * H] = (x_ref[:, c * H:(c + 1) * H] * inv
                                       + dX[c] + dX2[c])


# ----------------------------------------------------------------------------
# Wrapper / glue
# ----------------------------------------------------------------------------
def cosine_cutoff(d):
    c = 0.5 * (jnp.cos(d * math.pi / CUTOFF_UPPER) + 1.0)
    return c * (d < CUTOFF_UPPER).astype(jnp.float32)


def expnorm_rbf(d):
    alpha = 5.0 / (CUTOFF_UPPER - CUTOFF_LOWER)
    start = math.exp(-CUTOFF_UPPER + CUTOFF_LOWER)
    means = jnp.linspace(start, 1.0, NUM_RBF).astype(jnp.float32)
    beta = (2.0 / NUM_RBF * (1.0 - start)) ** -2
    de = d[:, None]
    return cosine_cutoff(d)[:, None] * jnp.exp(
        -beta * (jnp.exp(alpha * (CUTOFF_LOWER - de)) - means) ** 2)


def _round_up(x, m):
    return ((x + m - 1) // m) * m


def interaction_forward(params, X, edge_index, edge_weight, edge_attr,
                        tile_n=64, tile_e=128):
    """Pallas-fused equivalent of torchmdnet Interaction.forward (O(3) group).

    X: [N, H, 3, 3], edge_index: [2, E] (row 0 = scatter dst, row 1 = gather
    src), edge_weight: [E], edge_attr: [E, num_rbf]. Returns X_new [N, H, 3, 3].
    """
    N, H = X.shape[0], X.shape[1]
    E = edge_weight.shape[0]
    assert H == HIDDEN

    tm = min(tile_n, _round_up(N, 8))
    te = min(tile_e, _round_up(E, 8))
    N_pad = _round_up(N, tm)
    E_pad = _round_up(E, te)

    # lane-dense node layout [N, 9H]; component c = 3a+b at lanes [c*H,(c+1)*H)
    X9 = jnp.transpose(X, (0, 2, 3, 1)).reshape(N, 9 * H)
    X9 = jnp.pad(X9, ((0, N_pad - N), (0, 0)))

    C = cosine_cutoff(edge_weight).reshape(E, 1)
    C = jnp.pad(C, ((0, E_pad - E), (0, 0)))      # padded edges -> zero factor
    ea = jnp.pad(edge_attr, ((0, E_pad - E), (0, 0)))
    src = jnp.pad(edge_index[1].astype(jnp.int32), (0, E_pad - E))
    dst = jnp.pad(edge_index[0].astype(jnp.int32), (0, E_pad - E))

    # ---- host-side weight fusion -------------------------------------------
    D = jnp.asarray(_decompose_matrix())          # [9, 10]
    R = jnp.asarray(_recompose_matrix())          # [10, 9]
    wt = params["t"]
    Wstk1 = jnp.stack([wt[0]] + [wt[1]] * 3 + [wt[2]] * 6, axis=0)   # [10,H,H]
    Wstk2 = jnp.stack([wt[3]] + [wt[4]] * 3 + [wt[5]] * 6, axis=0)
    W1f = jnp.einsum("ck,khj->chkj", D, Wstk1).reshape(9 * H, 10 * H)
    W2f = jnp.einsum("ck,khj,kd->chdj", D, Wstk2, R).reshape(9 * H, 9 * H)

    # third scalar linear expanded so lane block k of its output is the factor
    # for channel k (torch .reshape(E,H,3)[..., g(k)]), g = [0,1,1,1,2,...,2]
    cols, bias = [], []
    for gch in (0, 1, 1, 1, 2, 2, 2, 2, 2, 2):
        idx = jnp.arange(H) * 3 + gch
        cols.append(params["s3"]["w"][:, idx])
        bias.append(params["s3"]["b"][idx])
    ws3e = jnp.concatenate(cols, axis=1)                             # [2H,10H]
    bs3e = jnp.concatenate(bias, axis=0).reshape(1, 10 * H)

    cp_par = pltpu.CompilerParams(dimension_semantics=("parallel",),
                                  vmem_limit_bytes=_VMEM_LIMIT)
    cp_arb = pltpu.CompilerParams(dimension_semantics=("arbitrary",),
                                  vmem_limit_bytes=_VMEM_LIMIT)

    # ---- kernel A: node pre-pass (atom-tiled, parallel) ---------------------
    Y10, inv = pl.pallas_call(
        _node_pre_kernel,
        out_shape=(jax.ShapeDtypeStruct((N_pad, 10 * H), jnp.float32),
                   jax.ShapeDtypeStruct((N_pad, H), jnp.float32)),
        grid=(N_pad // tm,),
        in_specs=[pl.BlockSpec((tm, 9 * H), lambda i: (i, 0)),
                  pl.BlockSpec((9 * H, 10 * H), lambda i: (0, 0))],
        out_specs=(pl.BlockSpec((tm, 10 * H), lambda i: (i, 0)),
                   pl.BlockSpec((tm, H), lambda i: (i, 0))),
        compiler_params=cp_par,
    )(X9, W1f)

    # ---- kernel B: message passing (edge blocks, arbitrary, accumulator) ----
    M10 = pl.pallas_call(
        _message_kernel,
        out_shape=jax.ShapeDtypeStruct((N_pad, 10 * H), jnp.float32),
        grid_spec=pltpu.PrefetchScalarGridSpec(
            num_scalar_prefetch=2,
            grid=(E_pad // te,),
            in_specs=[pl.BlockSpec((te, NUM_RBF), lambda g, s, d: (g, 0)),
                      pl.BlockSpec((te, 1), lambda g, s, d: (g, 0)),
                      pl.BlockSpec((NUM_RBF, H), lambda g, s, d: (0, 0)),
                      pl.BlockSpec((1, H), lambda g, s, d: (0, 0)),
                      pl.BlockSpec((H, 2 * H), lambda g, s, d: (0, 0)),
                      pl.BlockSpec((1, 2 * H), lambda g, s, d: (0, 0)),
                      pl.BlockSpec((2 * H, 10 * H), lambda g, s, d: (0, 0)),
                      pl.BlockSpec((1, 10 * H), lambda g, s, d: (0, 0)),
                      pl.BlockSpec((N_pad, 10 * H), lambda g, s, d: (0, 0))],
            out_specs=pl.BlockSpec((N_pad, 10 * H), lambda g, s, d: (0, 0)),
            scratch_shapes=[pltpu.VMEM((te, 10 * H), jnp.float32)]),
        compiler_params=cp_arb,
    )(src, dst, ea, C,
      params["s1"]["w"], params["s1"]["b"].reshape(1, H),
      params["s2"]["w"], params["s2"]["b"].reshape(1, 2 * H),
      ws3e, bs3e, Y10)

    # ---- kernel C: node post-pass (atom-tiled, parallel) --------------------
    out9 = pl.pallas_call(
        _node_post_kernel,
        out_shape=jax.ShapeDtypeStruct((N_pad, 9 * H), jnp.float32),
        grid=(N_pad // tm,),
        in_specs=[pl.BlockSpec((tm, 9 * H), lambda i: (i, 0)),
                  pl.BlockSpec((tm, H), lambda i: (i, 0)),
                  pl.BlockSpec((tm, 10 * H), lambda i: (i, 0)),
                  pl.BlockSpec((tm, 10 * H), lambda i: (i, 0)),
                  pl.BlockSpec((9 * H, 9 * H), lambda i: (0, 0))],
        out_specs=pl.BlockSpec((tm, 9 * H), lambda i: (i, 0)),
        compiler_params=cp_par,
    )(X9, inv, Y10, M10, W2f)

    out9 = out9[:N]
    return jnp.transpose(out9.reshape(N, 3, 3, H), (0, 3, 1, 2))


# ----------------------------------------------------------------------------
# Pure-JAX reference (mirrors the PyTorch module) for correctness checking
# ----------------------------------------------------------------------------
def _decompose_ref(T):
    eye = jnp.eye(3, dtype=T.dtype)
    I = jnp.mean(jnp.diagonal(T, axis1=-2, axis2=-1), axis=-1)[..., None, None] * eye
    A = 0.5 * (T - jnp.swapaxes(T, -1, -2))
    S = 0.5 * (T + jnp.swapaxes(T, -1, -2)) - I
    return I, A, S


def interaction_reference(params, X, edge_index, edge_weight, edge_attr):
    N, H = X.shape[0], X.shape[1]
    C = cosine_cutoff(edge_weight)
    ea = edge_attr
    ea = jax.nn.silu(ea @ params["s1"]["w"] + params["s1"]["b"])
    ea = jax.nn.silu(ea @ params["s2"]["w"] + params["s2"]["b"])
    ea = jax.nn.silu(ea @ params["s3"]["w"] + params["s3"]["b"])
    ea = (ea * C[:, None]).reshape(-1, H, 3)

    lin = lambda T, w: jnp.einsum("nhab,hk->nkab", T, w)
    src, dst = edge_index[1], edge_index[0]

    def mp(factor, T):
        msg = factor[:, :, None, None] * T[src]
        return jnp.zeros((N, H, 3, 3), T.dtype).at[dst].add(msg)

    Xn = X / (jnp.sum(X ** 2, axis=(-2, -1)) + 1.0)[..., None, None]
    I, A, S = _decompose_ref(Xn)
    I, A, S = lin(I, params["t"][0]), lin(A, params["t"][1]), lin(S, params["t"][2])
    Y = I + A + S
    msg = mp(ea[..., 0], I) + mp(ea[..., 1], A) + mp(ea[..., 2], S)
    I, A, S = _decompose_ref(msg @ Y + Y @ msg)
    normp1 = (jnp.sum((I + A + S) ** 2, axis=(-2, -1)) + 1.0)[..., None, None]
    I, A, S = I / normp1, A / normp1, S / normp1
    I, A, S = lin(I, params["t"][3]), lin(A, params["t"][4]), lin(S, params["t"][5])
    dX = I + A + S
    return Xn + dX + dX @ dX


# ----------------------------------------------------------------------------
# Deterministic synthetic parameters / inputs
# ----------------------------------------------------------------------------
def init_params(key):
    def lin(k, fan_in, fan_out, bias=True):
        k1, k2 = jax.random.split(k)
        bound = 1.0 / math.sqrt(fan_in)
        p = {"w": jax.random.uniform(k1, (fan_in, fan_out), jnp.float32, -bound, bound)}
        if bias:
            p["b"] = jax.random.uniform(k2, (fan_out,), jnp.float32, -bound, bound)
        return p

    ks = jax.random.split(key, 9)
    return {
        "s1": lin(ks[0], NUM_RBF, HIDDEN),
        "s2": lin(ks[1], HIDDEN, 2 * HIDDEN),
        "s3": lin(ks[2], 2 * HIDDEN, 3 * HIDDEN),
        "t": [lin(ks[3 + i], HIDDEN, HIDDEN, bias=False)["w"] for i in range(6)],
    }


if __name__ == "__main__":
    key = jax.random.PRNGKey(0)
    kx, kp, kpar = jax.random.split(key, 3)

    n_atoms = 16
    pos = jax.random.uniform(kp, (n_atoms, 3), jnp.float32, 0.0, 2.0)
    ii, jj = jnp.meshgrid(jnp.arange(n_atoms), jnp.arange(n_atoms), indexing="ij")
    edge_index = jnp.stack([ii.reshape(-1), jj.reshape(-1)], axis=0).astype(jnp.int32)  # [2, 256]
    edge_vec = pos[edge_index[0]] - pos[edge_index[1]]
    edge_weight = jnp.sqrt(jnp.sum(edge_vec ** 2, axis=-1))                              # [256]
    edge_attr = expnorm_rbf(edge_weight)                                                 # [256, 16]
    X = jax.random.normal(kx, (n_atoms, HIDDEN, 3, 3), jnp.float32)
    params = init_params(kpar)

    # small tiles so the example exercises a 2-step node grid and a 4-step edge grid
    fwd = jax.jit(functools.partial(interaction_forward, tile_n=8, tile_e=64))
    out = fwd(params, X, edge_index, edge_weight, edge_attr)
    jax.block_until_ready(out)

    ref = interaction_reference(params, X, edge_index, edge_weight, edge_attr)
    err = float(jnp.max(jnp.abs(out - ref)))
    assert out.shape == (n_atoms, HIDDEN, 3, 3)
    assert bool(jnp.all(jnp.isfinite(out)))
    assert bool(jnp.allclose(out, ref, rtol=2e-3, atol=2e-3)), err
    print("KERNEL_OK")
</pallas_src>

<mosaic_0001>
module attributes {stable_mosaic.version = 11 : i64} {
  func.func @_node_pre_kernel(%arg0: i32, %arg1: memref<8x288xf32, #tpu.memory_space<vmem>>, %arg2: memref<288x320xf32, #tpu.memory_space<vmem>>, %arg3: memref<8x320xf32, #tpu.memory_space<vmem>>, %arg4: memref<8x32xf32, #tpu.memory_space<vmem>>) attributes {dimension_semantics = [#tpu.dimension_semantics<parallel>], iteration_bounds = array<i64: 2>, scalar_prefetch = 0 : i64, scratch_operands = 0 : i64, tpu.core_type = #tpu.core_type<tc>, window_params = [{transform_indices = @transform_0, window_bounds = array<i64: 8, 288>}, {pipeline_mode = #tpu.pipeline_mode<synchronous>, transform_indices = @transform_1, window_bounds = array<i64: 288, 320>}, {transform_indices = @transform_2, window_bounds = array<i64: 8, 320>}, {transform_indices = @transform_3, window_bounds = array<i64: 8, 32>}]} {
    %c0 = arith.constant 0 : index
    %c0_0 = arith.constant 0 : index
    %0 = vector.load %arg1[%c0, %c0_0] : memref<8x288xf32, #tpu.memory_space<vmem>>, vector<8x32xf32>
    %c0_1 = arith.constant 0 : index
    %c32 = arith.constant 32 : index
    %1 = vector.load %arg1[%c0_1, %c32] : memref<8x288xf32, #tpu.memory_space<vmem>>, vector<8x32xf32>
    %c0_2 = arith.constant 0 : index
    %c64 = arith.constant 64 : index
    %2 = vector.load %arg1[%c0_2, %c64] : memref<8x288xf32, #tpu.memory_space<vmem>>, vector<8x32xf32>
    %c0_3 = arith.constant 0 : index
    %c96 = arith.constant 96 : index
    %3 = vector.load %arg1[%c0_3, %c96] : memref<8x288xf32, #tpu.memory_space<vmem>>, vector<8x32xf32>
    %c0_4 = arith.constant 0 : index
    %c128 = arith.constant 128 : index
    %4 = vector.load %arg1[%c0_4, %c128] : memref<8x288xf32, #tpu.memory_space<vmem>>, vector<8x32xf32>
    %c0_5 = arith.constant 0 : index
    %c160 = arith.constant 160 : index
    %5 = vector.load %arg1[%c0_5, %c160] : memref<8x288xf32, #tpu.memory_space<vmem>>, vector<8x32xf32>
    %c0_6 = arith.constant 0 : index
    %c192 = arith.constant 192 : index
    %6 = vector.load %arg1[%c0_6, %c192] : memref<8x288xf32, #tpu.memory_space<vmem>>, vector<8x32xf32>
    %c0_7 = arith.constant 0 : index
    %c224 = arith.constant 224 : index
    %7 = vector.load %arg1[%c0_7, %c224] : memref<8x288xf32, #tpu.memory_space<vmem>>, vector<8x32xf32>
    %c0_8 = arith.constant 0 : index
    %c256 = arith.constant 256 : index
    %8 = vector.load %arg1[%c0_8, %c256] : memref<8x288xf32, #tpu.memory_space<vmem>>, vector<8x32xf32>
    %9 = arith.mulf %0, %0 : vector<8x32xf32>
    %10 = arith.mulf %1, %1 : vector<8x32xf32>
    %11 = arith.addf %9, %10 : vector<8x32xf32>
    %12 = arith.mulf %2, %2 : vector<8x32xf32>
    %13 = arith.addf %11, %12 : vector<8x32xf32>
    %14 = arith.mulf %3, %3 : vector<8x32xf32>
    %15 = arith.addf %13, %14 : vector<8x32xf32>
    %16 = arith.mulf %4, %4 : vector<8x32xf32>
    %17 = arith.addf %15, %16 : vector<8x32xf32>
    %18 = arith.mulf %5, %5 : vector<8x32xf32>
    %19 = arith.addf %17, %18 : vector<8x32xf32>
    %20 = arith.mulf %6, %6 : vector<8x32xf32>
    %21 = arith.addf %19, %20 : vector<8x32xf32>
    %22 = arith.mulf %7, %7 : vector<8x32xf32>
    %23 = arith.addf %21, %22 : vector<8x32xf32>
    %24 = arith.mulf %8, %8 : vector<8x32xf32>
    %25 = arith.addf %23, %24 : vector<8x32xf32>
    %cst = arith.constant 1.000000e+00 : f32
    %26 = vector.broadcast %cst : f32 to vector<8x32xf32>
    %27 = arith.addf %25, %26 : vector<8x32xf32>
    %cst_9 = arith.constant 1.000000e+00 : f32
    %28 = vector.broadcast %cst_9 : f32 to vector<8x32xf32>
    %29 = arith.divf %28, %27 : vector<8x32xf32>
    %c0_10 = arith.constant 0 : index
    %c0_11 = arith.constant 0 : index
    %30 = vector.load %arg4[%c0_10, %c0_11] : memref<8x32xf32, #tpu.memory_space<vmem>>, vector<8x32xf32>
    tpu.vector_store %arg4[%c0_10, %c0_11], %29 {strides = array<i32>} : memref<8x32xf32, #tpu.memory_space<vmem>>, vector<8x32xf32>,
    %31 = arith.mulf %0, %29 : vector<8x32xf32>
    %32 = arith.mulf %1, %29 : vector<8x32xf32>
    %33 = arith.mulf %2, %29 : vector<8x32xf32>
    %34 = arith.mulf %3, %29 : vector<8x32xf32>
    %35 = arith.mulf %4, %29 : vector<8x32xf32>
    %36 = arith.mulf %5, %29 : vector<8x32xf32>
    %37 = arith.mulf %6, %29 : vector<8x32xf32>
    %38 = arith.mulf %7, %29 : vector<8x32xf32>
    %39 = arith.mulf %8, %29 : vector<8x32xf32>
    %40 = tpu.concatenate %31, %32, %33, %34, %35, %36, %37, %38, %39 in 1 : vector<8x32xf32>, vector<8x32xf32>, vector<8x32xf32>, vector<8x32xf32>, vector<8x32xf32>, vector<8x32xf32>, vector<8x32xf32>, vector<8x32xf32>, vector<8x32xf32> -> vector<8x288xf32>
    %c0_12 = arith.constant 0 : index
    %c0_13 = arith.constant 0 : index
    %41 = vector.load %arg2[%c0_12, %c0_13] : memref<288x320xf32, #tpu.memory_space<vmem>>, vector<288x320xf32>
    %cst_14 = arith.constant dense<0.000000e+00> : vector<8x320xf32>
    %42 = tpu.matmul %40, %41, %cst_14 {dimension_numbers = #tpu.dot_dimension_numbers<[1], [0], [0], [1], [0, 0, 1, 1], [], []>} : vector<8x288xf32>, vector<288x320xf32>, vector<8x320xf32> -> vector<8x320xf32>
    %c0_15 = arith.constant 0 : index
    %c0_16 = arith.constant 0 : index
    %43 = vector.load %arg3[%c0_15, %c0_16] : memref<8x320xf32, #tpu.memory_space<vmem>>, vector<8x320xf32>
    tpu.vector_store %arg3[%c0_15, %c0_16], %42 {strides = array<i32>} : memref<8x320xf32, #tpu.memory_space<vmem>>, vector<8x320xf32>,
    return
  }
  func.func @transform_0(%arg0: i32) -> (i32, i32) {
    %c0_i32 = arith.constant 0 : i32
    %c0_i32_0 = arith.constant 0 : i32
    return %arg0, %c0_i32 : i32, i32
  }
  func.func @transform_1(%arg0: i32) -> (i32, i32) {
    %c0_i32 = arith.constant 0 : i32
    %c0_i32_0 = arith.constant 0 : i32
    %c0_i32_1 = arith.constant 0 : i32
    return %c0_i32, %c0_i32_0 : i32, i32
  }
  func.func @transform_2(%arg0: i32) -> (i32, i32) {
    %c0_i32 = arith.constant 0 : i32
    %c0_i32_0 = arith.constant 0 : i32
    return %arg0, %c0_i32 : i32, i32
  }
  func.func @transform_3(%arg0: i32) -> (i32, i32) {
    %c0_i32 = arith.constant 0 : i32
    %c0_i32_0 = arith.constant 0 : i32
    return %arg0, %c0_i32 : i32, i32
  }
}

module attributes {stable_mosaic.version = 11 : i64} {
  func.func @_message_kernel(%arg0: i32, %arg1: memref<256xi32, #tpu.memory_space<smem>>, %arg2: memref<256xi32, #tpu.memory_space<smem>>, %arg3: memref<64x16xf32, #tpu.memory_space<vmem>>, %arg4: memref<64x1xf32, #tpu.memory_space<vmem>>, %arg5: memref<16x32xf32, #tpu.memory_space<vmem>>, %arg6: memref<1x32xf32, #tpu.memory_space<vmem>>, %arg7: memref<32x64xf32, #tpu.memory_space<vmem>>, %arg8: memref<1x64xf32, #tpu.memory_space<vmem>>, %arg9: memref<64x320xf32, #tpu.memory_space<vmem>>, %arg10: memref<1x320xf32, #tpu.memory_space<vmem>>, %arg11: memref<16x320xf32, #tpu.memory_space<vmem>>, %arg12: memref<16x320xf32, #tpu.memory_space<vmem>>, %arg13: memref<64x320xf32, #tpu.memory_space<vmem>>) attributes {dimension_semantics = [#tpu.dimension_semantics<arbitrary>], iteration_bounds = array<i64: 4>, scalar_prefetch = 2 : i64, scratch_operands = 1 : i64, tpu.core_type = #tpu.core_type<tc>, window_params = [{transform_indices = @transform_0, window_bounds = array<i64: 64, 16>}, {transform_indices = @transform_1, window_bounds = array<i64: 64, 1>}, {pipeline_mode = #tpu.pipeline_mode<synchronous>, transform_indices = @transform_2, window_bounds = array<i64: 16, 32>}, {pipeline_mode = #tpu.pipeline_mode<synchronous>, transform_indices = @transform_3, window_bounds = array<i64: 1, 32>}, {pipeline_mode = #tpu.pipeline_mode<synchronous>, transform_indices = @transform_4, window_bounds = array<i64: 32, 64>}, {pipeline_mode = #tpu.pipeline_mode<synchronous>, transform_indices = @transform_5, window_bounds = array<i64: 1, 64>}, {pipeline_mode = #tpu.pipeline_mode<synchronous>, transform_indices = @transform_6, window_bounds = array<i64: 64, 320>}, {pipeline_mode = #tpu.pipeline_mode<synchronous>, transform_indices = @transform_7, window_bounds = array<i64: 1, 320>}, {pipeline_mode = #tpu.pipeline_mode<synchronous>, transform_indices = @transform_8, window_bounds = array<i64: 16, 320>}, {pipeline_mode = #tpu.pipeline_mode<synchronous>, transform_indices = @transform_9, window_bounds = array<i64: 16, 320>}]} {
    %c64_i32 = arith.constant 64 : i32
    %0 = arith.muli %arg0, %c64_i32 : i32
    %c0_i32 = arith.constant 0 : i32
    %1 = arith.cmpi eq, %arg0, %c0_i32 : i32
    %2 = arith.extui %1 : i1 to i32
    %c0_i32_0 = arith.constant 0 : i32
    %3 = arith.cmpi ne, %2, %c0_i32_0 : i32
    scf.if %3 {
      %cst_32 = arith.constant 0.000000e+00 : f32
      %46 = vector.broadcast %cst_32 : f32 to vector<16x320xf32>
      %c0_33 = arith.constant 0 : index
      %c0_34 = arith.constant 0 : index
      %47 = vector.load %arg12[%c0_33, %c0_34] : memref<16x320xf32, #tpu.memory_space<vmem>>, vector<16x320xf32>
      tpu.vector_store %arg12[%c0_33, %c0_34], %46 {strides = array<i32>} : memref<16x320xf32, #tpu.memory_space<vmem>>, vector<16x320xf32>,
    } else {
    }
    %c0_i32_1 = arith.constant 0 : i32
    %c64_i32_2 = arith.constant 64 : i32
    %4 = arith.addi %c0_i32_1, %c64_i32_2 : i32
    %c1_i32 = arith.constant 1 : i32
    scf.for %arg14 = %c0_i32_1 to %4 step %c1_i32  : i32 {
      %46 = arith.addi %0, %arg14 : i32
      %47 = arith.index_cast %46 : i32 to index
      %48 = memref.load %arg1[%47] : memref<256xi32, #tpu.memory_space<smem>>
      %49 = arith.index_cast %48 : i32 to index
      %c0_32 = arith.constant 0 : index
      %50 = vector.load %arg11[%49, %c0_32] : memref<16x320xf32, #tpu.memory_space<vmem>>, vector<1x320xf32>
      %51 = arith.index_cast %arg14 : i32 to index
      %c0_33 = arith.constant 0 : index
      %52 = vector.load %arg13[%51, %c0_33] : memref<64x320xf32, #tpu.memory_space<vmem>>, vector<1x320xf32>
      tpu.vector_store %arg13[%51, %c0_33], %50 {strides = array<i32>} : memref<64x320xf32, #tpu.memory_space<vmem>>, vector<1x320xf32>,
    }
    %c64_i32_3 = arith.constant 64 : i32
    %c0 = arith.constant 0 : index
    %c0_4 = arith.constant 0 : index
    %5 = vector.load %arg3[%c0, %c0_4] : memref<64x16xf32, #tpu.memory_space<vmem>>, vector<64x16xf32>
    %c0_5 = arith.constant 0 : index
    %c0_6 = arith.constant 0 : index
    %6 = vector.load %arg5[%c0_5, %c0_6] : memref<16x32xf32, #tpu.memory_space<vmem>>, vector<16x32xf32>
    %cst = arith.constant dense<0.000000e+00> : vector<64x32xf32>
    %7 = tpu.matmul %5, %6, %cst {dimension_numbers = #tpu.dot_dimension_numbers<[1], [0], [0], [1], [0, 0, 1, 1], [], []>} : vector<64x16xf32>, vector<16x32xf32>, vector<64x32xf32> -> vector<64x32xf32>
    %c0_7 = arith.constant 0 : index
    %c0_8 = arith.constant 0 : index
    %8 = vector.load %arg6[%c0_7, %c0_8] : memref<1x32xf32, #tpu.memory_space<vmem>>, vector<1x32xf32>
    %9 = vector.broadcast %8 : vector<1x32xf32> to vector<64x32xf32>
    %10 = arith.addf %7, %9 : vector<64x32xf32>
    %11 = arith.negf %10 : vector<64x32xf32>
    %12 = math.exp %11 : vector<64x32xf32>
    %cst_9 = arith.constant 1.000000e+00 : f32
    %13 = vector.broadcast %cst_9 : f32 to vector<64x32xf32>
    %14 = arith.addf %13, %12 : vector<64x32xf32>
    %15 = arith.divf %13, %14 : vector<64x32xf32>
    %16 = arith.mulf %10, %15 : vector<64x32xf32>
    %c0_10 = arith.constant 0 : index
    %c0_11 = arith.constant 0 : index
    %17 = vector.load %arg7[%c0_10, %c0_11] : memref<32x64xf32, #tpu.memory_space<vmem>>, vector<32x64xf32>
    %cst_12 = arith.constant dense<0.000000e+00> : vector<64x64xf32>
    %18 = tpu.matmul %16, %17, %cst_12 {dimension_numbers = #tpu.dot_dimension_numbers<[1], [0], [0], [1], [0, 0, 1, 1], [], []>} : vector<64x32xf32>, vector<32x64xf32>, vector<64x64xf32> -> vector<64x64xf32>
    %c0_13 = arith.constant 0 : index
    %c0_14 = arith.constant 0 : index
    %19 = vector.load %arg8[%c0_13, %c0_14] : memref<1x64xf32, #tpu.memory_space<vmem>>, vector<1x64xf32>
    %20 = vector.broadcast %19 : vector<1x64xf32> to vector<64x64xf32>
    %21 = arith.addf %18, %20 : vector<64x64xf32>
    %22 = arith.negf %21 : vector<64x64xf32>
    %23 = math.exp %22 : vector<64x64xf32>
    %cst_15 = arith.constant 1.000000e+00 : f32
    %24 = vector.broadcast %cst_15 : f32 to vector<64x64xf32>
    %25 = arith.addf %24, %23 : vector<64x64xf32>
    %26 = arith.divf %24, %25 : vector<64x64xf32>
    %27 = arith.mulf %21, %26 : vector<64x64xf32>
    %c0_16 = arith.constant 0 : index
    %c0_17 = arith.constant 0 : index
    %28 = vector.load %arg9[%c0_16, %c0_17] : memref<64x320xf32, #tpu.memory_space<vmem>>, vector<64x320xf32>
    %cst_18 = arith.constant dense<0.000000e+00> : vector<64x320xf32>
    %29 = tpu.matmul %27, %28, %cst_18 {dimension_numbers = #tpu.dot_dimension_numbers<[1], [0], [0], [1], [0, 0, 1, 1], [], []>} : vector<64x64xf32>, vector<64x320xf32>, vector<64x320xf32> -> vector<64x320xf32>
    %c0_19 = arith.constant 0 : index
    %c0_20 = arith.constant 0 : index
    %30 = vector.load %arg10[%c0_19, %c0_20] : memref<1x320xf32, #tpu.memory_space<vmem>>, vector<1x320xf32>
    %31 = vector.broadcast %30 : vector<1x320xf32> to vector<64x320xf32>
    %32 = arith.addf %29, %31 : vector<64x320xf32>
    %33 = arith.negf %32 : vector<64x320xf32>
    %34 = math.exp %33 : vector<64x320xf32>
    %cst_21 = arith.constant 1.000000e+00 : f32
    %35 = vector.broadcast %cst_21 : f32 to vector<64x320xf32>
    %36 = arith.addf %35, %34 : vector<64x320xf32>
    %37 = arith.divf %35, %36 : vector<64x320xf32>
    %38 = arith.mulf %32, %37 : vector<64x320xf32>
    %c0_22 = arith.constant 0 : index
    %c0_23 = arith.constant 0 : index
    %39 = vector.load %arg13[%c0_22, %c0_23] : memref<64x320xf32, #tpu.memory_space<vmem>>, vector<64x320xf32>
    %c0_24 = arith.constant 0 : index
    %c0_25 = arith.constant 0 : index
    %40 = vector.load %arg4[%c0_24, %c0_25] : memref<64x1xf32, #tpu.memory_space<vmem>>, vector<64x1xf32>
    %41 = vector.broadcast %40 : vector<64x1xf32> to vector<64x320xf32>
    %42 = arith.mulf %38, %41 : vector<64x320xf32>
    %43 = arith.mulf %39, %42 : vector<64x320xf32>
    %c0_26 = arith.constant 0 : index
    %c0_27 = arith.constant 0 : index
    %44 = vector.load %arg13[%c0_26, %c0_27] : memref<64x320xf32, #tpu.memory_space<vmem>>, vector<64x320xf32>
    tpu.vector_store %arg13[%c0_26, %c0_27], %43 {strides = array<i32>} : memref<64x320xf32, #tpu.memory_space<vmem>>, vector<64x320xf32>,
    %c0_i32_28 = arith.constant 0 : i32
    %c64_i32_29 = arith.constant 64 : i32
    %45 = arith.addi %c0_i32_28, %c64_i32_29 : i32
    %c1_i32_30 = arith.constant 1 : i32
    scf.for %arg14 = %c0_i32_28 to %45 step %c1_i32_30  : i32 {
      %46 = arith.addi %0, %arg14 : i32
      %47 = arith.index_cast %46 : i32 to index
      %48 = memref.load %arg2[%47] : memref<256xi32, #tpu.memory_space<smem>>
      %49 = arith.index_cast %48 : i32 to index
      %c0_32 = arith.constant 0 : index
      %50 = vector.load %arg12[%49, %c0_32] : memref<16x320xf32, #tpu.memory_space<vmem>>, vector<1x320xf32>
      %51 = arith.index_cast %arg14 : i32 to index
      %c0_33 = arith.constant 0 : index
      %52 = vector.load %arg13[%51, %c0_33] : memref<64x320xf32, #tpu.memory_space<vmem>>, vector<1x320xf32>
      %53 = arith.addf %50, %52 : vector<1x320xf32>
      %54 = arith.index_cast %48 : i32 to index
      %c0_34 = arith.constant 0 : index
      %55 = vector.load %arg12[%54, %c0_34] : memref<16x320xf32, #tpu.memory_space<vmem>>, vector<1x320xf32>
      tpu.vector_store %arg12[%54, %c0_34], %53 {strides = array<i32>} : memref<16x320xf32, #tpu.memory_space<vmem>>, vector<1x320xf32>,
    }
    %c64_i32_31 = arith.constant 64 : i32
    return
  }
  func.func @transform_0(%arg0: i32, %arg1: memref<256xi32, #tpu.memory_space<smem>>, %arg2: memref<256xi32, #tpu.memory_space<smem>>) -> (i32, i32) {
    %c0_i32 = arith.constant 0 : i32
    %c0_i32_0 = arith.constant 0 : i32
    return %arg0, %c0_i32 : i32, i32
  }
  func.func @transform_1(%arg0: i32, %arg1: memref<256xi32, #tpu.memory_space<smem>>, %arg2: memref<256xi32, #tpu.memory_space<smem>>) -> (i32, i32) {
    %c0_i32 = arith.constant 0 : i32
    %c0_i32_0 = arith.constant 0 : i32
    return %arg0, %c0_i32 : i32, i32
  }
  func.func @transform_2(%arg0: i32, %arg1: memref<256xi32, #tpu.memory_space<smem>>, %arg2: memref<256xi32, #tpu.memory_space<smem>>) -> (i32, i32) {
    %c0_i32 = arith.constant 0 : i32
    %c0_i32_0 = arith.constant 0 : i32
    %c0_i32_1 = arith.constant 0 : i32
    return %c0_i32, %c0_i32_0 : i32, i32
  }
  func.func @transform_3(%arg0: i32, %arg1: memref<256xi32, #tpu.memory_space<smem>>, %arg2: memref<256xi32, #tpu.memory_space<smem>>) -> (i32, i32) {
    %c0_i32 = arith.constant 0 : i32
    %c0_i32_0 = arith.constant 0 : i32
    %c0_i32_1 = arith.constant 0 : i32
    return %c0_i32, %c0_i32_0 : i32, i32
  }
  func.func @transform_4(%arg0: i32, %arg1: memref<256xi32, #tpu.memory_space<smem>>, %arg2: memref<256xi32, #tpu.memory_space<smem>>) -> (i32, i32) {
    %c0_i32 = arith.constant 0 : i32
    %c0_i32_0 = arith.constant 0 : i32
    %c0_i32_1 = arith.constant 0 : i32
    return %c0_i32, %c0_i32_0 : i32, i32
  }
  func.func @transform_5(%arg0: i32, %arg1: memref<256xi32, #tpu.memory_space<smem>>, %arg2: memref<256xi32, #tpu.memory_space<smem>>) -> (i32, i32) {
    %c0_i32 = arith.constant 0 : i32
    %c0_i32_0 = arith.constant 0 : i32
    %c0_i32_1 = arith.constant 0 : i32
    return %c0_i32, %c0_i32_0 : i32, i32
  }
  func.func @transform_6(%arg0: i32, %arg1: memref<256xi32, #tpu.memory_space<smem>>, %arg2: memref<256xi32, #tpu.memory_space<smem>>) -> (i32, i32) {
    %c0_i32 = arith.constant 0 : i32
    %c0_i32_0 = arith.constant 0 : i32
    %c0_i32_1 = arith.constant 0 : i32
    return %c0_i32, %c0_i32_0 : i32, i32
  }
  func.func @transform_7(%arg0: i32, %arg1: memref<256xi32, #tpu.memory_space<smem>>, %arg2: memref<256xi32, #tpu.memory_space<smem>>) -> (i32, i32) {
    %c0_i32 = arith.constant 0 : i32
    %c0_i32_0 = arith.constant 0 : i32
    %c0_i32_1 = arith.constant 0 : i32
    return %c0_i32, %c0_i32_0 : i32, i32
  }
  func.func @transform_8(%arg0: i32, %arg1: memref<256xi32, #tpu.memory_space<smem>>, %arg2: memref<256xi32, #tpu.memory_space<smem>>) -> (i32, i32) {
    %c0_i32 = arith.constant 0 : i32
    %c0_i32_0 = arith.constant 0 : i32
    %c0_i32_1 = arith.constant 0 : i32
    return %c0_i32, %c0_i32_0 : i32, i32
  }
  func.func @transform_9(%arg0: i32, %arg1: memref<256xi32, #tpu.memory_space<smem>>, %arg2: memref<256xi32, #tpu.memory_space<smem>>) -> (i32, i32) {
    %c0_i32 = arith.constant 0 : i32
    %c0_i32_0 = arith.constant 0 : i32
    %c0_i32_1 = arith.constant 0 : i32
    return %c0_i32, %c0_i32_0 : i32, i32
  }
}

module attributes {stable_mosaic.version = 11 : i64} {
  func.func @_node_post_kernel(%arg0: i32, %arg1: memref<8x288xf32, #tpu.memory_space<vmem>>, %arg2: memref<8x32xf32, #tpu.memory_space<vmem>>, %arg3: memref<8x320xf32, #tpu.memory_space<vmem>>, %arg4: memref<8x320xf32, #tpu.memory_space<vmem>>, %arg5: memref<288x288xf32, #tpu.memory_space<vmem>>, %arg6: memref<8x288xf32, #tpu.memory_space<vmem>>) attributes {dimension_semantics = [#tpu.dimension_semantics<parallel>], iteration_bounds = array<i64: 2>, scalar_prefetch = 0 : i64, scratch_operands = 0 : i64, tpu.core_type = #tpu.core_type<tc>, window_params = [{transform_indices = @transform_0, window_bounds = array<i64: 8, 288>}, {transform_indices = @transform_1, window_bounds = array<i64: 8, 32>}, {transform_indices = @transform_2, window_bounds = array<i64: 8, 320>}, {transform_indices = @transform_3, window_bounds = array<i64: 8, 320>}, {pipeline_mode = #tpu.pipeline_mode<synchronous>, transform_indices = @transform_4, window_bounds = array<i64: 288, 288>}, {transform_indices = @transform_5, window_bounds = array<i64: 8, 288>}]} {
    %c0 = arith.constant 0 : index
    %c0_0 = arith.constant 0 : index
    %0 = vector.load %arg3[%c0, %c0_0] : memref<8x320xf32, #tpu.memory_space<vmem>>, vector<8x320xf32>
    %1 = vector.extract_strided_slice %0 {offsets = [0, 0], sizes = [8, 32], strides = [1, 1]} : vector<8x320xf32> to vector<8x32xf32>
    %2 = vector.extract_strided_slice %0 {offsets = [0, 32], sizes = [8, 32], strides = [1, 1]} : vector<8x320xf32> to vector<8x32xf32>
    %3 = vector.extract_strided_slice %0 {offsets = [0, 64], sizes = [8, 32], strides = [1, 1]} : vector<8x320xf32> to vector<8x32xf32>
    %4 = vector.extract_strided_slice %0 {offsets = [0, 96], sizes = [8, 32], strides = [1, 1]} : vector<8x320xf32> to vector<8x32xf32>
    %5 = vector.extract_strided_slice %0 {offsets = [0, 128], sizes = [8, 32], strides = [1, 1]} : vector<8x320xf32> to vector<8x32xf32>
    %6 = vector.extract_strided_slice %0 {offsets = [0, 160], sizes = [8, 32], strides = [1, 1]} : vector<8x320xf32> to vector<8x32xf32>
    %7 = vector.extract_strided_slice %0 {offsets = [0, 192], sizes = [8, 32], strides = [1, 1]} : vector<8x320xf32> to vector<8x32xf32>
    %8 = vector.extract_strided_slice %0 {offsets = [0, 224], sizes = [8, 32], strides = [1, 1]} : vector<8x320xf32> to vector<8x32xf32>
    %9 = vector.extract_strided_slice %0 {offsets = [0, 256], sizes = [8, 32], strides = [1, 1]} : vector<8x320xf32> to vector<8x32xf32>
    %10 = vector.extract_strided_slice %0 {offsets = [0, 288], sizes = [8, 32], strides = [1, 1]} : vector<8x320xf32> to vector<8x32xf32>
    %11 = arith.addf %1, %5 : vector<8x32xf32>
    %12 = arith.addf %2, %6 : vector<8x32xf32>
    %13 = arith.addf %3, %7 : vector<8x32xf32>
    %cst = arith.constant 0.000000e+00 : f32
    %14 = vector.broadcast %cst : f32 to vector<8x32xf32>
    %15 = arith.subf %14, %2 : vector<8x32xf32>
    %16 = arith.addf %15, %6 : vector<8x32xf32>
    %17 = arith.addf %1, %8 : vector<8x32xf32>
    %18 = arith.addf %4, %9 : vector<8x32xf32>
    %cst_1 = arith.constant 0.000000e+00 : f32
    %19 = vector.broadcast %cst_1 : f32 to vector<8x32xf32>
    %20 = arith.subf %19, %3 : vector<8x32xf32>
    %21 = arith.addf %20, %7 : vector<8x32xf32>
    %cst_2 = arith.constant 0.000000e+00 : f32
    %22 = vector.broadcast %cst_2 : f32 to vector<8x32xf32>
    %23 = arith.subf %22, %4 : vector<8x32xf32>
    %24 = arith.addf %23, %9 : vector<8x32xf32>
    %25 = arith.addf %1, %10 : vector<8x32xf32>
    %c0_3 = arith.constant 0 : index
    %c0_4 = arith.constant 0 : index
    %26 = vector.load %arg4[%c0_3, %c0_4] : memref<8x320xf32, #tpu.memory_space<vmem>>, vector<8x320xf32>
    %27 = vector.extract_strided_slice %26 {offsets = [0, 0], sizes = [8, 32], strides = [1, 1]} : vector<8x320xf32> to vector<8x32xf32>
    %28 = vector.extract_strided_slice %26 {offsets = [0, 32], sizes = [8, 32], strides = [1, 1]} : vector<8x320xf32> to vector<8x32xf32>
    %29 = vector.extract_strided_slice %26 {offsets = [0, 64], sizes = [8, 32], strides = [1, 1]} : vector<8x320xf32> to vector<8x32xf32>
    %30 = vector.extract_strided_slice %26 {offsets = [0, 96], sizes = [8, 32], strides = [1, 1]} : vector<8x320xf32> to vector<8x32xf32>
    %31 = vector.extract_strided_slice %26 {offsets = [0, 128], sizes = [8, 32], strides = [1, 1]} : vector<8x320xf32> to vector<8x32xf32>
    %32 = vector.extract_strided_slice %26 {offsets = [0, 160], sizes = [8, 32], strides = [1, 1]} : vector<8x320xf32> to vector<8x32xf32>
    %33 = vector.extract_strided_slice %26 {offsets = [0, 192], sizes = [8, 32], strides = [1, 1]} : vector<8x320xf32> to vector<8x32xf32>
    %34 = vector.extract_strided_slice %26 {offsets = [0, 224], sizes = [8, 32], strides = [1, 1]} : vector<8x320xf32> to vector<8x32xf32>
    %35 = vector.extract_strided_slice %26 {offsets = [0, 256], sizes = [8, 32], strides = [1, 1]} : vector<8x320xf32> to vector<8x32xf32>
    %36 = vector.extract_strided_slice %26 {offsets = [0, 288], sizes = [8, 32], strides = [1, 1]} : vector<8x320xf32> to vector<8x32xf32>
    %37 = arith.addf %27, %31 : vector<8x32xf32>
    %38 = arith.addf %28, %32 : vector<8x32xf32>
    %39 = arith.addf %29, %33 : vector<8x32xf32>
    %cst_5 = arith.constant 0.000000e+00 : f32
    %40 = vector.broadcast %cst_5 : f32 to vector<8x32xf32>
    %41 = arith.subf %40, %28 : vector<8x32xf32>
    %42 = arith.addf %41, %32 : vector<8x32xf32>
    %43 = arith.addf %27, %34 : vector<8x32xf32>
    %44 = arith.addf %30, %35 : vector<8x32xf32>
    %cst_6 = arith.constant 0.000000e+00 : f32
    %45 = vector.broadcast %cst_6 : f32 to vector<8x32xf32>
    %46 = arith.subf %45, %29 : vector<8x32xf32>
    %47 = arith.addf %46, %33 : vector<8x32xf32>
    %cst_7 = arith.constant 0.000000e+00 : f32
    %48 = vector.broadcast %cst_7 : f32 to vector<8x32xf32>
    %49 = arith.subf %48, %30 : vector<8x32xf32>
    %50 = arith.addf %49, %35 : vector<8x32xf32>
    %51 = arith.addf %27, %36 : vector<8x32xf32>
    %52 = arith.mulf %37, %11 : vector<8x32xf32>
    %53 = arith.mulf %38, %16 : vector<8x32xf32>
    %54 = arith.addf %52, %53 : vector<8x32xf32>
    %55 = arith.mulf %39, %21 : vector<8x32xf32>
    %56 = arith.addf %54, %55 : vector<8x32xf32>
    %57 = arith.mulf %37, %12 : vector<8x32xf32>
    %58 = arith.mulf %38, %17 : vector<8x32xf32>
    %59 = arith.addf %57, %58 : vector<8x32xf32>
    %60 = arith.mulf %39, %24 : vector<8x32xf32>
    %61 = arith.addf %59, %60 : vector<8x32xf32>
    %62 = arith.mulf %37, %13 : vector<8x32xf32>
    %63 = arith.mulf %38, %18 : vector<8x32xf32>
    %64 = arith.addf %62, %63 : vector<8x32xf32>
    %65 = arith.mulf %39, %25 : vector<8x32xf32>
    %66 = arith.addf %64, %65 : vector<8x32xf32>
    %67 = arith.mulf %42, %11 : vector<8x32xf32>
    %68 = arith.mulf %43, %16 : vector<8x32xf32>
    %69 = arith.addf %67, %68 : vector<8x32xf32>
    %70 = arith.mulf %44, %21 : vector<8x32xf32>
    %71 = arith.addf %69, %70 : vector<8x32xf32>
    %72 = arith.mulf %42, %12 : vector<8x32xf32>
    %73 = arith.mulf %43, %17 : vector<8x32xf32>
    %74 = arith.addf %72, %73 : vector<8x32xf32>
    %75 = arith.mulf %44, %24 : vector<8x32xf32>
    %76 = arith.addf %74, %75 : vector<8x32xf32>
    %77 = arith.mulf %42, %13 : vector<8x32xf32>
    %78 = arith.mulf %43, %18 : vector<8x32xf32>
    %79 = arith.addf %77, %78 : vector<8x32xf32>
    %80 = arith.mulf %44, %25 : vector<8x32xf32>
    %81 = arith.addf %79, %80 : vector<8x32xf32>
    %82 = arith.mulf %47, %11 : vector<8x32xf32>
    %83 = arith.mulf %50, %16 : vector<8x32xf32>
    %84 = arith.addf %82, %83 : vector<8x32xf32>
    %85 = arith.mulf %51, %21 : vector<8x32xf32>
    %86 = arith.addf %84, %85 : vector<8x32xf32>
    %87 = arith.mulf %47, %12 : vector<8x32xf32>
    %88 = arith.mulf %50, %17 : vector<8x32xf32>
    %89 = arith.addf %87, %88 : vector<8x32xf32>
    %90 = arith.mulf %51, %24 : vector<8x32xf32>
    %91 = arith.addf %89, %90 : vector<8x32xf32>
    %92 = arith.mulf %47, %13 : vector<8x32xf32>
    %93 = arith.mulf %50, %18 : vector<8x32xf32>
    %94 = arith.addf %92, %93 : vector<8x32xf32>
    %95 = arith.mulf %51, %25 : vector<8x32xf32>
    %96 = arith.addf %94, %95 : vector<8x32xf32>
    %97 = arith.mulf %11, %37 : vector<8x32xf32>
    %98 = arith.mulf %12, %42 : vector<8x32xf32>
    %99 = arith.addf %97, %98 : vector<8x32xf32>
    %100 = arith.mulf %13, %47 : vector<8x32xf32>
    %101 = arith.addf %99, %100 : vector<8x32xf32>
    %102 = arith.mulf %11, %38 : vector<8x32xf32>
    %103 = arith.mulf %12, %43 : vector<8x32xf32>
    %104 = arith.addf %102, %103 : vector<8x32xf32>
    %105 = arith.mulf %13, %50 : vector<8x32xf32>
    %106 = arith.addf %104, %105 : vector<8x32xf32>
    %107 = arith.mulf %11, %39 : vector<8x32xf32>
    %108 = arith.mulf %12, %44 : vector<8x32xf32>
    %109 = arith.addf %107, %108 : vector<8x32xf32>
    %110 = arith.mulf %13, %51 : vector<8x32xf32>
    %111 = arith.addf %109, %110 : vector<8x32xf32>
    %112 = arith.mulf %16, %37 : vector<8x32xf32>
    %113 = arith.mulf %17, %42 : vector<8x32xf32>
    %114 = arith.addf %112, %113 : vector<8x32xf32>
    %115 = arith.mulf %18, %47 : vector<8x32xf32>
    %116 = arith.addf %114, %115 : vector<8x32xf32>
    %117 = arith.mulf %16, %38 : vector<8x32xf32>
    %118 = arith.mulf %17, %43 : vector<8x32xf32>
    %119 = arith.addf %117, %118 : vector<8x32xf32>
    %120 = arith.mulf %18, %50 : vector<8x32xf32>
    %121 = arith.addf %119, %120 : vector<8x32xf32>
    %122 = arith.mulf %16, %39 : vector<8x32xf32>
    %123 = arith.mulf %17, %44 : vector<8x32xf32>
    %124 = arith.addf %122, %123 : vector<8x32xf32>
    %125 = arith.mulf %18, %51 : vector<8x32xf32>
    %126 = arith.addf %124, %125 : vector<8x32xf32>
    %127 = arith.mulf %21, %37 : vector<8x32xf32>
    %128 = arith.mulf %24, %42 : vector<8x32xf32>
    %129 = arith.addf %127, %128 : vector<8x32xf32>
    %130 = arith.mulf %25, %47 : vector<8x32xf32>
    %131 = arith.addf %129, %130 : vector<8x32xf32>
    %132 = arith.mulf %21, %38 : vector<8x32xf32>
    %133 = arith.mulf %24, %43 : vector<8x32xf32>
    %134 = arith.addf %132, %133 : vector<8x32xf32>
    %135 = arith.mulf %25, %50 : vector<8x32xf32>
    %136 = arith.addf %134, %135 : vector<8x32xf32>
    %137 = arith.mulf %21, %39 : vector<8x32xf32>
    %138 = arith.mulf %24, %44 : vector<8x32xf32>
    %139 = arith.addf %137, %138 : vector<8x32xf32>
    %140 = arith.mulf %25, %51 : vector<8x32xf32>
    %141 = arith.addf %139, %140 : vector<8x32xf32>
    %142 = arith.addf %56, %101 : vector<8x32xf32>
    %143 = arith.addf %61, %106 : vector<8x32xf32>
    %144 = arith.addf %66, %111 : vector<8x32xf32>
    %145 = arith.addf %71, %116 : vector<8x32xf32>
    %146 = arith.addf %76, %121 : vector<8x32xf32>
    %147 = arith.addf %81, %126 : vector<8x32xf32>
    %148 = arith.addf %86, %131 : vector<8x32xf32>
    %149 = arith.addf %91, %136 : vector<8x32xf32>
    %150 = arith.addf %96, %141 : vector<8x32xf32>
    %151 = arith.mulf %142, %142 : vector<8x32xf32>
    %152 = arith.mulf %143, %143 : vector<8x32xf32>
    %153 = arith.addf %151, %152 : vector<8x32xf32>
    %154 = arith.mulf %144, %144 : vector<8x32xf32>
    %155 = arith.addf %153, %154 : vector<8x32xf32>
    %156 = arith.mulf %145, %145 : vector<8x32xf32>
    %157 = arith.addf %155, %156 : vector<8x32xf32>
    %158 = arith.mulf %146, %146 : vector<8x32xf32>
    %159 = arith.addf %157, %158 : vector<8x32xf32>
    %160 = arith.mulf %147, %147 : vector<8x32xf32>
    %161 = arith.addf %159, %160 : vector<8x32xf32>
    %162 = arith.mulf %148, %148 : vector<8x32xf32>
    %163 = arith.addf %161, %162 : vector<8x32xf32>
    %164 = arith.mulf %149, %149 : vector<8x32xf32>
    %165 = arith.addf %163, %164 : vector<8x32xf32>
    %166 = arith.mulf %150, %150 : vector<8x32xf32>
    %167 = arith.addf %165, %166 : vector<8x32xf32>
    %cst_8 = arith.constant 1.000000e+00 : f32
    %168 = vector.broadcast %cst_8 : f32 to vector<8x32xf32>
    %169 = arith.addf %167, %168 : vector<8x32xf32>
    %cst_9 = arith.constant 1.000000e+00 : f32
    %170 = vector.broadcast %cst_9 : f32 to vector<8x32xf32>
    %171 = arith.divf %170, %169 : vector<8x32xf32>
    %172 = arith.mulf %142, %171 : vector<8x32xf32>
    %173 = arith.mulf %143, %171 : vector<8x32xf32>
    %174 = arith.mulf %144, %171 : vector<8x32xf32>
    %175 = arith.mulf %145, %171 : vector<8x32xf32>
    %176 = arith.mulf %146, %171 : vector<8x32xf32>
    %177 = arith.mulf %147, %171 : vector<8x32xf32>
    %178 = arith.mulf %148, %171 : vector<8x32xf32>
    %179 = arith.mulf %149, %171 : vector<8x32xf32>
    %180 = arith.mulf %150, %171 : vector<8x32xf32>
    %181 = tpu.concatenate %172, %173, %174, %175, %176, %177, %178, %179, %180 in 1 : vector<8x32xf32>, vector<8x32xf32>, vector<8x32xf32>, vector<8x32xf32>, vector<8x32xf32>, vector<8x32xf32>, vector<8x32xf32>, vector<8x32xf32>, vector<8x32xf32> -> vector<8x288xf32>
    %c0_10 = arith.constant 0 : index
    %c0_11 = arith.constant 0 : index
    %182 = vector.load %arg5[%c0_10, %c0_11] : memref<288x288xf32, #tpu.memory_space<vmem>>, vector<288x288xf32>
    %cst_12 = arith.constant dense<0.000000e+00> : vector<8x288xf32>
    %183 = tpu.matmul %181, %182, %cst_12 {dimension_numbers = #tpu.dot_dimension_numbers<[1], [0], [0], [1], [0, 0, 1, 1], [], []>} : vector<8x288xf32>, vector<288x288xf32>, vector<8x288xf32> -> vector<8x288xf32>
    %184 = vector.extract_strided_slice %183 {offsets = [0, 0], sizes = [8, 32], strides = [1, 1]} : vector<8x288xf32> to vector<8x32xf32>
    %185 = vector.extract_strided_slice %183 {offsets = [0, 32], sizes = [8, 32], strides = [1, 1]} : vector<8x288xf32> to vector<8x32xf32>
    %186 = vector.extract_strided_slice %183 {offsets = [0, 64], sizes = [8, 32], strides = [1, 1]} : vector<8x288xf32> to vector<8x32xf32>
    %187 = vector.extract_strided_slice %183 {offsets = [0, 96], sizes = [8, 32], strides = [1, 1]} : vector<8x288xf32> to vector<8x32xf32>
    %188 = vector.extract_strided_slice %183 {offsets = [0, 128], sizes = [8, 32], strides = [1, 1]} : vector<8x288xf32> to vector<8x32xf32>
    %189 = vector.extract_strided_slice %183 {offsets = [0, 160], sizes = [8, 32], strides = [1, 1]} : vector<8x288xf32> to vector<8x32xf32>
    %190 = vector.extract_strided_slice %183 {offsets = [0, 192], sizes = [8, 32], strides = [1, 1]} : vector<8x288xf32> to vector<8x32xf32>
    %191 = vector.extract_strided_slice %183 {offsets = [0, 224], sizes = [8, 32], strides = [1, 1]} : vector<8x288xf32> to vector<8x32xf32>
    %192 = vector.extract_strided_slice %183 {offsets = [0, 256], sizes = [8, 32], strides = [1, 1]} : vector<8x288xf32> to vector<8x32xf32>
    %193 = arith.mulf %184, %184 : vector<8x32xf32>
    %194 = arith.mulf %185, %187 : vector<8x32xf32>
    %195 = arith.addf %193, %194 : vector<8x32xf32>
    %196 = arith.mulf %186, %190 : vector<8x32xf32>
    %197 = arith.addf %195, %196 : vector<8x32xf32>
    %198 = arith.mulf %184, %185 : vector<8x32xf32>
    %199 = arith.mulf %185, %188 : vector<8x32xf32>
    %200 = arith.addf %198, %199 : vector<8x32xf32>
    %201 = arith.mulf %186, %191 : vector<8x32xf32>
    %202 = arith.addf %200, %201 : vector<8x32xf32>
    %203 = arith.mulf %184, %186 : vector<8x32xf32>
    %204 = arith.mulf %185, %189 : vector<8x32xf32>
    %205 = arith.addf %203, %204 : vector<8x32xf32>
    %206 = arith.mulf %186, %192 : vector<8x32xf32>
    %207 = arith.addf %205, %206 : vector<8x32xf32>
    %208 = arith.mulf %187, %184 : vector<8x32xf32>
    %209 = arith.mulf %188, %187 : vector<8x32xf32>
    %210 = arith.addf %208, %209 : vector<8x32xf32>
    %211 = arith.mulf %189, %190 : vector<8x32xf32>
    %212 = arith.addf %210, %211 : vector<8x32xf32>
    %213 = arith.mulf %187, %185 : vector<8x32xf32>
    %214 = arith.mulf %188, %188 : vector<8x32xf32>
    %215 = arith.addf %213, %214 : vector<8x32xf32>
    %216 = arith.mulf %189, %191 : vector<8x32xf32>
    %217 = arith.addf %215, %216 : vector<8x32xf32>
    %218 = arith.mulf %187, %186 : vector<8x32xf32>
    %219 = arith.mulf %188, %189 : vector<8x32xf32>
    %220 = arith.addf %218, %219 : vector<8x32xf32>
    %221 = arith.mulf %189, %192 : vector<8x32xf32>
    %222 = arith.addf %220, %221 : vector<8x32xf32>
    %223 = arith.mulf %190, %184 : vector<8x32xf32>
    %224 = arith.mulf %191, %187 : vector<8x32xf32>
    %225 = arith.addf %223, %224 : vector<8x32xf32>
    %226 = arith.mulf %192, %190 : vector<8x32xf32>
    %227 = arith.addf %225, %226 : vector<8x32xf32>
    %228 = arith.mulf %190, %185 : vector<8x32xf32>
    %229 = arith.mulf %191, %188 : vector<8x32xf32>
    %230 = arith.addf %228, %229 : vector<8x32xf32>
    %231 = arith.mulf %192, %191 : vector<8x32xf32>
    %232 = arith.addf %230, %231 : vector<8x32xf32>
    %233 = arith.mulf %190, %186 : vector<8x32xf32>
    %234 = arith.mulf %191, %189 : vector<8x32xf32>
    %235 = arith.addf %233, %234 : vector<8x32xf32>
    %236 = arith.mulf %192, %192 : vector<8x32xf32>
    %237 = arith.addf %235, %236 : vector<8x32xf32>
    %c0_13 = arith.constant 0 : index
    %c0_14 = arith.constant 0 : index
    %238 = vector.load %arg2[%c0_13, %c0_14] : memref<8x32xf32, #tpu.memory_space<vmem>>, vector<8x32xf32>
    %c0_15 = arith.constant 0 : index
    %c0_16 = arith.constant 0 : index
    %239 = vector.load %arg1[%c0_15, %c0_16] : memref<8x288xf32, #tpu.memory_space<vmem>>, vector<8x32xf32>
    %240 = arith.mulf %239, %238 : vector<8x32xf32>
    %241 = arith.addf %240, %184 : vector<8x32xf32>
    %242 = arith.addf %241, %197 : vector<8x32xf32>
    %c0_17 = arith.constant 0 : index
    %c0_18 = arith.constant 0 : index
    %243 = vector.load %arg6[%c0_17, %c0_18] : memref<8x288xf32, #tpu.memory_space<vmem>>, vector<8x32xf32>
    tpu.vector_store %arg6[%c0_17, %c0_18], %242 {strides = array<i32>} : memref<8x288xf32, #tpu.memory_space<vmem>>, vector<8x32xf32>,
    %c0_19 = arith.constant 0 : index
    %c32 = arith.constant 32 : index
    %244 = vector.load %arg1[%c0_19, %c32] : memref<8x288xf32, #tpu.memory_space<vmem>>, vector<8x32xf32>
    %245 = arith.mulf %244, %238 : vector<8x32xf32>
    %246 = arith.addf %245, %185 : vector<8x32xf32>
    %247 = arith.addf %246, %202 : vector<8x32xf32>
    %c0_20 = arith.constant 0 : index
    %c32_21 = arith.constant 32 : index
    %248 = vector.load %arg6[%c0_20, %c32_21] : memref<8x288xf32, #tpu.memory_space<vmem>>, vector<8x32xf32>
    tpu.vector_store %arg6[%c0_20, %c32_21], %247 {strides = array<i32>} : memref<8x288xf32, #tpu.memory_space<vmem>>, vector<8x32xf32>,
    %c0_22 = arith.constant 0 : index
    %c64 = arith.constant 64 : index
    %249 = vector.load %arg1[%c0_22, %c64] : memref<8x288xf32, #tpu.memory_space<vmem>>, vector<8x32xf32>
    %250 = arith.mulf %249, %238 : vector<8x32xf32>
    %251 = arith.addf %250, %186 : vector<8x32xf32>
    %252 = arith.addf %251, %207 : vector<8x32xf32>
    %c0_23 = arith.constant 0 : index
    %c64_24 = arith.constant 64 : index
    %253 = vector.load %arg6[%c0_23, %c64_24] : memref<8x288xf32, #tpu.memory_space<vmem>>, vector<8x32xf32>
    tpu.vector_store %arg6[%c0_23, %c64_24], %252 {strides = array<i32>} : memref<8x288xf32, #tpu.memory_space<vmem>>, vector<8x32xf32>,
    %c0_25 = arith.constant 0 : index
    %c96 = arith.constant 96 : index
    %254 = vector.load %arg1[%c0_25, %c96] : memref<8x288xf32, #tpu.memory_space<vmem>>, vector<8x32xf32>
    %255 = arith.mulf %254, %238 : vector<8x32xf32>
    %256 = arith.addf %255, %187 : vector<8x32xf32>
    %257 = arith.addf %256, %212 : vector<8x32xf32>
    %c0_26 = arith.constant 0 : index
    %c96_27 = arith.constant 96 : index
    %258 = vector.load %arg6[%c0_26, %c96_27] : memref<8x288xf32, #tpu.memory_space<vmem>>, vector<8x32xf32>
    tpu.vector_store %arg6[%c0_26, %c96_27], %257 {strides = array<i32>} : memref<8x288xf32, #tpu.memory_space<vmem>>, vector<8x32xf32>,
    %c0_28 = arith.constant 0 : index
    %c128 = arith.constant 128 : index
    %259 = vector.load %arg1[%c0_28, %c128] : memref<8x288xf32, #tpu.memory_space<vmem>>, vector<8x32xf32>
    %260 = arith.mulf %259, %238 : vector<8x32xf32>
    %261 = arith.addf %260, %188 : vector<8x32xf32>
    %262 = arith.addf %261, %217 : vector<8x32xf32>
    %c0_29 = arith.constant 0 : index
    %c128_30 = arith.constant 128 : index
    %263 = vector.load %arg6[%c0_29, %c128_30] : memref<8x288xf32, #tpu.memory_space<vmem>>, vector<8x32xf32>
    tpu.vector_store %arg6[%c0_29, %c128_30], %262 {strides = array<i32>} : memref<8x288xf32, #tpu.memory_space<vmem>>, vector<8x32xf32>,
    %c0_31 = arith.constant 0 : index
    %c160 = arith.constant 160 : index
    %264 = vector.load %arg1[%c0_31, %c160] : memref<8x288xf32, #tpu.memory_space<vmem>>, vector<8x32xf32>
    %265 = arith.mulf %264, %238 : vector<8x32xf32>
    %266 = arith.addf %265, %189 : vector<8x32xf32>
    %267 = arith.addf %266, %222 : vector<8x32xf32>
    %c0_32 = arith.constant 0 : index
    %c160_33 = arith.constant 160 : index
    %268 = vector.load %arg6[%c0_32, %c160_33] : memref<8x288xf32, #tpu.memory_space<vmem>>, vector<8x32xf32>
    tpu.vector_store %arg6[%c0_32, %c160_33], %267 {strides = array<i32>} : memref<8x288xf32, #tpu.memory_space<vmem>>, vector<8x32xf32>,
    %c0_34 = arith.constant 0 : index
    %c192 = arith.constant 192 : index
    %269 = vector.load %arg1[%c0_34, %c192] : memref<8x288xf32, #tpu.memory_space<vmem>>, vector<8x32xf32>
    %270 = arith.mulf %269, %238 : vector<8x32xf32>
    %271 = arith.addf %270, %190 : vector<8x32xf32>
    %272 = arith.addf %271, %227 : vector<8x32xf32>
    %c0_35 = arith.constant 0 : index
    %c192_36 = arith.constant 192 : index
    %273 = vector.load %arg6[%c0_35, %c192_36] : memref<8x288xf32, #tpu.memory_space<vmem>>, vector<8x32xf32>
    tpu.vector_store %arg6[%c0_35, %c192_36], %272 {strides = array<i32>} : memref<8x288xf32, #tpu.memory_space<vmem>>, vector<8x32xf32>,
    %c0_37 = arith.constant 0 : index
    %c224 = arith.constant 224 : index
    %274 = vector.load %arg1[%c0_37, %c224] : memref<8x288xf32, #tpu.memory_space<vmem>>, vector<8x32xf32>
    %275 = arith.mulf %274, %238 : vector<8x32xf32>
    %276 = arith.addf %275, %191 : vector<8x32xf32>
    %277 = arith.addf %276, %232 : vector<8x32xf32>
    %c0_38 = arith.constant 0 : index
    %c224_39 = arith.constant 224 : index
    %278 = vector.load %arg6[%c0_38, %c224_39] : memref<8x288xf32, #tpu.memory_space<vmem>>, vector<8x32xf32>
    tpu.vector_store %arg6[%c0_38, %c224_39], %277 {strides = array<i32>} : memref<8x288xf32, #tpu.memory_space<vmem>>, vector<8x32xf32>,
    %c0_40 = arith.constant 0 : index
    %c256 = arith.constant 256 : index
    %279 = vector.load %arg1[%c0_40, %c256] : memref<8x288xf32, #tpu.memory_space<vmem>>, vector<8x32xf32>
    %280 = arith.mulf %279, %238 : vector<8x32xf32>
    %281 = arith.addf %280, %192 : vector<8x32xf32>
    %282 = arith.addf %281, %237 : vector<8x32xf32>
    %c0_41 = arith.constant 0 : index
    %c256_42 = arith.constant 256 : index
    %283 = vector.load %arg6[%c0_41, %c256_42] : memref<8x288xf32, #tpu.memory_space<vmem>>, vector<8x32xf32>
    tpu.vector_store %arg6[%c0_41, %c256_42], %282 {strides = array<i32>} : memref<8x288xf32, #tpu.memory_space<vmem>>, vector<8x32xf32>,
    return
  }
  func.func @transform_0(%arg0: i32) -> (i32, i32) {
    %c0_i32 = arith.constant 0 : i32
    %c0_i32_0 = arith.constant 0 : i32
    return %arg0, %c0_i32 : i32, i32
  }
  func.func @transform_1(%arg0: i32) -> (i32, i32) {
    %c0_i32 = arith.constant 0 : i32
    %c0_i32_0 = arith.constant 0 : i32
    return %arg0, %c0_i32 : i32, i32
  }
  func.func @transform_2(%arg0: i32) -> (i32, i32) {
    %c0_i32 = arith.constant 0 : i32
    %c0_i32_0 = arith.constant 0 : i32
    return %arg0, %c0_i32 : i32, i32
  }
  func.func @transform_3(%arg0: i32) -> (i32, i32) {
    %c0_i32 = arith.constant 0 : i32
    %c0_i32_0 = arith.constant 0 : i32
    return %arg0, %c0_i32 : i32, i32
  }
  func.func @transform_4(%arg0: i32) -> (i32, i32) {
    %c0_i32 = arith.constant 0 : i32
    %c0_i32_0 = arith.constant 0 : i32
    %c0_i32_1 = arith.constant 0 : i32
    return %c0_i32, %c0_i32_0 : i32, i32
  }
  func.func @transform_5(%arg0: i32) -> (i32, i32) {
    %c0_i32 = arith.constant 0 : i32
    %c0_i32_0 = arith.constant 0 : i32
    return %arg0, %c0_i32 : i32, i32
  }
}

</mosaic_0001>

<bundles_post_ra>
// kernel: interaction_forward.3
= control target key start
LH: loop header
LB: loop body
LE: loop exit
PB: predicated region body
PF: predicated region fallthrough
CT: control target
= control target key end

     0   :  { %s842_s12 = smov 0   ;;  %s1263_s0 = inlined_call_operand.vmem [shape: f32[16,288], index: 0, kind: input, shape index: {}]   ;;  %s1264_s1 = inlined_call_operand.vmem [shape: f32[288,320], index: 1, kind: input, shape index: {}]   ;;  %s1265_s2 = inlined_call_operand.vmem [shape: f32[16,320], index: 2, kind: output, shape index: {0}]   ;;  %s1266_s3 = inlined_call_operand.vmem [shape: f32[16,32], index: 3, kind: output, shape index: {1}]  }
   0x1 LB: > { %s730_s13 = sadd.s32 4294967295, %s815_s12   ;;  %p734_p0 = scmp.ge.s32.totalorder %s815_s12, 1  ;;  %s815_s12 = sphi %s842_s12, %s14_s12  }
   0x2   : > { %p140_p1 = scmp.lt.s32.totalorder %s815_s12, 3 }
   0x4   : > { %p141_p2 = pnand %p734_p0, %p140_p1 }
   0x5   : > { %p168_p3 = scmp.lt.s32.totalorder (!%p141_p2), %s730_s13, 1  ;;  %s817_s18 = smov (!%p141_p2), 96  }
   0x6   : > { %144 = sbr.rel (%p141_p2) target bundleno = 494 (0x1ee), region = 28  ;;  %s818_s19 = smov (!%p141_p2), 32  }
   0x7   : > { %s819_s20 = smov (!%p141_p2), 64  }
   0xb   : > { %s1268_s13 = smov (!%p168_p3, %s730_s13), 1  ;;  %v354_v4 = vld [vmem:[%s1264_s1 + $0x350] sm:$0xff]  ;;  %v353_v5 = vld [vmem:[%s1264_s1 + $0x348] sm:$0xff]  ;;  %v351_v6 = vld [vmem:[%s1264_s1 + $0x338] sm:$0xff]  ;;  %v820_v12 = vmov 0.0   ;;  %vm219_vm0 = vcmask 261120  }
   0xc   : > { %s793_s14 = smul.u32 24, %s1268_s13  ;;  %454 = vmatprep.subr.mxu1 %v354_v4  ;;  %v350_v7 = vld [vmem:[%s1264_s1 + $0x330] sm:$0xff]  ;;  %v348_v8 = vld [vmem:[%s1264_s1 + $0x320] sm:$0xff]  ;;  %v347_v9 = vld [vmem:[%s1264_s1 + $0x318] sm:$0xff]  ;;  %494 = vmatprep.mubr.f32.mxu1 %v820_v12  ;;  %s737_s26 = sshll.u32 %s1268_s13, 3  ;;  %vm241_vm1 = vcmask 523264  }
   0xd   : > { %455 = vmatpush1.msra.mxu1 %v353_v5  ;;  %v345_v10 = vld [vmem:[%s1264_s1 + $0x308] sm:$0xff]  ;;  %v344_v11 = vld [vmem:[%s1264_s1 + $0x300] sm:$0xff]  ;;  %v294_v13 = vld [vmem:[%s1264_s1 + $0x170] sm:$0xff]  ;;  %s181_s29 = scalar_lea.vmem %s1266_s3, %s737_s26  ;;  %vm243_vm2 = vcmask 785408   ;;  %vm821_vm3 = vmmov 0  }
   0xe   : > { %s858_s17 = scalar_lea.vmem %s1263_s0, %s793_s14  ;;  %456 = vmatprep.subr.mxu1 %v351_v6  ;;  %v293_v14 = vld [vmem:[%s1264_s1 + $0x168] sm:$0xff]  ;;  %v291_v15 = vld [vmem:[%s1264_s1 + $0x158] sm:$0xff]  ;;  %359 = vmatprep.subr.mxu0 %v294_v13  ;;  %v290_v16 = vld [vmem:[%s1264_s1 + $0x150] sm:$0xff]  ;;  %s177_s30 = scalar_lea.vmem %s1265_s2, %s793_s14 }
   0xf   : > { %v861_v0 = vld [vmem:[%s858_s17] sm:$0xff]  ;;  %v864_v1 = vld [vmem:[%s858_s17 + $0x8] sm:$0xff]  ;;  %457 = vmatpush1.msra.mxu1 %v350_v7  ;;  %360 = vmatpush1.msra.mxu0 %v293_v14  ;;  %v287_v18 = vld [vmem:[%s1264_s1 + $0x138] sm:$0xff] }
  0x10   : > { %v868_v2 = vmul.f32 %v861_v0, %v861_v0  ;;  %v876_v3 = vmul.f32 %v864_v1, %v864_v1  ;;  %458 = vmatprep.subr.mxu1 %v348_v8  ;;  %v288_v17 = vld [vmem:[%s1264_s1 + $0x140] sm:$0xff]  ;;  %361 = vmatprep.subr.mxu0 %v291_v15  ;;  %v285_v19 = vld [vmem:[%s1264_s1 + $0x128] sm:$0xff]  ;;  %v282_v21 = vld [vmem:[%s1264_s1 + $0x110] sm:$0xff] }
  0x11   : > { %459 = vmatpush1.msra.mxu1 %v347_v9  ;;  %362 = vmatpush1.msra.mxu0 %v290_v16  ;;  %v284_v20 = vld [vmem:[%s1264_s1 + $0x120] sm:$0xff]  ;;  %v281_v22 = vld [vmem:[%s1264_s1 + $0x108] sm:$0xff]  ;;  %v279_v23 = vld [vmem:[%s1264_s1 + $0xf8] sm:$0xff] }
  0x12   : > { %187 = vrot.lane.b32.xlu0 %v868_v2, %s817_s18  ;;  %195 = vrot.lane.b32.xlu1 %v868_v2, %s818_s19  ;;  %v278_v24 = vld [vmem:[%s1264_s1 + $0xf0] sm:$0xff]  ;;  %v276_v25 = vld [vmem:[%s1264_s1 + $0xe0] sm:$0xff] }
  0x13   : > { %460 = vmatprep.subr.mxu1 %v345_v10  ;;  %363 = vmatprep.subr.mxu0 %v288_v17  ;;  %v343_v26 = vld [vmem:[%s1264_s1 + $0x2f8] sm:$0xff]  ;;  %v273_v28 = vld [vmem:[%s1264_s1 + $0xc8] sm:$0xff]  ;;  %v272_v29 = vld [vmem:[%s1264_s1 + $0xc0] sm:$0xff] }
  0x14   : > { %461 = vmatpush1.msra.mxu1 %v344_v11  ;;  %364 = vmatpush1.msra.mxu0 %v287_v18  ;;  %v275_v27 = vld [vmem:[%s1264_s1 + $0xd8] sm:$0xff]  ;;  %v270_v30 = vld [vmem:[%s1264_s1 + $0xb0] sm:$0xff]  ;;  %v269_v31 = vld [vmem:[%s1264_s1 + $0xa8] sm:$0xff] }
  0x15   : > { %365 = vmatprep.subr.mxu0 %v285_v19  ;;  %742 = vmatprep.subr.mxu1 %v343_v26  ;;  %v267_v32 = vld [vmem:[%s1264_s1 + $0x98] sm:$0xff]  ;;  %v266_v33 = vld [vmem:[%s1264_s1 + $0x90] sm:$0xff]  ;;  %v264_v34 = vld [vmem:[%s1264_s1 + $0x80] sm:$0xff] }
  0x16   : > { %191 = vrot.lane.b32.xlu0 %v868_v2, %s819_s20  ;;  %202 = vrot.lane.b32.xlu1 %v876_v3, %s817_s18  ;;  %v263_v35 = vld [vmem:[%s1264_s1 + $0x78] sm:$0xff]  ;;  %v261_v36 = vld [vmem:[%s1264_s1 + $0x68] sm:$0xff] }
  0x17   : > { %366 = vmatpush1.msra.mxu0 %v284_v20  ;;  %v260_v37 = vld [vmem:[%s1264_s1 + $0x60] sm:$0xff]  ;;  %v258_v38 = vld [vmem:[%s1264_s1 + $0x50] sm:$0xff]  ;;  %v257_v39 = vld [vmem:[%s1264_s1 + $0x48] sm:$0xff] }
  0x18   : > { %367 = vmatprep.subr.mxu0 %v282_v21  ;;  %v255_v40 = vld [vmem:[%s1264_s1 + $0x38] sm:$0xff]  ;;  %v254_v41 = vld [vmem:[%s1264_s1 + $0x30] sm:$0xff]  ;;  %v252_v42 = vld [vmem:[%s1264_s1 + $0x20] sm:$0xff] }
  0x19   : > { %368 = vmatpush1.msra.mxu0 %v281_v22  ;;  %v251_v43 = vld [vmem:[%s1264_s1 + $0x18] sm:$0xff]  ;;  %v249_v44 = vld [vmem:[%s1264_s1 + $0x8] sm:$0xff]  ;;  %v248_v45 = vld [vmem:[%s1264_s1] sm:$0xff] }
  0x1a   : > { %206 = vrot.lane.b32.xlu0 %v876_v3, %s819_s20  ;;  %210 = vrot.lane.b32.xlu1 %v876_v3, %s818_s19  ;;  %v342_v46 = vld [vmem:[%s1264_s1 + $0x2f0] sm:$0xff]  ;;  %v341_v47 = vld [vmem:[%s1264_s1 + $0x2e8] sm:$0xff] }
  0x1b   : > { %369 = vmatprep.subr.mxu0 %v279_v23  ;;  %v339_v48 = vld [vmem:[%s1264_s1 + $0x2d8] sm:$0xff]  ;;  %v338_v49 = vld [vmem:[%s1264_s1 + $0x2d0] sm:$0xff]  ;;  %v336_v50 = vld [vmem:[%s1264_s1 + $0x2c0] sm:$0xff] }
  0x1c   : > { %370 = vmatpush1.msra.mxu0 %v278_v24  ;;  %v335_v51 = vld [vmem:[%s1264_s1 + $0x2b8] sm:$0xff]  ;;  %v333_v52 = vld [vmem:[%s1264_s1 + $0x2a8] sm:$0xff]  ;;  %v332_v53 = vld [vmem:[%s1264_s1 + $0x2a0] sm:$0xff] }
  0x1d   : > { %371 = vmatprep.subr.mxu0 %v276_v25  ;;  %v330_v54 = vld [vmem:[%s1264_s1 + $0x290] sm:$0xff]  ;;  %v329_v55 = vld [vmem:[%s1264_s1 + $0x288] sm:$0xff]  ;;  %v327_v56 = vld [vmem:[%s1264_s1 + $0x278] sm:$0xff] }
  0x1e   : > { %372 = vmatpush1.msra.mxu0 %v275_v27  ;;  %v326_v57 = vld [vmem:[%s1264_s1 + $0x270] sm:$0xff]  ;;  %v324_v58 = vld [vmem:[%s1264_s1 + $0x260] sm:$0xff]  ;;  %v323_v59 = vld [vmem:[%s1264_s1 + $0x258] sm:$0xff] }
  0x1f   : > { %373 = vmatprep.subr.mxu0 %v273_v28  ;;  %v321_v60 = vld [vmem:[%s1264_s1 + $0x248] sm:$0xff]  ;;  %v320_v61 = vld [vmem:[%s1264_s1 + $0x240] sm:$0xff]  ;;  %v318_v62 = vld [vmem:[%s1264_s1 + $0x230] sm:$0xff] }
  0x20   : > { %374 = vmatpush1.msra.mxu0 %v272_v29  ;;  %v317_v63 = vld [vmem:[%s1264_s1 + $0x228] sm:$0xff]  ;;  %v315_v4 = vld [vmem:[%s1264_s1 + $0x218] sm:$0xff]  ;;  %v314_v5 = vld [vmem:[%s1264_s1 + $0x210] sm:$0xff] }
  0x21   : > { %375 = vmatprep.subr.mxu0 %v270_v30  ;;  %v312_v6 = vld [vmem:[%s1264_s1 + $0x200] sm:$0xff]  ;;  %v311_v7 = vld [vmem:[%s1264_s1 + $0x1f8] sm:$0xff]  ;;  %v309_v8 = vld [vmem:[%s1264_s1 + $0x1e8] sm:$0xff] }
  0x22   : > { %376 = vmatpush1.msra.mxu0 %v269_v31  ;;  %v308_v9 = vld [vmem:[%s1264_s1 + $0x1e0] sm:$0xff]  ;;  %v184_v20 = vld [vmem:[%s858_s17 + $0x10] sm:$0xff]  ;;  %v303_v28 = vld [vmem:[%s1264_s1 + $0x1b8] sm:$0xff] }
  0x23   : > { %377 = vmatprep.subr.mxu0 %v267_v32  ;;  %v214_v24 = vmul.f32 %v184_v20, %v184_v20  ;;  %v302_v29 = vld [vmem:[%s1264_s1 + $0x1b0] sm:$0xff]  ;;  %v300_v30 = vld [vmem:[%s1264_s1 + $0x1a0] sm:$0xff]  ;;  %v299_v31 = vld [vmem:[%s1264_s1 + $0x198] sm:$0xff] }
  0x24   : > { %378 = vmatpush1.msra.mxu0 %v266_v33  ;;  %v297_v32 = vld [vmem:[%s1264_s1 + $0x188] sm:$0xff]  ;;  %v296_v33 = vld [vmem:[%s1264_s1 + $0x180] sm:$0xff] }
  0x25   : > { %379 = vmatprep.subr.mxu0 %v264_v34 }
  0x26   : > { %380 = vmatpush1.msra.mxu0 %v263_v35 }
  0x27   : > { %381 = vmatprep.subr.mxu0 %v261_v36  ;;  %v295_v36 = vld [vmem:[%s1264_s1 + $0x178] sm:$0xff] }
  0x28   : > { %382 = vmatpush1.msra.mxu0 %v260_v37  ;;  %v340_v37 = vld [vmem:[%s1264_s1 + $0x2e0] sm:$0xff] }
  0x29   : > { %383 = vmatprep.subr.mxu0 %v258_v38  ;;  %v292_v38 = vld [vmem:[%s1264_s1 + $0x160] sm:$0xff] }
  0x2a   : > { %384 = vmatpush1.msra.mxu0 %v257_v39  ;;  %v337_v39 = vld [vmem:[%s1264_s1 + $0x2c8] sm:$0xff] }
  0x2b   : > { %385 = vmatprep.subr.mxu0 %v255_v40  ;;  %v289_v40 = vld [vmem:[%s1264_s1 + $0x148] sm:$0xff] }
  0x2c   : > { %386 = vmatpush1.msra.mxu0 %v254_v41  ;;  %v334_v41 = vld [vmem:[%s1264_s1 + $0x2b0] sm:$0xff] }
  0x2d   : > { %387 = vmatprep.subr.mxu0 %v252_v42  ;;  %v286_v42 = vld [vmem:[%s1264_s1 + $0x130] sm:$0xff] }
  0x2e   : > { %388 = vmatpush1.msra.mxu0 %v251_v43  ;;  %v331_v43 = vld [vmem:[%s1264_s1 + $0x298] sm:$0xff] }
  0x2f   : > { %389 = vmatprep.subr.mxu0 %v249_v44  ;;  %v283_v44 = vld [vmem:[%s1264_s1 + $0x118] sm:$0xff] }
  0x30   : > { %390 = vmatpush1.msra.mxu0 %v248_v45  ;;  %v328_v45 = vld [vmem:[%s1264_s1 + $0x280] sm:$0xff] }
  0x31   : > { %391 = vmatprep.subr.mxu0 %v342_v46  ;;  %v280_v46 = vld [vmem:[%s1264_s1 + $0x100] sm:$0xff] }
  0x32   : > { %392 = vmatpush2.msra.mxu0 %v341_v47  ;;  %v325_v47 = vld [vmem:[%s1264_s1 + $0x268] sm:$0xff] }
  0x33   : > { %393 = vmatprep.subr.mxu0 %v339_v48  ;;  %v277_v48 = vld [vmem:[%s1264_s1 + $0xe8] sm:$0xff] }
  0x34   : > { %394 = vmatpush2.msra.mxu0 %v338_v49  ;;  %v322_v49 = vld [vmem:[%s1264_s1 + $0x250] sm:$0xff] }
  0x35   : > { %395 = vmatprep.subr.mxu0 %v336_v50  ;;  %v274_v50 = vld [vmem:[%s1264_s1 + $0xd0] sm:$0xff] }
  0x36   : > { %396 = vmatpush2.msra.mxu0 %v335_v51  ;;  %v319_v51 = vld [vmem:[%s1264_s1 + $0x238] sm:$0xff] }
  0x37   : > { %397 = vmatprep.subr.mxu0 %v333_v52  ;;  %v271_v52 = vld [vmem:[%s1264_s1 + $0xb8] sm:$0xff] }
  0x38   : > { %398 = vmatpush2.msra.mxu0 %v332_v53  ;;  %v316_v53 = vld [vmem:[%s1264_s1 + $0x220] sm:$0xff] }
  0x39   : > { %399 = vmatprep.subr.mxu0 %v330_v54  ;;  %v268_v54 = vld [vmem:[%s1264_s1 + $0xa0] sm:$0xff] }
  0x3a   : > { %400 = vmatpush2.msra.mxu0 %v329_v55  ;;  %v313_v55 = vld [vmem:[%s1264_s1 + $0x208] sm:$0xff] }
  0x3b   : > { %401 = vmatprep.subr.mxu0 %v327_v56  ;;  %v265_v56 = vld [vmem:[%s1264_s1 + $0x88] sm:$0xff] }
  0x3c   : > { %402 = vmatpush2.msra.mxu0 %v326_v57  ;;  %v310_v57 = vld [vmem:[%s1264_s1 + $0x1f0] sm:$0xff] }
  0x3d   : > { %403 = vmatprep.subr.mxu0 %v324_v58  ;;  %v262_v58 = vld [vmem:[%s1264_s1 + $0x70] sm:$0xff] }
  0x3e   : > { %404 = vmatpush2.msra.mxu0 %v323_v59  ;;  %v307_v59 = vld [vmem:[%s1264_s1 + $0x1d8] sm:$0xff] }
  0x3f   : > { %405 = vmatprep.subr.mxu0 %v321_v60  ;;  %v259_v60 = vld [vmem:[%s1264_s1 + $0x58] sm:$0xff] }
  0x40   : > { %406 = vmatpush2.msra.mxu0 %v320_v61  ;;  %v304_v61 = vld [vmem:[%s1264_s1 + $0x1c0] sm:$0xff] }
  0x41   : > { %407 = vmatprep.subr.mxu0 %v318_v62  ;;  %v256_v62 = vld [vmem:[%s1264_s1 + $0x40] sm:$0xff] }
  0x42   : > { %408 = vmatpush2.msra.mxu0 %v317_v63  ;;  %v301_v63 = vld [vmem:[%s1264_s1 + $0x1a8] sm:$0xff] }
  0x43   : > { %409 = vmatprep.subr.mxu0 %v315_v4  ;;  %v253_v4 = vld [vmem:[%s1264_s1 + $0x28] sm:$0xff] }
  0x44   : > { %410 = vmatpush2.msra.mxu0 %v314_v5  ;;  %v298_v5 = vld [vmem:[%s1264_s1 + $0x190] sm:$0xff] }
  0x45   : > { %411 = vmatprep.subr.mxu0 %v312_v6  ;;  %v250_v6 = vld [vmem:[%s1264_s1 + $0x10] sm:$0xff] }
  0x46   : > { %412 = vmatpush2.msra.mxu0 %v311_v7 }
  0x47   : > { %413 = vmatprep.subr.mxu0 %v309_v8 }
  0x48   : > { %414 = vmatpush2.msra.mxu0 %v308_v9 }
  0x84   : > { %v188_v10 = vpop.permute.xlu0 %187  ;;  %v196_v11 = vpop.permute.xlu1 %195 }
  0x85   : > { %v190_v13 = vadd.f32 %v188_v10, %v868_v2  ;;  %v306_v2 = vld [vmem:[%s1264_s1 + $0x1d0] sm:$0xff] }
  0x86   : > { %415 = vmatprep.subr.mxu0 %v306_v2 }
  0x88   : > { %v192_v14 = vpop.permute.xlu0 %191  ;;  %v203_v16 = vpop.permute.xlu1 %202 }
  0x89   : > { %v194_v15 = vadd.f32 %v192_v14, %v190_v13 }
  0x8b   : > { %v198_v17 = vadd.f32 %v196_v11, %v194_v15 }
  0x8c   : > { %v207_v19 = vpop.permute.xlu0 %206  ;;  %v211_v22 = vpop.permute.xlu1 %210 }
  0x8d   : > { %v200_v18 = vadd.f32 %v876_v3, %v198_v17  ;;  %v305_v3 = vld [vmem:[%s1264_s1 + $0x1c8] sm:$0xff] }
  0x8e   : > { %416 = vmatpush2.msra.mxu0 %v305_v3 }
  0x8f   : > { %v205_v21 = vadd.f32 %v203_v16, %v200_v18  ;;  %417 = vmatprep.subr.mxu0 %v303_v28 }
  0x90   : > { %418 = vmatpush2.msra.mxu0 %v302_v29 }
  0x91   : > { %v209_v23 = vadd.f32 %v207_v19, %v205_v21  ;;  %419 = vmatprep.subr.mxu0 %v300_v30 }
  0x92   : > { %420 = vmatpush2.msra.mxu0 %v299_v31 }
  0x93   : > { %v213_v25 = vadd.f32 %v211_v22, %v209_v23  ;;  %421 = vmatprep.subr.mxu0 %v297_v32 }
  0x94   : > { %422 = vmatpush2.msra.mxu0 %v296_v33 }
  0x95   : > { %v215_v26 = vadd.f32 %v214_v24, %v213_v25  ;;  %v355_v25 = vld [vmem:[%s1264_s1 + $0x358] sm:$0xff] }
  0x97   : > { %v216_v27 = vadd.f32 1.0, %v215_v26  ;;  %v346_v26 = vld [vmem:[%s1264_s1 + $0x310] sm:$0xff] }
  0x99   : > { %807 = vrcp.f32 %v216_v27 }
  0xa6   : > { %v1113_v34 = vpop.eup %807 }
  0xa7   : > { %v1116_v35 = vmul.f32 %v1113_v34, %v184_v20  ;;  %227 = vrot.lane.b32.xlu1 %v1113_v34, %s819_s20  ;;  %223 = vrot.lane.b32.xlu0 %v1113_v34, %s818_s19  ;;  %220 = vst.msk [vmem:[%s181_s29] sm:$0xff] %vm219_vm0, %v1113_v34  ;;  %v235_v11 = vmul.f32 %v1113_v34, %v864_v1 }
  0xa8   : > { %v221_v13 = vmul.f32 %v1113_v34, %v861_v0 }
  0xa9   : > { %738 = vmatmul.mubr.msk.f32.vlgmr.msra.gmra.mxu1 %vm219_vm0, %v1116_v35 }
  0xaa   : > { %743 = vmatpush3.msra.mxu1 %v295_v36 }
  0xab   : > { %231 = vrot.lane.b32.xlu0 %v1113_v34, %s817_s18  ;;  %744 = vmatprep.subr.mxu1 %v340_v37 }
  0xac   : > { %745 = vmatpush3.msra.mxu1 %v292_v38 }
  0xad   : > { %746 = vmatprep.subr.mxu1 %v337_v39 }
  0xae   : > { %747 = vmatpush3.msra.mxu1 %v289_v40 }
  0xaf   : > { %748 = vmatprep.subr.mxu1 %v334_v41 }
  0xb0   : > { %749 = vmatpush3.msra.mxu1 %v286_v42 }
  0xb1   : > { %750 = vmatprep.subr.mxu1 %v331_v43 }
  0xb2   : > { %751 = vmatpush3.msra.mxu1 %v283_v44 }
  0xb3   : > { %752 = vmatprep.subr.mxu1 %v328_v45 }
  0xb4   : > { %753 = vmatpush3.msra.mxu1 %v280_v46 }
  0xb5   : > { %754 = vmatprep.subr.mxu1 %v325_v47 }
  0xb6   : > { %755 = vmatpush3.msra.mxu1 %v277_v48 }
  0xb7   : > { %756 = vmatprep.subr.mxu1 %v322_v49 }
  0xb8   : > { %757 = vmatpush3.msra.mxu1 %v274_v50 }
  0xb9   : > { %758 = vmatprep.subr.mxu1 %v319_v51 }
  0xba   : > { %759 = vmatpush3.msra.mxu1 %v271_v52 }
  0xbb   : > { %760 = vmatprep.subr.mxu1 %v316_v53 }
  0xbc   : > { %761 = vmatpush3.msra.mxu1 %v268_v54 }
  0xbd   : > { %762 = vmatprep.subr.mxu1 %v313_v55 }
  0xbe   : > { %763 = vmatpush3.msra.mxu1 %v265_v56 }
  0xbf   : > { %764 = vmatprep.subr.mxu1 %v310_v57 }
  0xc0   : > { %765 = vmatpush3.msra.mxu1 %v262_v58 }
  0xc1   : > { %766 = vmatprep.subr.mxu1 %v307_v59 }
  0xc2   : > { %767 = vmatpush3.msra.mxu1 %v259_v60 }
  0xc3   : > { %768 = vmatprep.subr.mxu1 %v304_v61 }
  0xc4   : > { %769 = vmatpush3.msra.mxu1 %v256_v62 }
  0xc5   : > { %770 = vmatprep.subr.mxu1 %v301_v63 }
  0xc6   : > { %771 = vmatpush3.msra.mxu1 %v253_v4 }
  0xc7   : > { %772 = vmatprep.subr.mxu1 %v298_v5 }
  0xc8   : > { %773 = vmatpush3.msra.mxu1 %v250_v6 }
  0xc9   : > { %782 = vmatprep.subr.mxu1 %v820_v12 }
 0x119   : > { %v228_v7 = vpop.permute.xlu1 %227  ;;  %v224_v8 = vpop.permute.xlu0 %223 }
 0x11a   : > { %v226_v9 = vmul.f32 %v224_v8, %v861_v0  ;;  %v236_v10 = vmul.f32 %v224_v8, %v864_v1  ;;  %v230_v14 = vmul.f32 %v228_v7, %v861_v0  ;;  %v237_v15 = vmul.f32 %v228_v7, %v864_v1 }
 0x11c   : > { %v245_v16 = vsel %vm219_vm0, %v235_v11, %v236_v10  ;;  %v240_v17 = vsel %vm219_vm0, %v221_v13, %v226_v9 }
 0x11d   : > { %v232_v18 = vpop.permute.xlu0 %231  ;;  %v246_v21 = vsel %vm241_vm1, %v245_v16, %v237_v15  ;;  %v242_v22 = vsel %vm241_vm1, %v240_v17, %v230_v14 }
 0x11e   : > { %v234_v19 = vmul.f32 %v232_v18, %v861_v0  ;;  %v238_v20 = vmul.f32 %v232_v18, %v864_v1  ;;  %v352_v0 = vld [vmem:[%s1264_s1 + $0x340] sm:$0xff]  ;;  %v349_v1 = vld [vmem:[%s1264_s1 + $0x328] sm:$0xff] }
 0x120   : > { %v247_v23 = vsel %vm243_vm2, %v246_v21, %v238_v20  ;;  %v244_v24 = vsel %vm243_vm2, %v242_v22, %v234_v19 }
 0x121   : > { %423 = vmatprep.mubr.f32.mxu0 %v247_v23  ;;  %565 = vmatprep.mubr.f32.mxu1 %v247_v23 }
 0x122   : > { %424 = vmatmul.mubr.f32.vlgmr.msra.gmra.mxu0 %v244_v24  ;;  %566 = vmatmul.mubr.f32.vlgmr.msra.gmra.mxu1 %v244_v24 }
 0x123   : > { %783 = vmatpush3.msra.mxu1 %v355_v25  ;;  %790 = vmatprep.mubr.msk.f32.mxu1 %vm821_vm3, %v820_v12 }
 0x124   : > { %784 = vmatprep.subr.mxu1 %v820_v12 }
 0x125   : > { %785 = vmatpush3.msra.mxu1 %v352_v0 }
 0x126   : > { %786 = vmatprep.subr.mxu1 %v820_v12 }
 0x127   : > { %787 = vmatpush3.msra.mxu1 %v349_v1 }
 0x128   : > { %788 = vmatprep.subr.mxu1 %v820_v12 }
 0x129   : > { %789 = vmatpush3.msra.mxu1 %v346_v26 }
 0x12a   : > { %791 = vmatmul.mubr.msk.f32.vlgmr.msra.gmra.mxu1 %vm219_vm0, %v1116_v35 }
 0x169   : > { %v496_v27 = vpop.f32.mrf.mxu1 }
 0x16b   : > { %v498_v2 = vpop.f32.mrf.mxu1 }
 0x1e2   : > { %v425_v3 = vpop.f32.mrf.mxu0  ;;  %v774_v28 = vpop.f32.mrf.mxu1 }
 0x1e3   : > { %v497_v29 = vadd.f32 %v496_v27, %v425_v3 }
 0x1e4   : > { %v427_v30 = vpop.f32.mrf.mxu0  ;;  %v775_v32 = vpop.f32.mrf.mxu1 }
 0x1e5   : > { %641 = vst [vmem:[%s177_s30] sm:$0xff] %v497_v29  ;;  %v499_v31 = vadd.f32 %v498_v2, %v427_v30  ;;  %v776_v12 = vadd.f32 %v775_v32, %v774_v28 }
 0x1e7   : > { %642 = vst [vmem:[%s177_s30 + $0x8] sm:$0xff] %v499_v31 }
 0x1ea   : > { %v637_v33 = vpop.f32.mrf.mxu1 }
 0x1eb   : > { %v638_v34 = vadd.f32 %v776_v12, %v637_v33 }
 0x1ec   : > { %v792_v36 = vpop.f32.mrf.mxu1 }
 0x1ed   : > { %643 = vst.msk [vmem:[%s177_s30 + $0x10] sm:$0xff] %vm241_vm1, %v638_v34 }
 0x1ee PF: > { %s14_s12 = sadd.s32 1, %s815_s12  }
 0x1ef   : > { %p11_p4 = scmp.ge.s32.totalorder %s14_s12, 4  }
 0x1f1   :  { %13 = sbr.rel (!%p11_p4) target bundleno = 1 (0x1), region = 70 }

// kernel: interaction_forward.4
= control target key start
LH: loop header
LB: loop body
LE: loop exit
PB: predicated region body
PF: predicated region fallthrough
CT: control target
= control target key end

     0   :  { %s2365_s0 = inlined_call_operand.vmem [shape: s32[256], index: 0, kind: input, shape index: {}]   ;;  %s2366_s2 = inlined_call_operand.vmem [shape: f32[256,16], index: 2, kind: input, shape index: {}]   ;;  %s2367_s3 = inlined_call_operand.vmem [shape: f32[256,1], index: 3, kind: input, shape index: {}]   ;;  %s2368_s4 = inlined_call_operand.vmem [shape: f32[16,32], index: 4, kind: input, shape index: {}]   ;;  %s2369_s5 = inlined_call_operand.vmem [shape: f32[1,32], index: 5, kind: input, shape index: {}]   ;;  %s2370_s6 = inlined_call_operand.vmem [shape: f32[32,64], index: 6, kind: input, shape index: {}]   ;;  %s2371_s7 = inlined_call_operand.vmem [shape: f32[1,64], index: 7, kind: input, shape index: {}]   ;;  %s2372_s8 = inlined_call_operand.vmem [shape: f32[64,320], index: 8, kind: input, shape index: {}]   ;;  %s2373_s9 = inlined_call_operand.vmem [shape: f32[1,320], index: 9, kind: input, shape index: {}]   ;;  %s2374_s10 = inlined_call_operand.vmem [shape: f32[16,320], index: 10, kind: input, shape index: {}]   ;;  %s2375_s11 = inlined_call_operand.vmem [shape: f32[16,320], index: 11, kind: output, shape index: {}]   ;;  %s2376_s1 = inlined_call_operand.vmem [shape: s32[256], index: 1, kind: input, shape index: {}]  }
   0x1   :  { %s16_s19 = sshll.u32 %s2365_s0, 4  ;;  %s20_s22 = sshll.u32 %s2376_s1, 4  ;;  %s17_s19 = int_to_ptr.vmem [resolvable:$true] %s16_s19  ;;  %s21_s22 = int_to_ptr.vmem [resolvable:$true] %s20_s22 }
   0x2   :  { %s1871_s23 = scalar_lea.vmem %s17_s19, 32  ;;  %p1876_p1 = scmp.lt.s32.totalorder %s17_s19, %s17_s19 }
   0x3   :  { %p1872_p0 = scmp.ne.s32.totalorder %s17_s19, %s1871_s23  ;;  %p1877_p2 = scmp.lt.s32.totalorder %s1871_s23, %s1871_s23 }
   0x5   :  { %p1878_p3 = por %p1877_p2, %p1876_p1 }
   0x7   :  { %p1879_p4 = pnand %p1878_p3, %p1872_p0 }
   0x9   :  { %1882 = shalt.err (!%p1879_p4)  }
   0xa   :  { %s1921_s24 = smov [#allocation4]   ;;  %s1883_s25 = scalar_lea.vmem %s21_s22, 32 }
   0xb   :  { %19 = dma.vmem_to_smem %s17_s19, 32, %s1921_s24, [#allocation3] }
   0xc   :  { %p1884_p5 = scmp.ne.s32.totalorder %s21_s22, %s1883_s25  ;;  %p1888_p6 = scmp.lt.s32.totalorder %s21_s22, %s21_s22 }
   0xd   :  { %p1889_p7 = scmp.lt.s32.totalorder %s1883_s25, %s1883_s25 }
   0xf   :  { %p1890_p8 = por %p1889_p7, %p1888_p6 }
  0x11   :  { %p1891_p9 = pnand %p1890_p8, %p1884_p5 }
  0x13   :  { %1894 = shalt.err (!%p1891_p9)  }
  0x14   :  { %s1922_s0 = smov [#allocation5]  }
  0x15   :  { %23 = dma.vmem_to_smem %s21_s22, 32, %s1922_s0, [#allocation3] }
  0x16   :  { %1907 = dma.done.wait [#allocation3], 64 }
  0x17   :  { %1908 = vsyncadd [#allocation3], 4294967232 }
  0x18   :  { %25 = sfence }
  0x19   :  { %s1992_s1 = smov 0  }
  0x1a LB: > { %s1998_s26 = sadd.s32 4294967295, %s1911_s1   ;;  %p1491_p10 = scmp.ge.s32.totalorder %s1911_s1, 1  ;;  %s1911_s1 = sphi %s1992_s1, %s31_s1  }
  0x1b   : > { %p306_p11 = scmp.lt.s32.totalorder %s1911_s1, 5 }
  0x1d   : > { %p307_p12 = pnand %p1491_p10, %p306_p11 }
  0x1e   : > { %s1492_s27 = sshll.u32 (!%p307_p12), %s1998_s26, 3  ;;  %s1496_s28 = sshll.u32 (!%p307_p12), %s1998_s26, 6 }
  0x1f   : > { %310 = sbr.rel (%p307_p12) target bundleno = 807 (0x327), region = 56  ;;  %p343_p13 = scmp.lt.s32.totalorder (!%p307_p12), %s1492_s27, 31 }
  0x20   : > { %p1497_p0 = scmp.ne.s32.totalorder (!%p307_p12), %s1998_s26, 0 }
  0x24   : > { %s2380_s27 = smov (!%p343_p13, %s1492_s27), 31  ;;  %358 = sbr.rel (%p1497_p0) target bundleno = 45 (0x2d), region = 60 }
  0x25   : > { %s1493_s29 = sshll.u32 %s2380_s27, 3 }
  0x26   : > { %s2007_s13 = scalar_lea.vmem %s2366_s2, %s1493_s29  ;;  %s2012_s16 = scalar_lea.vmem %s2367_s3, %s1493_s29 }
  0x29   : > { %vm361_vm0 = vcmask 523264   ;;  %v1923_v0 = vmov 0.0  }
  0x2a   : > { %359 = vst [vmem:[%s2375_s11] sm:$0xff] %v1923_v0  ;;  %360 = vst [vmem:[%s2375_s11 + $0x8] sm:$0xff] %v1923_v0 }
  0x2b   : > { %363 = vst [vmem:[%s2375_s11 + $0x18] sm:$0xff] %v1923_v0  ;;  %364 = vst [vmem:[%s2375_s11 + $0x20] sm:$0xff] %v1923_v0 }
  0x2c   : > { %362 = vst.msk [vmem:[%s2375_s11 + $0x10] sm:$0xff] %vm361_vm0, %v1923_v0  ;;  %365 = vst.msk [vmem:[%s2375_s11 + $0x28] sm:$0xff] %vm361_vm0, %v1923_v0 }
  0x2d PF: > { %s1913_s30 = smov 0  }
  0x2e LB: >> { %s372_s12 = sadd.s32 %s1915_s30, %s1496_s28  ;;  %s387_s14 = sshra.s32 %s1915_s30, 3  ;;  %v383_v1 = vlaneseq  ;;  %s1915_s30 = sphi %s1913_s30, %s371_s30  }
  0x2f   : >> { %s373_s15 = sld [smem:[#allocation4 + %s372_s12]]  ;;  %s1499_s17 = smul.u32 24, %s387_s14 }
  0x30   : >> { %s390_s18 = sand.u32 7, %s1915_s30  ;;  %vm2036_vm1 = vcmp.lt.s32.totalorder %v383_v1, 320  ;;  %s371_s30 = sadd.s32 1, %s1915_s30  }
  0x31   : >> { %s393_s19 = sadd.s32 %s1499_s17, %s390_s18  ;;  %p368_p1 = scmp.ge.s32.totalorder %s371_s30, 64  }
  0x32   : >> { %s394_s27 = scalar_lea.vmem [#allocation2], %s393_s19  ;;  %v406_v4 = vld [vmem:[%s2368_s4 + $0x8] sm:$0xff] (%p368_p1)  ;;  %v405_v5 = vld [vmem:[%s2368_s4] sm:$0xff] (%p368_p1)  ;;  %vm414_vm2 = vcmask (%p368_p1), 130048   ;;  %v399_v8 = vld [vmem:[%s2007_s13 + $0x10] sm:$0xff] (%p368_p1)  ;;  %vm611_vm3 = vcmask (%p368_p1), 261120  }
  0x33   : > { %v397_v6 = vld [vmem:[%s2007_s13] sm:$0xff] (%p368_p1)  ;;  %1616 = vmatprep.subr.mxu0 (%p368_p1), %v406_v4  ;;  %v398_v7 = vld [vmem:[%s2007_s13 + $0x8] sm:$0xff] (%p368_p1)  ;;  %v400_v9 = vld [vmem:[%s2007_s13 + $0x18] sm:$0xff] (%p368_p1)  ;;  %vm838_vm4 = vcmask (%p368_p1), 523264   ;;  %s1917_s25 = smov (%p368_p1), 0  }
  0x34   : > { %1620 = vmatprep.mubr.msk.f32.mxu0 (%p368_p1), %vm414_vm2, %v397_v6  ;;  %1617 = vmatpush3.msra.mxu0 (%p368_p1), %v406_v4  ;;  %v401_v10 = vld [vmem:[%s2007_s13 + $0x20] sm:$0xff] (%p368_p1)  ;;  %v402_v11 = vld [vmem:[%s2007_s13 + $0x28] sm:$0xff] (%p368_p1)  ;;  %v403_v12 = vld [vmem:[%s2007_s13 + $0x30] sm:$0xff] (%p368_p1) }
  0x35   : >> { %s374_s20 = sshra.s32 %s373_s15, 3  ;;  %s377_s21 = sand.u32 7, %s373_s15  ;;  %1618 = vmatprep.subr.mxu0 (%p368_p1), %v405_v5  ;;  %v404_v13 = vld [vmem:[%s2007_s13 + $0x38] sm:$0xff] (%p368_p1)  ;;  %v602_v15 = vld [vmem:[%s2370_s6 + $0x10] sm:$0xff] (%p368_p1)  ;;  %v601_v16 = vld [vmem:[%s2370_s6 + $0x8] sm:$0xff] (%p368_p1) }
  0x36   : >> { %s1498_s22 = smul.u32 24, %s374_s20  ;;  %1619 = vmatpush3.msra.mxu0 (%p368_p1), %v405_v5  ;;  %v603_v14 = vld [vmem:[%s2370_s6 + $0x18] sm:$0xff] (%p368_p1)  ;;  %v600_v17 = vld [vmem:[%s2370_s6] sm:$0xff] (%p368_p1) }
  0x37   : > { %370 = sbr.rel (!%p368_p1) target bundleno = 46 (0x2e), region = 107  ;;  %1621 = vmatmul.mubr.msk.f32.vlgmr.msra.gmra.mxu0 (%p368_p1), %vm414_vm2, %v398_v7  ;;  %1632 = vmatprep.subr.mxu1 (%p368_p1), %v603_v14  ;;  %v1500_v18 = vld [vmem:[%s2369_s5] ss:$0 sm:$0xff] (%p368_p1) }
  0x38   : >> { %s380_s23 = sadd.s32 %s1498_s22, %s377_s21  ;;  %1623 = vmatprep.mubr.msk.f32.mxu0 (%p368_p1), %vm414_vm2, %v399_v8  ;;  %1633 = vmatpush3.msra.mxu1 (%p368_p1), %v603_v14  ;;  %v818_v14 = vld [vmem:[%s2372_s8 + $0xa8] sm:$0xff] (%p368_p1) }
  0x39   : >> { %s381_s0 = scalar_lea.vmem %s2374_s10, %s380_s23  ;;  %1634 = vmatprep.subr.mxu1 (%p368_p1), %v602_v15 }
  0x3a   : >> { %v382_v3 = vld [vmem:[%s381_s0] ss:$8 sm:$0x7]  ;;  %1635 = vmatpush3.msra.mxu1 (%p368_p1), %v602_v15  ;;  %v820_v15 = vld [vmem:[%s2372_s8 + $0xb8] sm:$0xff] (%p368_p1) }
  0x3b   : >> { %395 = vst.msk [vmem:[%s394_s27] ss:$8 sm:$0x7] %vm2036_vm1, %v382_v3  ;;  %1624 = vmatmul.mubr.msk.f32.gmra.mxu0 (%p368_p1), %vm414_vm2, %v400_v9  ;;  %1636 = vmatprep.subr.mxu1 (%p368_p1), %v601_v16 }
  0x3c   : > { %1626 = vmatprep.mubr.msk.f32.mxu0 %vm414_vm2, %v401_v10  ;;  %1637 = vmatpush3.msra.mxu1 %v601_v16  ;;  %v816_v16 = vld [vmem:[%s2372_s8 + $0x98] sm:$0xff] }
  0x3d   : > { %1638 = vmatprep.subr.mxu1 %v600_v17 }
  0x3e   : > { %1639 = vmatpush3.msra.mxu1 %v600_v17  ;;  %v815_v17 = vld [vmem:[%s2372_s8 + $0x90] sm:$0xff] }
  0x3f   : > { %1627 = vmatmul.mubr.msk.f32.gmra.mxu0 %vm414_vm2, %v402_v11  ;;  %1652 = vmatprep.subr.mxu1 %v820_v15 }
  0x40   : > { %1629 = vmatprep.mubr.msk.f32.mxu0 %vm414_vm2, %v403_v12 }
  0x43   : > { %1630 = vmatmul.mubr.msk.f32.gmra.mxu0 %vm414_vm2, %v404_v13  ;;  %v819_v13 = vld [vmem:[%s2372_s8 + $0xb0] sm:$0xff] }
  0x44   : > { %879 = vmatprep.subr.mxu0 %v819_v13 }
  0x45   : > { %880 = vmatpush1.msra.mxu0 %v818_v14 }
  0x46   : > { %881 = vmatprep.subr.mxu0 %v816_v16 }
  0x47   : > { %882 = vmatpush1.msra.mxu0 %v815_v17 }
  0xf7   : > { %v1622_v19 = vpop.f32.mrf.mxu0 }
  0xf8   : > { %v511_v20 = vadd.f32 %v1622_v19, %v1500_v18  ;;  %v813_v19 = vld [vmem:[%s2372_s8 + $0x80] sm:$0xff] }
  0xf9   : > { %v505_v21 = vpop.f32.mrf.mxu0  ;;  %883 = vmatprep.subr.mxu0 %v813_v19 }
  0xfa   : > { %v1510_v22 = vmul.f32 -1.442695, %v511_v20  ;;  %v506_v23 = vadd.f32 %v1500_v18, %v505_v21  ;;  %v814_v21 = vld [vmem:[%s2372_s8 + $0x88] sm:$0xff] }
  0xfb   : > { %v1625_v24 = vpop.f32.mrf.mxu0 }
  0xfc   : > { %1711 = vpow2.f32 %v1510_v22  ;;  %v1509_v25 = vmul.f32 -1.442695, %v506_v23  ;;  %v521_v26 = vadd.f32 %v1625_v24, %v1500_v18  ;;  %v810_v22 = vld [vmem:[%s2372_s8 + $0x68] sm:$0xff]  ;;  %v811_v24 = vld [vmem:[%s2372_s8 + $0x70] sm:$0xff] }
  0xfd   : > { %v515_v27 = vpop.f32.mrf.mxu0 }
  0xfe   : > { %1713 = vpow2.f32 %v1509_v25  ;;  %v1512_v28 = vmul.f32 -1.442695, %v521_v26  ;;  %v516_v29 = vadd.f32 %v1500_v18, %v515_v27  ;;  %v807_v25 = vld [vmem:[%s2372_s8 + $0x50] sm:$0xff]  ;;  %v808_v27 = vld [vmem:[%s2372_s8 + $0x58] sm:$0xff] }
  0xff   : > { %v1628_v30 = vpop.f32.mrf.mxu0 }
 0x100   : > { %1715 = vpow2.f32 %v1512_v28  ;;  %v1511_v31 = vmul.f32 -1.442695, %v516_v29  ;;  %v531_v32 = vadd.f32 %v1628_v30, %v1500_v18  ;;  %v804_v28 = vld [vmem:[%s2372_s8 + $0x38] sm:$0xff]  ;;  %v805_v30 = vld [vmem:[%s2372_s8 + $0x40] sm:$0xff] }
 0x101   : > { %v525_v33 = vpop.f32.mrf.mxu0 }
 0x102   : > { %1717 = vpow2.f32 %v1511_v31  ;;  %v1514_v34 = vmul.f32 -1.442695, %v531_v32  ;;  %v526_v35 = vadd.f32 %v1500_v18, %v525_v33  ;;  %v801_v31 = vld [vmem:[%s2372_s8 + $0x20] sm:$0xff]  ;;  %v802_v33 = vld [vmem:[%s2372_s8 + $0x28] sm:$0xff] }
 0x103   : > { %v1631_v36 = vpop.f32.mrf.mxu0 }
 0x104   : > { %1719 = vpow2.f32 %v1514_v34  ;;  %v1513_v37 = vmul.f32 -1.442695, %v526_v35  ;;  %v541_v38 = vadd.f32 %v1631_v36, %v1500_v18  ;;  %v798_v34 = vld [vmem:[%s2372_s8 + $0x8] sm:$0xff]  ;;  %v799_v36 = vld [vmem:[%s2372_s8 + $0x10] sm:$0xff] }
 0x105   : > { %v535_v39 = vpop.f32.mrf.mxu0 }
 0x106   : > { %1721 = vpow2.f32 %v1513_v37  ;;  %v1516_v40 = vmul.f32 -1.442695, %v541_v38  ;;  %v536_v41 = vadd.f32 %v1500_v18, %v535_v39  ;;  %v817_v18 = vld [vmem:[%s2372_s8 + $0xa0] sm:$0xff]  ;;  %v1924_v37 = vmov 0.0   ;;  %v1275_v39 = vld [vmem:[%s2012_s16 + $0x10] sm:$0xff] }
 0x107   : > { %927 = vmatprep.mubr.f32.mxu0 %v1924_v37 }
 0x108   : > { %1723 = vpow2.f32 %v1516_v40  ;;  %v1515_v42 = vmul.f32 -1.442695, %v536_v41  ;;  %v1925_v40 = vmov 0  }
 0x109   : > { %v1712_v43 = vpop.eup %1711  ;;  %1709 = vset.pattern.permute.xlu0 %v1925_v40  ;;  %1710 = vset.pattern.permute.xlu1 %v1925_v40 }
 0x10a   : > { %v569_v44 = vadd.f32 1.0, %v1712_v43  ;;  %1725 = vpow2.f32 %v1515_v42  ;;  %1293 = vperm.xlu1 %1710, %v1275_v39   ;;  %v1276_v42 = vld [vmem:[%s2012_s16 + $0x18] sm:$0xff]  ;;  %v1278_v43 = vld [vmem:[%s2012_s16 + $0x28] sm:$0xff] }
 0x10b   : > { %v1714_v45 = vpop.eup %1713 }
 0x10c   : > { %v568_v46 = vadd.f32 1.0, %v1714_v45  ;;  %1727 = vrcp.f32 %v569_v44  ;;  %v1277_v44 = vld [vmem:[%s2012_s16 + $0x20] sm:$0xff]  ;;  %v1280_v45 = vld [vmem:[%s2012_s16 + $0x38] sm:$0xff] }
 0x10d   : > { %v1716_v47 = vpop.eup %1715 }
 0x10e   : > { %1729 = vrcp.f32 %v568_v46  ;;  %v571_v48 = vadd.f32 1.0, %v1716_v47  ;;  %1298 = vperm.xlu1 %1710, %v1276_v42   ;;  %v1279_v46 = vld [vmem:[%s2012_s16 + $0x30] sm:$0xff]  ;;  %v1517_v47 = vld [vmem:[%s2371_s7] ss:$0 sm:$0xff] }
 0x10f   : > { %v1718_v49 = vpop.eup %1717 }
 0x110   : > { %v570_v50 = vadd.f32 1.0, %v1718_v49  ;;  %1731 = vrcp.f32 %v571_v48 }
 0x111   : > { %v1720_v51 = vpop.eup %1719 }
 0x112   : > { %1733 = vrcp.f32 %v570_v50  ;;  %v573_v52 = vadd.f32 1.0, %v1720_v51  ;;  %1308 = vperm.xlu1 %1710, %v1278_v43   ;;  %v824_v43 = vshrl.u32 %v383_v1, 7 }
 0x113   : > { %v1722_v53 = vpop.eup %1721 }
 0x114   : > { %v572_v54 = vadd.f32 1.0, %v1722_v53  ;;  %1735 = vrcp.f32 %v573_v52 }
 0x115   : > { %v1724_v55 = vpop.eup %1723 }
 0x116   : > { %1737 = vrcp.f32 %v572_v54  ;;  %v575_v56 = vadd.f32 1.0, %v1724_v55  ;;  %1318 = vperm.xlu1 %1710, %v1280_v45   ;;  %v821_v45 = vld [vmem:[%s2373_s9] sm:$0x7] }
 0x117   : > { %v1726_v57 = vpop.eup %1725 }
 0x118   : > { %v574_v58 = vadd.f32 1.0, %v1726_v57  ;;  %1739 = vrcp.f32 %v575_v56 }
 0x119   : > { %v1728_v59 = vpop.eup %1727 }
 0x11a   : > { %1741 = vrcp.f32 %v574_v58  ;;  %v593_v62 = vmul.f32 %v1728_v59, %v511_v20  ;;  %v812_v20 = vld [vmem:[%s2372_s8 + $0x78] sm:$0xff] }
 0x11b   : > { %v1730_v60 = vpop.eup %1729  ;;  %884 = vmatpush1.msra.mxu0 %v812_v20 }
 0x11c   : > { %v592_v61 = vmul.f32 %v1730_v60, %v506_v23  ;;  %885 = vmatprep.subr.mxu0 %v810_v22  ;;  %v809_v23 = vld [vmem:[%s2372_s8 + $0x60] sm:$0xff] }
 0x11d   : > { %v1732_v63 = vpop.eup %1731  ;;  %886 = vmatpush1.msra.mxu0 %v809_v23 }
 0x11e   : > { %1640 = vmatprep.mubr.msk.f32.mxu1 %vm611_vm3, %v592_v61  ;;  %v595_v4 = vmul.f32 %v1732_v63, %v521_v26  ;;  %887 = vmatprep.subr.mxu0 %v807_v25  ;;  %v806_v26 = vld [vmem:[%s2372_s8 + $0x48] sm:$0xff] }
 0x11f   : > { %v1734_v0 = vpop.eup %1733  ;;  %1641 = vmatmul.mubr.msk.f32.vlgmr.msra.gmra.mxu1 %vm611_vm3, %v593_v62  ;;  %888 = vmatpush1.msra.mxu0 %v806_v26 }
 0x120   : > { %v594_v3 = vmul.f32 %v1734_v0, %v516_v29  ;;  %1653 = vmatpush3.msra.mxu1 %v820_v15  ;;  %889 = vmatprep.subr.mxu0 %v804_v28  ;;  %v803_v29 = vld [vmem:[%s2372_s8 + $0x30] sm:$0xff] }
 0x121   : > { %v1736_v5 = vpop.eup %1735  ;;  %1654 = vmatprep.subr.mxu1 %v817_v18  ;;  %890 = vmatpush1.msra.mxu0 %v803_v29 }
 0x122   : > { %1643 = vmatprep.mubr.msk.f32.mxu1 %vm611_vm3, %v594_v3  ;;  %v597_v8 = vmul.f32 %v1736_v5, %v531_v32  ;;  %1655 = vmatpush3.msra.mxu1 %v817_v18  ;;  %v800_v32 = vld [vmem:[%s2372_s8 + $0x18] sm:$0xff] }
 0x123   : > { %v1738_v6 = vpop.eup %1737  ;;  %1644 = vmatmul.mubr.msk.f32.gmra.mxu1 %vm611_vm3, %v595_v4  ;;  %1656 = vmatprep.subr.mxu1 %v814_v21 }
 0x124   : > { %v596_v7 = vmul.f32 %v1738_v6, %v526_v35  ;;  %1657 = vmatpush3.msra.mxu1 %v814_v21  ;;  %891 = vmatprep.subr.mxu0 %v801_v31  ;;  %v797_v35 = vld [vmem:[%s2372_s8] sm:$0xff] }
 0x125   : > { %v1740_v9 = vpop.eup %1739  ;;  %1658 = vmatprep.subr.mxu1 %v811_v24  ;;  %892 = vmatpush1.msra.mxu0 %v800_v32 }
 0x126   : > { %1646 = vmatprep.mubr.msk.f32.mxu1 %vm611_vm3, %v596_v7  ;;  %v599_v12 = vmul.f32 %v1740_v9, %v541_v38  ;;  %1659 = vmatpush3.msra.mxu1 %v811_v24  ;;  %v1273_v38 = vld [vmem:[%s2012_s16] sm:$0xff] }
 0x127   : > { %v1742_v10 = vpop.eup %1741  ;;  %1647 = vmatmul.mubr.msk.f32.gmra.mxu1 %vm611_vm3, %v597_v8  ;;  %1660 = vmatprep.subr.mxu1 %v808_v27 }
 0x128   : > { %v598_v11 = vmul.f32 %v1742_v10, %v536_v41  ;;  %1661 = vmatpush3.msra.mxu1 %v808_v27  ;;  %893 = vmatprep.subr.mxu0 %v798_v34  ;;  %v1274_v41 = vld [vmem:[%s2012_s16 + $0x8] sm:$0xff] }
 0x129   : > { %1662 = vmatprep.subr.mxu1 %v805_v30  ;;  %894 = vmatpush1.msra.mxu0 %v797_v35 }
 0x12a   : > { %1649 = vmatprep.mubr.msk.f32.mxu1 %vm611_vm3, %v598_v11  ;;  %1663 = vmatpush3.msra.mxu1 %v805_v30 }
 0x12b   : > { %1650 = vmatmul.mubr.msk.f32.gmra.mxu1 %vm611_vm3, %v599_v12  ;;  %1664 = vmatprep.subr.mxu1 %v802_v33 }
 0x12c   : > { %1665 = vmatpush3.msra.mxu1 %v802_v33  ;;  %1283 = vperm.xlu0 %1709, %v1273_v38  }
 0x12d   : > { %1666 = vmatprep.subr.mxu1 %v799_v36 }
 0x12e   : > { %1667 = vmatpush3.msra.mxu1 %v799_v36 }
 0x130   : > { %1288 = vperm.xlu0 %1709, %v1274_v41  }
 0x134   : > { %1303 = vperm.xlu0 %1709, %v1277_v44   ;;  %v825_v44 = vsub.s32 0, %v824_v43 }
 0x138   : > { %1313 = vperm.xlu0 %1709, %v1279_v46   ;;  %v833_v46 = vsub.s32 2, %v824_v43 }
 0x1df   : > { %v1642_v48 = vpop.f32.mrf.mxu1 }
 0x1e0   : > { %v708_v49 = vadd.f32 %v1642_v48, %v1517_v47  ;;  %v2201_v48 = vrot.slane %v821_v45, %v825_v44 }
 0x1e1   : > { %v702_v50 = vpop.f32.mrf.mxu1 }
 0x1e2   : > { %v1527_v51 = vmul.f32 -1.442695, %v708_v49  ;;  %v703_v52 = vadd.f32 %v1517_v47, %v702_v50 }
 0x1e3   : > { %v1645_v53 = vpop.f32.mrf.mxu1 }
 0x1e4   : > { %1743 = vpow2.f32 %v1527_v51  ;;  %v1526_v54 = vmul.f32 -1.442695, %v703_v52  ;;  %v718_v55 = vadd.f32 %v1645_v53, %v1517_v47 }
 0x1e5   : > { %v712_v56 = vpop.f32.mrf.mxu1 }
 0x1e6   : > { %1745 = vpow2.f32 %v1526_v54  ;;  %v1529_v57 = vmul.f32 -1.442695, %v718_v55  ;;  %v713_v58 = vadd.f32 %v1517_v47, %v712_v56 }
 0x1e7   : > { %v1648_v59 = vpop.f32.mrf.mxu1 }
 0x1e8   : > { %1747 = vpow2.f32 %v1529_v57  ;;  %v1528_v60 = vmul.f32 -1.442695, %v713_v58  ;;  %v728_v61 = vadd.f32 %v1648_v59, %v1517_v47 }
 0x1e9   : > { %v722_v62 = vpop.f32.mrf.mxu1 }
 0x1ea   : > { %1749 = vpow2.f32 %v1528_v60  ;;  %v1531_v63 = vmul.f32 -1.442695, %v728_v61  ;;  %v723_v0 = vadd.f32 %v1517_v47, %v722_v62 }
 0x1eb   : > { %v1651_v3 = vpop.f32.mrf.mxu1 }
 0x1ec   : > { %1751 = vpow2.f32 %v1531_v63  ;;  %v1530_v4 = vmul.f32 -1.442695, %v723_v0  ;;  %v738_v5 = vadd.f32 %v1651_v3, %v1517_v47 }
 0x1ed   : > { %v732_v6 = vpop.f32.mrf.mxu1 }
 0x1ee   : > { %1753 = vpow2.f32 %v1530_v4  ;;  %v1533_v7 = vmul.f32 -1.442695, %v738_v5  ;;  %v733_v8 = vadd.f32 %v1517_v47, %v732_v6  ;;  %v829_v47 = vsub.s32 1, %v824_v43 }
 0x1f0   : > { %1755 = vpow2.f32 %v1533_v7  ;;  %v1532_v9 = vmul.f32 -1.442695, %v733_v8  ;;  %v2203_v50 = vrot.slane %v821_v45, %v829_v47 }
 0x1f1   : > { %v1744_v10 = vpop.eup %1743 }
 0x1f2   : > { %v766_v11 = vadd.f32 1.0, %v1744_v10  ;;  %1757 = vpow2.f32 %v1532_v9 }
 0x1f3   : > { %v1746_v12 = vpop.eup %1745 }
 0x1f4   : > { %v765_v13 = vadd.f32 1.0, %v1746_v12  ;;  %1759 = vrcp.f32 %v766_v11 }
 0x1f5   : > { %v1748_v14 = vpop.eup %1747 }
 0x1f6   : > { %1761 = vrcp.f32 %v765_v13  ;;  %v768_v15 = vadd.f32 1.0, %v1748_v14 }
 0x1f7   : > { %v1750_v16 = vpop.eup %1749 }
 0x1f8   : > { %v767_v17 = vadd.f32 1.0, %v1750_v16  ;;  %1763 = vrcp.f32 %v768_v15 }
 0x1f9   : > { %v1752_v18 = vpop.eup %1751 }
 0x1fa   : > { %1765 = vrcp.f32 %v767_v17  ;;  %v770_v19 = vadd.f32 1.0, %v1752_v18 }
 0x1fb   : > { %v1754_v20 = vpop.eup %1753 }
 0x1fc   : > { %v769_v21 = vadd.f32 1.0, %v1754_v20  ;;  %1767 = vrcp.f32 %v770_v19 }
 0x1fd   : > { %v1756_v22 = vpop.eup %1755 }
 0x1fe   : > { %1769 = vrcp.f32 %v769_v21  ;;  %v772_v23 = vadd.f32 1.0, %v1756_v22 }
 0x1ff   : > { %v1758_v24 = vpop.eup %1757 }
 0x200   : > { %v771_v25 = vadd.f32 1.0, %v1758_v24  ;;  %1771 = vrcp.f32 %v772_v23 }
 0x201   : > { %v1760_v26 = vpop.eup %1759 }
 0x202   : > { %1773 = vrcp.f32 %v771_v25  ;;  %v790_v29 = vmul.f32 %v1760_v26, %v708_v49  ;;  %v834_v49 = vrot.slane %v821_v45, %v833_v46 }
 0x203   : > { %v1762_v27 = vpop.eup %1761 }
 0x204   : > { %v789_v28 = vmul.f32 %v1762_v27, %v703_v52 }
 0x205   : > { %v1764_v30 = vpop.eup %1763 }
 0x206   : > { %1534 = vmatmul.mubr.msk.f32.vlgmr.msra.gmra.mxu0 %vm838_vm4, %v789_v28  ;;  %1668 = vmatprep.mubr.msk.f32.mxu1 %vm838_vm4, %v789_v28  ;;  %v792_v33 = vmul.f32 %v1764_v30, %v718_v55 }
 0x207   : > { %v1766_v31 = vpop.eup %1765  ;;  %1669 = vmatmul.mubr.msk.f32.vlgmr.msra.gmra.mxu1 %vm838_vm4, %v790_v29  ;;  %933 = vmatprep.mubr.f32.mxu0 %v1924_v37 }
 0x208   : > { %v791_v32 = vmul.f32 %v1766_v31, %v713_v58 }
 0x209   : > { %v1768_v34 = vpop.eup %1767 }
 0x20a   : > { %1535 = vmatmul.mubr.msk.f32.gmra.mxu0 %vm838_vm4, %v790_v29  ;;  %1671 = vmatprep.mubr.msk.f32.mxu1 %vm838_vm4, %v791_v32  ;;  %v794_v38 = vmul.f32 %v1768_v34, %v728_v61 }
 0x20b   : > { %v1770_v35 = vpop.eup %1769  ;;  %1672 = vmatmul.mubr.msk.f32.gmra.mxu1 %vm838_vm4, %v792_v33  ;;  %939 = vmatprep.mubr.f32.mxu0 %v1924_v37 }
 0x20c   : > { %v793_v36 = vmul.f32 %v1770_v35, %v723_v0 }
 0x20d   : > { %v1772_v39 = vpop.eup %1771 }
 0x20e   : > { %1536 = vmatmul.mubr.msk.f32.gmra.mxu0 %vm838_vm4, %v791_v32  ;;  %1674 = vmatprep.mubr.msk.f32.mxu1 %vm838_vm4, %v793_v36  ;;  %v796_v42 = vmul.f32 %v1772_v39, %v738_v5 }
 0x20f   : > { %v1774_v40 = vpop.eup %1773  ;;  %1675 = vmatmul.mubr.msk.f32.gmra.mxu1 %vm838_vm4, %v794_v38  ;;  %945 = vmatprep.mubr.f32.mxu0 %v1924_v37 }
 0x210   : > { %v795_v41 = vmul.f32 %v1774_v40, %v733_v8 }
 0x212   : > { %1537 = vmatmul.mubr.msk.f32.gmra.mxu0 %vm838_vm4, %v792_v33  ;;  %1677 = vmatprep.mubr.msk.f32.mxu1 %vm838_vm4, %v795_v41 }
 0x213   : > { %1678 = vmatmul.mubr.msk.f32.gmra.mxu1 %vm838_vm4, %v796_v42  ;;  %951 = vmatprep.mubr.f32.mxu0 %v1924_v37 }
 0x216   : > { %1538 = vmatmul.mubr.msk.f32.gmra.mxu0 %vm838_vm4, %v793_v36 }
 0x217   : > { %957 = vmatprep.mubr.f32.mxu0 %v1924_v37 }
 0x21a   : > { %1539 = vmatmul.mubr.msk.f32.gmra.mxu0 %vm838_vm4, %v794_v38 }
 0x21b   : > { %963 = vmatprep.mubr.f32.mxu0 %v1924_v37 }
 0x21e   : > { %1540 = vmatmul.mubr.msk.f32.gmra.mxu0 %vm838_vm4, %v795_v41 }
 0x21f   : > { %969 = vmatprep.mubr.f32.mxu0 %v1924_v37 }
 0x222   : > { %1541 = vmatmul.mubr.msk.f32.gmra.mxu0 %vm838_vm4, %v796_v42 }
 0x2c6   : > { %v929_v51 = vpop.f32.mrf.mxu0 }
 0x2c7   : > { %v2206_v52 = vadd.f32 %v929_v51, %v2201_v48  ;;  %v1670_v37 = vpop.f32.mrf.mxu1 }
 0x2c8   : > { %v2208_v53 = vadd.f32 %v1670_v37, %v834_v49  ;;  %v931_v1 = vpop.f32.mrf.mxu0 }
 0x2c9   : > { %v1550_v54 = vmul.f32 -1.442695, %v2206_v52  ;;  %v2212_v55 = vadd.f32 %v931_v1, %v2203_v50  ;;  %v1042_v56 = vpop.f32.mrf.mxu1 }
 0x2ca   : > { %v1555_v57 = vmul.f32 -1.442695, %v2208_v53  ;;  %v2215_v58 = vadd.f32 %v1042_v56, %v834_v49  ;;  %v935_v59 = vpop.f32.mrf.mxu0 }
 0x2cb   : > { %1775 = vpow2.f32 %v1550_v54  ;;  %v1551_v60 = vmul.f32 -1.442695, %v2212_v55  ;;  %v2219_v61 = vadd.f32 %v935_v59, %v2201_v48  ;;  %v1673_v62 = vpop.f32.mrf.mxu1 }
 0x2cc   : > { %1777 = vpow2.f32 %v1555_v57  ;;  %v1552_v63 = vmul.f32 -1.442695, %v2215_v58  ;;  %v2222_v0 = vadd.f32 %v1673_v62, %v834_v49  ;;  %v937_v3 = vpop.f32.mrf.mxu0 }
 0x2cd   : > { %1779 = vpow2.f32 %v1551_v60  ;;  %v1553_v4 = vmul.f32 -1.442695, %v2219_v61  ;;  %v2226_v5 = vadd.f32 %v937_v3, %v2203_v50  ;;  %v1052_v6 = vpop.f32.mrf.mxu1 }
 0x2ce   : > { %1781 = vpow2.f32 %v1552_v63  ;;  %v1561_v7 = vmul.f32 -1.442695, %v2222_v0  ;;  %v2229_v8 = vadd.f32 %v1052_v6, %v834_v49  ;;  %v941_v9 = vpop.f32.mrf.mxu0 }
 0x2cf   : > { %1783 = vpow2.f32 %v1553_v4  ;;  %v1554_v10 = vmul.f32 -1.442695, %v2226_v5  ;;  %v2233_v11 = vadd.f32 %v941_v9, %v2201_v48  ;;  %v1676_v12 = vpop.f32.mrf.mxu1 }
 0x2d0   : > { %1785 = vpow2.f32 %v1561_v7  ;;  %v1558_v13 = vmul.f32 -1.442695, %v2229_v8  ;;  %v2236_v14 = vadd.f32 %v1676_v12, %v834_v49  ;;  %v943_v15 = vpop.f32.mrf.mxu0 }
 0x2d1   : > { %1787 = vpow2.f32 %v1554_v10  ;;  %v1556_v16 = vmul.f32 -1.442695, %v2233_v11  ;;  %v2240_v17 = vadd.f32 %v943_v15, %v2203_v50  ;;  %v1062_v18 = vpop.f32.mrf.mxu1  ;;  %v1284_v15 = vpop.permute.xlu0 %1283 }
 0x2d2   : > { %1789 = vpow2.f32 %v1558_v13  ;;  %v1567_v19 = vmul.f32 -1.442695, %v2236_v14  ;;  %v2243_v20 = vadd.f32 %v1062_v18, %v834_v49  ;;  %v947_v21 = vpop.f32.mrf.mxu0 }
 0x2d3   : > { %1791 = vpow2.f32 %v1556_v16  ;;  %v1557_v22 = vmul.f32 -1.442695, %v2240_v17  ;;  %v2247_v23 = vadd.f32 %v947_v21, %v2201_v48  ;;  %v1679_v24 = vpop.f32.mrf.mxu1  ;;  %v2264_v16 = vpop.permute.xlu1 %1293 }
 0x2d4   : > { %1793 = vpow2.f32 %v1567_v19  ;;  %v1564_v25 = vmul.f32 -1.442695, %v2243_v20  ;;  %v2250_v26 = vadd.f32 %v1679_v24, %v834_v49  ;;  %v949_v27 = vpop.f32.mrf.mxu0 }
 0x2d5   : > { %1795 = vpow2.f32 %v1557_v22  ;;  %v1559_v28 = vmul.f32 -1.442695, %v2247_v23  ;;  %v2254_v29 = vadd.f32 %v949_v27, %v2203_v50  ;;  %v1072_v30 = vpop.f32.mrf.mxu1 }
 0x2d6   : > { %1797 = vpow2.f32 %v1564_v25  ;;  %v1573_v31 = vmul.f32 -1.442695, %v2250_v26  ;;  %v2257_v32 = vadd.f32 %v1072_v30, %v834_v49  ;;  %v953_v33 = vpop.f32.mrf.mxu0 }
 0x2d7   : > { %1799 = vpow2.f32 %v1559_v28  ;;  %v1560_v34 = vmul.f32 -1.442695, %v2254_v29  ;;  %v2262_v13 = vadd.f32 %v953_v33, %v2201_v48 }
 0x2d8   : > { %v1776_v35 = vpop.eup %1775  ;;  %1801 = vpow2.f32 %v1573_v31  ;;  %v1570_v36 = vmul.f32 -1.442695, %v2257_v32  ;;  %v955_v38 = vpop.f32.mrf.mxu0 }
 0x2d9   : > { %v1778_v39 = vpop.eup %1777  ;;  %v1153_v40 = vadd.f32 1.0, %v1776_v35  ;;  %1803 = vpow2.f32 %v1560_v34  ;;  %v2267_v21 = vadd.f32 %v955_v38, %v2203_v50  ;;  %v1562_v38 = vmul.f32 -1.442695, %v2262_v13 }
 0x2da   : > { %v1780_v41 = vpop.eup %1779  ;;  %v1158_v42 = vadd.f32 1.0, %v1778_v39  ;;  %1805 = vpow2.f32 %v1570_v36  ;;  %v959_v43 = vpop.f32.mrf.mxu0 }
 0x2db   : > { %v1782_v44 = vpop.eup %1781  ;;  %1807 = vrcp.f32 %v1153_v40  ;;  %v1154_v45 = vadd.f32 1.0, %v1780_v41  ;;  %v2270_v25 = vadd.f32 %v959_v43, %v2201_v48 }
 0x2dc   : > { %v1784_v46 = vpop.eup %1783  ;;  %1809 = vrcp.f32 %v1158_v42  ;;  %v1155_v47 = vadd.f32 1.0, %v1782_v44  ;;  %v961_v49 = vpop.f32.mrf.mxu0  ;;  %v1563_v42 = vmul.f32 -1.442695, %v2267_v21 }
 0x2dd   : > { %v1786_v51 = vpop.eup %1785  ;;  %1811 = vrcp.f32 %v1154_v45  ;;  %v1156_v37 = vadd.f32 1.0, %v1784_v46  ;;  %v2273_v27 = vadd.f32 %v961_v49, %v2203_v50  ;;  %v1565_v46 = vmul.f32 -1.442695, %v2270_v25  ;;  %v1289_v49 = vpop.permute.xlu0 %1288 }
 0x2de   : > { %v1788_v1 = vpop.eup %1787  ;;  %1813 = vrcp.f32 %v1155_v47  ;;  %v1164_v54 = vadd.f32 1.0, %v1786_v51  ;;  %v965_v56 = vpop.f32.mrf.mxu0 }
 0x2df   : > { %v1790_v57 = vpop.eup %1789  ;;  %1815 = vrcp.f32 %v1156_v37  ;;  %v1157_v59 = vadd.f32 1.0, %v1788_v1  ;;  %v2276_v33 = vadd.f32 %v965_v56, %v2201_v48  ;;  %v1566_v47 = vmul.f32 -1.442695, %v2273_v27  ;;  %v2292_v51 = vpop.permute.xlu1 %1298 }
 0x2e0   : > { %v1792_v60 = vpop.eup %1791  ;;  %1817 = vrcp.f32 %v1164_v54  ;;  %v1161_v62 = vadd.f32 1.0, %v1790_v57  ;;  %v967_v63 = vpop.f32.mrf.mxu0  ;;  %v1249_v54 = vld [vmem:[#allocation2] sm:$0xff] }
 0x2e1   : > { %v1794_v3 = vpop.eup %1793  ;;  %1819 = vrcp.f32 %v1157_v59  ;;  %v1159_v4 = vadd.f32 1.0, %v1792_v60  ;;  %v2279_v34 = vadd.f32 %v967_v63, %v2203_v50  ;;  %v1568_v1 = vmul.f32 -1.442695, %v2276_v33  ;;  %v1254_v60 = vld [vmem:[#allocation2 + $0x28] sm:$0xff] }
 0x2e2   : > { %v1796_v6 = vpop.eup %1795  ;;  %1821 = vrcp.f32 %v1161_v62  ;;  %v1170_v7 = vadd.f32 1.0, %v1794_v3  ;;  %v971_v9 = vpop.f32.mrf.mxu0  ;;  %v1250_v3 = vld [vmem:[#allocation2 + $0x8] sm:$0xff] }
 0x2e3   : > { %v1798_v10 = vpop.eup %1797  ;;  %1823 = vrcp.f32 %v1159_v4  ;;  %v1160_v12 = vadd.f32 1.0, %v1796_v6  ;;  %v2283_v39 = vadd.f32 %v971_v9, %v2201_v48  ;;  %v1251_v9 = vld [vmem:[#allocation2 + $0x10] sm:$0xff] }
 0x2e4   : > { %v1800_v18 = vpop.eup %1799  ;;  %1825 = vrcp.f32 %v1170_v7  ;;  %v1167_v19 = vadd.f32 1.0, %v1798_v10  ;;  %v973_v28 = vpop.f32.mrf.mxu0 }
 0x2e5   : > { %v1802_v22 = vpop.eup %1801  ;;  %1827 = vrcp.f32 %v1160_v12  ;;  %v1162_v24 = vadd.f32 1.0, %v1800_v18  ;;  %v2287_v43 = vadd.f32 %v973_v28, %v2203_v50  ;;  %v1569_v50 = vmul.f32 -1.442695, %v2279_v34 }
 0x2e6   : > { %v1804_v30 = vpop.eup %1803  ;;  %1829 = vrcp.f32 %v1167_v19  ;;  %v1176_v31 = vadd.f32 1.0, %v1802_v22  ;;  %v1571_v57 = vmul.f32 -1.442695, %v2283_v39  ;;  %v1252_v22 = vld [vmem:[#allocation2 + $0x18] sm:$0xff] }
 0x2e7   : > { %v1806_v35 = vpop.eup %1805  ;;  %1831 = vrcp.f32 %v1162_v24  ;;  %v1163_v36 = vadd.f32 1.0, %v1804_v30 }
 0x2e8   : > { %v1808_v40 = vpop.eup %1807  ;;  %1833 = vrcp.f32 %v1176_v31  ;;  %v1173_v41 = vadd.f32 1.0, %v1806_v35  ;;  %v1260_v35 = vld [vmem:[#allocation2 + $0x58] sm:$0xff] }
 0x2e9   : > { %v1810_v44 = vpop.eup %1809  ;;  %v1225_v45 = vmul.f32 %v1808_v40, %v2206_v52  ;;  %1835 = vrcp.f32 %v1163_v36 }
 0x2ea   : > { %v1812_v48 = vpop.eup %1811  ;;  %v1230_v37 = vmul.f32 %v1810_v44, %v2208_v53  ;;  %1837 = vrcp.f32 %v1173_v41  ;;  %v1572_v53 = vmul.f32 -1.442695, %v2287_v43 }
 0x2eb   : > { %v1814_v56 = vpop.eup %1813  ;;  %v1226_v52 = vmul.f32 %v1812_v48, %v2212_v55  ;;  %1839 = vpow2.f32 %v1562_v38  ;;  %v1321_v59 = vmul.f32 %v1284_v15, %v1225_v45  ;;  %v1255_v48 = vld [vmem:[#allocation2 + $0x30] sm:$0xff] }
 0x2ec   : > { %v1816_v62 = vpop.eup %1815  ;;  %v1227_v63 = vmul.f32 %v1814_v56, %v2215_v58  ;;  %1841 = vpow2.f32 %v1563_v42  ;;  %v1326_v4 = vmul.f32 %v1289_v49, %v1230_v37  ;;  %v1257_v42 = vld [vmem:[#allocation2 + $0x40] sm:$0xff] }
 0x2ed   : > { %v1818_v6 = vpop.eup %1817  ;;  %v1228_v7 = vmul.f32 %v1816_v62, %v2219_v61  ;;  %1843 = vpow2.f32 %v1565_v46  ;;  %v1322_v10 = vmul.f32 %v1284_v15, %v1226_v52  ;;  %v1345_v55 = vmul.f32 %v1321_v59, %v1249_v54  ;;  %v2304_v61 = vpop.permute.xlu1 %1308  ;;  %v1256_v59 = vld [vmem:[#allocation2 + $0x38] sm:$0xff] }
 0x2ee   : > { %v1820_v12 = vpop.eup %1819  ;;  %v1236_v18 = vmul.f32 %v1818_v6, %v2222_v0  ;;  %1845 = vpow2.f32 %v1566_v47  ;;  %v1323_v19 = vmul.f32 %v1284_v15, %v1227_v63  ;;  %v1350_v24 = vmul.f32 %v1326_v4, %v1254_v60  ;;  %v1253_v0 = vld [vmem:[#allocation2 + $0x20] sm:$0xff]  ;;  %v2310_v46 = vpop.permute.xlu0 %1303 }
 0x2ef   : > { %v1822_v58 = vpop.eup %1821  ;;  %v1229_v28 = vmul.f32 %v1820_v12, %v2226_v5  ;;  %1847 = vpow2.f32 %v1568_v1  ;;  %v1346_v30 = vmul.f32 %v1322_v10, %v1250_v3  ;;  %1369 = vst [vmem:[#allocation2] sm:$0xff] %v1345_v55  ;;  %v1324_v31 = vmul.f32 %v1289_v49, %v1228_v7  ;;  %v1263_v3 = vld [vmem:[#allocation2 + $0x70] sm:$0xff] }
 0x2f0   : > { %v1824_v36 = vpop.eup %1823  ;;  %v1233_v38 = vmul.f32 %v1822_v58, %v2229_v8  ;;  %1849 = vpow2.f32 %v1569_v50  ;;  %v1347_v40 = vmul.f32 %v1323_v19, %v1251_v9  ;;  %1374 = vst.msk [vmem:[#allocation2 + $0x28] sm:$0xff] %vm838_vm4, %v1350_v24  ;;  %v1332_v15 = vmul.f32 %v2292_v51, %v1236_v18  ;;  %v1272_v18 = vld [vmem:[#allocation2 + $0xb8] sm:$0xff] }
 0x2f1   : > { %v1826_v41 = vpop.eup %1825  ;;  %v1231_v5 = vmul.f32 %v1824_v36, %v2233_v11  ;;  %1851 = vpow2.f32 %v1571_v57  ;;  %1370 = vst [vmem:[#allocation2 + $0x8] sm:$0xff] %v1346_v30  ;;  %v1325_v44 = vmul.f32 %v1289_v49, %v1229_v28  ;;  %v1348_v45 = vmul.f32 %v1324_v31, %v1252_v22  ;;  %v1266_v49 = vld [vmem:[#allocation2 + $0x88] sm:$0xff]  ;;  %v2322_v4 = vpop.permute.xlu1 %1318  ;;  %v1269_v36 = vld [vmem:[#allocation2 + $0xa0] sm:$0xff] }
 0x2f2   : > { %v1828_v47 = vpop.eup %1827  ;;  %v1242_v8 = vmul.f32 %v1826_v41, %v2236_v14  ;;  %1853 = vpow2.f32 %v1572_v53  ;;  %1371 = vst.msk [vmem:[#allocation2 + $0x10] sm:$0xff] %vm838_vm4, %v1347_v40  ;;  %v1329_v37 = vmul.f32 %v2264_v16, %v1233_v38  ;;  %v1356_v1 = vmul.f32 %v1332_v15, %v1260_v35  ;;  %v2329_v19 = vpop.permute.xlu0 %1313 }
 0x2f3   : > { %v1830_v50 = vpop.eup %1829  ;;  %v1232_v11 = vmul.f32 %v1828_v47, %v2240_v17  ;;  %v1327_v54 = vmul.f32 %v2264_v16, %v1231_v5  ;;  %v1349_v56 = vmul.f32 %v1325_v44, %v1253_v0  ;;  %1372 = vst [vmem:[#allocation2 + $0x18] sm:$0xff] %v1348_v45 }
 0x2f4   : > { %v1832_v52 = vpop.eup %1831  ;;  %v1239_v57 = vmul.f32 %v1830_v50, %v2243_v20  ;;  %v1353_v14 = vmul.f32 %v1329_v37, %v1257_v42  ;;  %1380 = vst.msk [vmem:[#allocation2 + $0x58] sm:$0xff] %vm838_vm4, %v1356_v1  ;;  %v1338_v60 = vmul.f32 %v2304_v61, %v1242_v8  ;;  %v1258_v20 = vld [vmem:[#allocation2 + $0x48] sm:$0xff] }
 0x2f5   : > { %v1834_v62 = vpop.eup %1833  ;;  %v1234_v63 = vmul.f32 %v1832_v52, %v2247_v23  ;;  %v1328_v53 = vmul.f32 %v2264_v16, %v1232_v11  ;;  %v1351_v17 = vmul.f32 %v1327_v54, %v1255_v48  ;;  %1373 = vst [vmem:[#allocation2 + $0x20] sm:$0xff] %v1349_v56 }
 0x2f6   : > { %v1836_v6 = vpop.eup %1835  ;;  %v1248_v7 = vmul.f32 %v1834_v62, %v2250_v26  ;;  %1377 = vst.msk [vmem:[#allocation2 + $0x40] sm:$0xff] %vm838_vm4, %v1353_v14  ;;  %v1362_v9 = vmul.f32 %v1338_v60, %v1266_v49  ;;  %v1335_v10 = vmul.f32 %v2310_v46, %v1239_v57  ;;  %v1259_v26 = vld [vmem:[#allocation2 + $0x50] sm:$0xff]  ;;  %v1261_v57 = vld [vmem:[#allocation2 + $0x60] sm:$0xff]  ;;  %v1262_v60 = vld [vmem:[#allocation2 + $0x68] sm:$0xff] }
 0x2f7   : > { %v1838_v55 = vpop.eup %1837  ;;  %v1235_v12 = vmul.f32 %v1836_v6, %v2254_v29  ;;  %v1352_v23 = vmul.f32 %v1328_v53, %v1256_v59  ;;  %1375 = vst [vmem:[#allocation2 + $0x30] sm:$0xff] %v1351_v17  ;;  %v1330_v16 = vmul.f32 %v2292_v51, %v1234_v63  ;;  %v1264_v17 = vld [vmem:[#allocation2 + $0x78] sm:$0xff] }
 0x2f8   : > { %v1840_v22 = vpop.eup %1839  ;;  %v1245_v24 = vmul.f32 %v1838_v55, %v2257_v32  ;;  %1386 = vst.msk [vmem:[#allocation2 + $0x88] sm:$0xff] %vm838_vm4, %v1362_v9  ;;  %v1359_v58 = vmul.f32 %v1335_v10, %v1263_v3  ;;  %v1344_v28 = vmul.f32 %v2322_v4, %v1248_v7 }
 0x2f9   : > { %v1842_v30 = vpop.eup %1841  ;;  %v1165_v31 = vadd.f32 1.0, %v1840_v22  ;;  %1376 = vst [vmem:[#allocation2 + $0x38] sm:$0xff] %v1352_v23  ;;  %v1331_v29 = vmul.f32 %v2292_v51, %v1235_v12  ;;  %v1354_v35 = vmul.f32 %v1330_v16, %v1258_v20  ;;  %v1267_v12 = vld [vmem:[#allocation2 + $0x90] sm:$0xff] }
 0x2fa   : > { %v1844_v38 = vpop.eup %1843  ;;  %v1166_v40 = vadd.f32 1.0, %v1842_v30  ;;  %1383 = vst.msk [vmem:[#allocation2 + $0x70] sm:$0xff] %vm838_vm4, %v1359_v58  ;;  %v1368_v0 = vmul.f32 %v1344_v28, %v1272_v18  ;;  %v1341_v32 = vmul.f32 %v2329_v19, %v1245_v24  ;;  %v1270_v24 = vld [vmem:[#allocation2 + $0xa8] sm:$0xff] }
 0x2fb   : > { %v1846_v15 = vpop.eup %1845  ;;  %1855 = vrcp.f32 %v1165_v31  ;;  %v1168_v41 = vadd.f32 1.0, %v1844_v38  ;;  %v1355_v5 = vmul.f32 %v1331_v29, %v1259_v26  ;;  %1378 = vst [vmem:[#allocation2 + $0x48] sm:$0xff] %v1354_v35 }
 0x2fc   : > { %v1848_v42 = vpop.eup %1847  ;;  %1857 = vrcp.f32 %v1166_v40  ;;  %v1169_v44 = vadd.f32 1.0, %v1846_v15  ;;  %1392 = vst.msk [vmem:[#allocation2 + $0xb8] sm:$0xff] %vm838_vm4, %v1368_v0  ;;  %v1365_v51 = vmul.f32 %v1341_v32, %v1269_v36 }
 0x2fd   : > { %v1850_v45 = vpop.eup %1849  ;;  %1859 = vrcp.f32 %v1168_v41  ;;  %v1171_v47 = vadd.f32 1.0, %v1848_v42  ;;  %1379 = vst [vmem:[#allocation2 + $0x50] sm:$0xff] %v1355_v5 }
 0x2fe   : > { %v1852_v8 = vpop.eup %1851  ;;  %1861 = vrcp.f32 %v1169_v44  ;;  %v1172_v48 = vadd.f32 1.0, %v1850_v45  ;;  %1389 = vst.msk [vmem:[#allocation2 + $0xa0] sm:$0xff] %vm838_vm4, %v1365_v51 }
 0x2ff   : > { %v1854_v37 = vpop.eup %1853  ;;  %1863 = vrcp.f32 %v1171_v47  ;;  %v1174_v1 = vadd.f32 1.0, %v1852_v8 }
 0x300   : > { %1865 = vrcp.f32 %v1172_v48  ;;  %v1175_v50 = vadd.f32 1.0, %v1854_v37 }
 0x301   : > { %1867 = vrcp.f32 %v1174_v1 }
 0x302   : > { %1869 = vrcp.f32 %v1175_v50 }
 0x308   : > { %v1856_v11 = vpop.eup %1855 }
 0x309   : > { %v1858_v54 = vpop.eup %1857  ;;  %v1237_v56 = vmul.f32 %v1856_v11, %v2262_v13  ;;  %v1265_v13 = vld [vmem:[#allocation2 + $0x80] sm:$0xff] }
 0x30a   : > { %v1860_v49 = vpop.eup %1859  ;;  %v1238_v52 = vmul.f32 %v1858_v54, %v2267_v21 }
 0x30b   : > { %v1862_v59 = vpop.eup %1861  ;;  %v1240_v14 = vmul.f32 %v1860_v49, %v2270_v25  ;;  %v1333_v62 = vmul.f32 %v2310_v46, %v1237_v56 }
 0x30c   : > { %v1864_v63 = vpop.eup %1863  ;;  %v1241_v53 = vmul.f32 %v1862_v59, %v2273_v27  ;;  %v1334_v3 = vmul.f32 %v2310_v46, %v1238_v52  ;;  %v1268_v46 = vld [vmem:[#allocation2 + $0x98] sm:$0xff] }
 0x30d   : > { %v1866_v6 = vpop.eup %1865  ;;  %v1243_v7 = vmul.f32 %v1864_v63, %v2276_v33  ;;  %v1336_v20 = vmul.f32 %v2304_v61, %v1240_v14  ;;  %v1357_v21 = vmul.f32 %v1333_v62, %v1261_v57 }
 0x30e   : > { %v1868_v9 = vpop.eup %1867  ;;  %v1244_v10 = vmul.f32 %v1866_v6, %v2279_v34  ;;  %v1337_v25 = vmul.f32 %v2304_v61, %v1241_v53  ;;  %v1358_v55 = vmul.f32 %v1334_v3, %v1262_v60  ;;  %v1271_v34 = vld [vmem:[#allocation2 + $0xb0] sm:$0xff] }
 0x30f   : > { %v1870_v23 = vpop.eup %1869  ;;  %v1246_v27 = vmul.f32 %v1868_v9, %v2283_v39  ;;  %v1360_v16 = vmul.f32 %v1336_v20, %v1264_v17  ;;  %1381 = vst [vmem:[#allocation2 + $0x60] sm:$0xff] %v1357_v21  ;;  %v1339_v18 = vmul.f32 %v2329_v19, %v1243_v7 }
 0x310   : > { %v1247_v33 = vmul.f32 %v1870_v23, %v2287_v43  ;;  %v1361_v22 = vmul.f32 %v1337_v25, %v1265_v13  ;;  %1382 = vst [vmem:[#allocation2 + $0x68] sm:$0xff] %v1358_v55  ;;  %v1340_v26 = vmul.f32 %v2329_v19, %v1244_v10 }
 0x311   : > { %1384 = vst [vmem:[#allocation2 + $0x78] sm:$0xff] %v1360_v16  ;;  %v1342_v61 = vmul.f32 %v2322_v4, %v1246_v27  ;;  %v1363_v58 = vmul.f32 %v1339_v18, %v1267_v12 }
 0x312   : > { %1385 = vst [vmem:[#allocation2 + $0x80] sm:$0xff] %v1361_v22  ;;  %v1343_v39 = vmul.f32 %v2322_v4, %v1247_v33  ;;  %v1364_v28 = vmul.f32 %v1340_v26, %v1268_v46 }
 0x313   : > { %v1366_v30 = vmul.f32 %v1342_v61, %v1270_v24  ;;  %1387 = vst [vmem:[#allocation2 + $0x90] sm:$0xff] %v1363_v58 }
 0x314   : > { %v1367_v31 = vmul.f32 %v1343_v39, %v1271_v34  ;;  %1388 = vst [vmem:[#allocation2 + $0x98] sm:$0xff] %v1364_v28 }
 0x315   : > { %1390 = vst [vmem:[#allocation2 + $0xa8] sm:$0xff] %v1366_v30 }
 0x316   : > { %1391 = vst [vmem:[#allocation2 + $0xb0] sm:$0xff] %v1367_v31 }
 0x317 LB: >> { %s1399_s0 = sadd.s32 %s1919_s25, %s1496_s28  ;;  %s1410_s27 = sshra.s32 %s1919_s25, 3  ;;  %s1919_s25 = sphi %s1917_s25, %s1398_s25  }
 0x318   : >> { %s1400_s29 = sld [smem:[#allocation5 + %s1399_s0]]  ;;  %s1413_s12 = sand.u32 7, %s1919_s25 }
 0x319   : >> { %s1575_s14 = smul.u32 24, %s1410_s27  ;;  %s1398_s25 = sadd.s32 1, %s1919_s25  }
 0x31a   : >> { %p1395_p2 = scmp.ge.s32.totalorder %s1398_s25, 64  }
 0x31b   : >> { %s1416_s15 = sadd.s32 %s1575_s14, %s1413_s12 }
 0x31c   : >> { %s1417_s20 = scalar_lea.vmem [#allocation2], %s1416_s15 }
 0x31d   : >> { %v1418_v43 = vld [vmem:[%s1417_s20] ss:$8 sm:$0x7] }
 0x31e   : >> { %s1401_s30 = sshra.s32 %s1400_s29, 3  ;;  %s1404_s17 = sand.u32 7, %s1400_s29 }
 0x31f   : >> { %s1574_s18 = smul.u32 24, %s1401_s30 }
 0x321   : >> { %s1407_s19 = sadd.s32 %s1574_s18, %s1404_s17 }
 0x322   : >> { %s1408_s22 = scalar_lea.vmem %s2375_s11, %s1407_s19  ;;  %1397 = sbr.rel (!%p1395_p2) target bundleno = 791 (0x317), region = 118 }
 0x323   : >> { %v1409_v4 = vld [vmem:[%s1408_s22] ss:$8 sm:$0x7] }
 0x324   : >> { %v1419_v19 = vadd.f32 %v1418_v43, %v1409_v4 }
 0x326   : >> { %1424 = vst.msk [vmem:[%s1408_s22] ss:$8 sm:$0x7] %vm2036_vm1, %v1419_v19 }
 0x327 PF: > { %s31_s1 = sadd.s32 1, %s1911_s1  }
 0x328   : > { %p28_p3 = scmp.ge.s32.totalorder %s31_s1, 6  }
 0x32a   :  { %30 = sbr.rel (!%p28_p3) target bundleno = 26 (0x1a), region = 129 }

// kernel: interaction_forward.5
= control target key start
LH: loop header
LB: loop body
LE: loop exit
PB: predicated region body
PF: predicated region fallthrough
CT: control target
= control target key end

     0   :  { %s1530_s18 = smov 0   ;;  %s2240_s0 = inlined_call_operand.vmem [shape: f32[16,288], index: 0, kind: input, shape index: {}]   ;;  %s2241_s1 = inlined_call_operand.vmem [shape: f32[16,32], index: 1, kind: input, shape index: {}]   ;;  %s2242_s2 = inlined_call_operand.vmem [shape: f32[16,320], index: 2, kind: input, shape index: {}]   ;;  %s2243_s3 = inlined_call_operand.vmem [shape: f32[16,320], index: 3, kind: input, shape index: {}]   ;;  %s2244_s4 = inlined_call_operand.vmem [shape: f32[288,288], index: 4, kind: input, shape index: {}]   ;;  %s2245_s5 = inlined_call_operand.vmem [shape: f32[16,288], index: 5, kind: output, shape index: {}]  }
   0x1 LB: > { %s1396_s19 = sadd.s32 4294967295, %s1493_s18   ;;  %p1400_p0 = scmp.ge.s32.totalorder %s1493_s18, 1  ;;  %s1493_s18 = sphi %s1530_s18, %s15_s18  }
   0x2   : > { %p216_p1 = scmp.lt.s32.totalorder %s1493_s18, 3 }
   0x4   : > { %p217_p2 = pnand %p1400_p0, %p216_p1 }
   0x5   : > { %p258_p3 = scmp.lt.s32.totalorder (!%p217_p2), %s1396_s19, 1  ;;  %s1495_s27 = smov (!%p217_p2), 96  }
   0x6   : > { %220 = sbr.rel (%p217_p2) target bundleno = 1355 (0x54b), region = 40  ;;  %s1496_s28 = smov (!%p217_p2), 32  }
   0x7   : > { %s1497_s29 = smov (!%p217_p2), 64  }
   0xb   : > { %s2247_s19 = smov (!%p258_p3, %s1396_s19), 1  ;;  %vm701_vm0 = vcmask 261120   ;;  %vm703_vm1 = vcmask 523264   ;;  %vm705_vm2 = vcmask 785408   ;;  %vm1499_vm3 = vmmov 0  }
   0xc   : > { %s1541_s20 = smul.u32 24, %s2247_s19  ;;  %s1402_s12 = sshll.u32 %s2247_s19, 3  ;;  %vm1240_vm4 = vcmask 523520   ;;  %vm1253_vm5 = vcmask 785920   ;;  %vm1262_vm6 = vcmask 1048320  }
   0xd   : > { %s266_s15 = scalar_lea.vmem %s2241_s1, %s1402_s12 }
   0xe   : > { %s271_s23 = scalar_lea.vmem %s2242_s2, %s1541_s20  ;;  %s276_s26 = scalar_lea.vmem %s2243_s3, %s1541_s20 }
   0xf   : > { %v284_v0 = vld [vmem:[%s271_s23 + $0x10] sm:$0xff]  ;;  %v282_v1 = vld [vmem:[%s271_s23] sm:$0xff]  ;;  %v283_v2 = vld [vmem:[%s271_s23 + $0x8] sm:$0xff]  ;;  %s2193_s17 = scalar_lea.vmem %s2240_s0, %s1541_s20  ;;  %s2208_s22 = scalar_lea.vmem %s2245_s5, %s1541_s20 }
  0x10   : > { %294 = vrot.lane.b32.xlu0 %v284_v0, %s1495_s27  ;;  %289 = vrot.lane.b32.xlu1 %v283_v2, %s1496_s28  ;;  %v286_v3 = vsub.f32 0.0, %v282_v1  ;;  %v299_v4 = vld [vmem:[%s276_s26] sm:$0xff]  ;;  %v301_v5 = vld [vmem:[%s276_s26 + $0x10] sm:$0xff]  ;;  %v1563_v10 = vadd.f32 %v283_v2, %v282_v1 }
  0x11   : > { %v300_v6 = vld [vmem:[%s276_s26 + $0x8] sm:$0xff]  ;;  %v303_v7 = vsub.f32 0.0, %v299_v4 }
  0x12   : > { %v1553_v8 = vadd.f32 %v286_v3, %v283_v2  ;;  %v1573_v11 = vadd.f32 %v300_v6, %v299_v4 }
  0x13   : > { %v1556_v9 = vadd.f32 %v303_v7, %v300_v6 }
  0x14   : > { %311 = vrot.lane.b32.xlu0 %v301_v5, %s1495_s27  ;;  %306 = vrot.lane.b32.xlu1 %v300_v6, %s1496_s28  ;;  %v1656_v61 = vmul.f32 %v1573_v11, %v1553_v8 }
  0x18   : > { %528 = vrot.lane.b32.xlu1 %v1556_v9, %s1495_s27  ;;  %375 = vrot.lane.b32.xlu0 %v1553_v8, %s1495_s27 }
  0x1c   : > { %537 = vrot.lane.b32.xlu1 %v1556_v9, %s1496_s28  ;;  %384 = vrot.lane.b32.xlu0 %v1553_v8, %s1496_s28 }
  0x20   : > { %426 = vrot.lane.b32.xlu1 %v1553_v8, %s1497_s29  ;;  %370 = vrot.lane.b32.xlu0 %v1563_v10, %s1496_s28 }
  0x24   : > { %571 = vrot.lane.b32.xlu1 %v1556_v9, %s1497_s29  ;;  %328 = vrot.lane.b32.xlu0 %v1563_v10, %s1495_s27 }
  0x28   : > { %523 = vrot.lane.b32.xlu1 %v1573_v11, %s1496_s28 }
  0x82   : > { %v295_v12 = vpop.permute.xlu0 %294  ;;  %v290_v13 = vpop.permute.xlu1 %289 }
  0x83   : > { %v1581_v14 = vadd.f32 %v295_v12, %v282_v1  ;;  %v292_v19 = vadd.f32 %v290_v13, %v282_v1  ;;  %v298_v21 = vadd.f32 %v295_v12, %v286_v3  ;;  %v393_v1 = vmul.f32 %v1556_v9, %v1563_v10 }
  0x85   : > { %407 = vrot.lane.b32.xlu0 %v1581_v14, %s1496_s28 }
  0x86   : > { %v312_v15 = vpop.permute.xlu0 %311  ;;  %v307_v17 = vpop.permute.xlu1 %306 }
  0x87   : > { %v1585_v16 = vadd.f32 %v312_v15, %v299_v4  ;;  %v309_v18 = vadd.f32 %v307_v17, %v299_v4  ;;  %v315_v20 = vadd.f32 %v312_v15, %v303_v7 }
  0x89   : > { %552 = vrot.lane.b32.xlu1 %v1585_v16, %s1496_s28  ;;  %416 = vrot.lane.b32.xlu0 %v1581_v14, %s1495_s27  ;;  %v459_v24 = vmul.f32 %v315_v20, %v1581_v14  ;;  %v394_v25 = vmul.f32 %v309_v18, %v292_v19  ;;  %v400_v28 = vmul.f32 %v1585_v16, %v298_v21 }
  0x8a   : > { %v529_v22 = vpop.permute.xlu1 %528  ;;  %v376_v23 = vpop.permute.xlu0 %375  ;;  %v465_v0 = vmul.f32 %v1585_v16, %v1581_v14 }
  0x8b   : > { %v531_v27 = vmul.f32 %v529_v22, %v292_v19  ;;  %v378_v32 = vmul.f32 %v376_v23, %v309_v18 }
  0x8d   : > { %586 = vrot.lane.b32.xlu1 %v309_v18, %s1495_s27  ;;  %561 = vrot.lane.b32.xlu0 %v1585_v16, %s1495_s27 }
  0x8e   : > { %v538_v26 = vpop.permute.xlu1 %537  ;;  %v385_v29 = vpop.permute.xlu0 %384 }
  0x8f   : > { %v387_v31 = vmul.f32 %v385_v29, %v1585_v16  ;;  %v540_v35 = vmul.f32 %v538_v26, %v1581_v14 }
  0x91   : > { %595 = vrot.lane.b32.xlu1 %v315_v20, %s1496_s28  ;;  %441 = vrot.lane.b32.xlu0 %v292_v19, %s1495_s27 }
  0x92   : > { %v427_v30 = vpop.permute.xlu1 %426  ;;  %v1629_v39 = vpop.permute.xlu0 %370 }
  0x93   : > { %v435_v33 = vmul.f32 %v427_v30, %v1585_v16  ;;  %v429_v37 = vmul.f32 %v427_v30, %v315_v20 }
  0x95   : > { %481 = vrot.lane.b32.xlu1 %v1573_v11, %s1495_s27  ;;  %450 = vrot.lane.b32.xlu0 %v298_v21, %s1496_s28 }
  0x96   : > { %v572_v34 = vpop.permute.xlu1 %571  ;;  %v1631_v40 = vpop.permute.xlu0 %328 }
  0x97   : > { %v580_v36 = vmul.f32 %v572_v34, %v1581_v14  ;;  %v574_v38 = vmul.f32 %v572_v34, %v298_v21 }
  0x99   : > { %352 = vrot.lane.b32.xlu1 %v1563_v10, %s1497_s29  ;;  %505 = vrot.lane.b32.xlu0 %v1573_v11, %s1497_s29 }
  0x9a   : > { %v1633_v41 = vpop.permute.xlu1 %523 }
  0x9d   : > { %486 = vrot.lane.b32.xlu1 %v309_v18, %s1496_s28  ;;  %333 = vrot.lane.b32.xlu0 %v292_v19, %s1496_s28 }
  0xa1   : > { %357 = vrot.lane.b32.xlu1 %v1581_v14, %s1497_s29  ;;  %343 = vrot.lane.b32.xlu0 %v298_v21, %s1495_s27 }
  0xa5   : > { %510 = vrot.lane.b32.xlu1 %v1585_v16, %s1497_s29  ;;  %496 = vrot.lane.b32.xlu0 %v315_v20, %s1495_s27 }
  0xa9   : > { %547 = vrot.lane.b32.xlu1 %v459_v24, %s1497_s29  ;;  %396 = vrot.lane.b32.xlu0 %v394_v25, %s1496_s28  ;;  %v373_v25 = vmul.f32 %v1629_v39, %v1556_v9 }
  0xad   : > { %533 = vrot.lane.b32.xlu1 %v531_v27, %s1496_s28  ;;  %402 = vrot.lane.b32.xlu0 %v400_v28, %s1497_s29 }
  0xb1   : > { %389 = vrot.lane.b32.xlu1 %v387_v31, %s1497_s29  ;;  %461 = vrot.lane.b32.xlu0 %v459_v24, %s1495_s27 }
  0xb5   : > { %437 = vrot.lane.b32.xlu1 %v435_v33, %s1497_s29  ;;  %380 = vrot.lane.b32.xlu0 %v378_v32, %s1496_s28 }
  0xb9   : > { %582 = vrot.lane.b32.xlu1 %v580_v36, %s1497_s29  ;;  %542 = vrot.lane.b32.xlu0 %v540_v35, %s1497_s29 }
  0xbd   : > { %431 = vrot.lane.b32.xlu0 %v429_v37, %s1495_s27 }
  0xc1   : > { %576 = vrot.lane.b32.xlu0 %v574_v38, %s1495_s27 }
  0xf7   : > { %v408_v42 = vpop.permute.xlu0 %407 }
  0xf8   : > { %v410_v43 = vmul.f32 %v408_v42, %v309_v18 }
  0xfa   : > { %412 = vrot.lane.b32.xlu1 %v410_v43, %s1496_s28 }
  0xfb   : > { %v553_v44 = vpop.permute.xlu1 %552  ;;  %v417_v45 = vpop.permute.xlu0 %416 }
  0xfc   : > { %v555_v46 = vmul.f32 %v553_v44, %v292_v19  ;;  %v419_v47 = vmul.f32 %v417_v45, %v1585_v16 }
  0xfe   : > { %557 = vrot.lane.b32.xlu0 %v555_v46, %s1496_s28  ;;  %421 = vrot.lane.b32.xlu1 %v419_v47, %s1497_s29 }
  0xff   : > { %v587_v48 = vpop.permute.xlu1 %586  ;;  %v562_v49 = vpop.permute.xlu0 %561 }
 0x100   : > { %v564_v50 = vmul.f32 %v562_v49, %v1581_v14  ;;  %v589_v56 = vmul.f32 %v587_v48, %v298_v21 }
 0x102   : > { %566 = vrot.lane.b32.xlu1 %v564_v50, %s1497_s29 }
 0x103   : > { %v596_v51 = vpop.permute.xlu1 %595  ;;  %v442_v52 = vpop.permute.xlu0 %441 }
 0x104   : > { %v444_v53 = vmul.f32 %v442_v52, %v315_v20  ;;  %v598_v60 = vmul.f32 %v596_v51, %v1581_v14 }
 0x106   : > { %446 = vrot.lane.b32.xlu0 %v444_v53, %s1495_s27 }
 0x107   : > { %v1642_v54 = vpop.permute.xlu1 %481  ;;  %v451_v55 = vpop.permute.xlu0 %450 }
 0x108   : > { %v453_v57 = vmul.f32 %v451_v55, %v1585_v16 }
 0x10a   : > { %591 = vrot.lane.b32.xlu0 %v589_v56, %s1495_s27  ;;  %455 = vrot.lane.b32.xlu1 %v453_v57, %s1497_s29  ;;  %v406_v56 = vmul.f32 %v1631_v40, %v1556_v9  ;;  %v551_v57 = vmul.f32 %v1642_v54, %v1553_v8 }
 0x10b   : > { %v1647_v58 = vpop.permute.xlu1 %352  ;;  %v1649_v59 = vpop.permute.xlu0 %505 }
 0x10c   : > { %v425_v37 = vmul.f32 %v1647_v58, %v1556_v9  ;;  %v570_v42 = vmul.f32 %v1649_v59, %v1553_v8 }
 0x10e   : > { %604 = vrot.lane.b32.xlu0 %v400_v28, %s1495_s27  ;;  %600 = vrot.lane.b32.xlu1 %v598_v60, %s1497_s29  ;;  %v526_v28 = vmul.f32 %v1633_v41, %v1553_v8 }
 0x10f   : > { %v487_v62 = vpop.permute.xlu1 %486  ;;  %v334_v63 = vpop.permute.xlu0 %333 }
 0x110   : > { %v336_v6 = vmul.f32 %v334_v63, %v1573_v11  ;;  %v489_v12 = vmul.f32 %v487_v62, %v1563_v10 }
 0x112   : > { %319 = vrot.lane.b32.xlu0 %v1656_v61, %s1495_s27  ;;  %467 = vrot.lane.b32.xlu1 %v465_v0, %s1497_s29 }
 0x113   : > { %v358_v2 = vpop.permute.xlu1 %357  ;;  %v344_v3 = vpop.permute.xlu0 %343 }
 0x114   : > { %v360_v13 = vmul.f32 %v358_v2, %v1573_v11  ;;  %v346_v16 = vmul.f32 %v344_v3, %v1573_v11 }
 0x116   : > { %476 = vrot.lane.b32.xlu1 %v393_v1, %s1497_s29  ;;  %472 = vrot.lane.b32.xlu0 %v393_v1, %s1495_s27 }
 0x117   : > { %v511_v4 = vpop.permute.xlu1 %510  ;;  %v497_v5 = vpop.permute.xlu0 %496 }
 0x118   : > { %v499_v17 = vmul.f32 %v497_v5, %v1563_v10  ;;  %v513_v22 = vmul.f32 %v511_v4, %v1563_v10 }
 0x11a   : > { %338 = vrot.lane.b32.xlu1 %v336_v6, %s1495_s27  ;;  %323 = vrot.lane.b32.xlu0 %v1656_v61, %s1497_s29 }
 0x11b   : > { %v397_v7 = vpop.permute.xlu0 %396  ;;  %v548_v14 = vpop.permute.xlu1 %547 }
 0x11c   : > { %v399_v18 = vadd.f32 %v397_v7, %v393_v1  ;;  %v546_v19 = vadd.f32 %v397_v7, %v1656_v61 }
 0x11e   : > { %491 = vrot.lane.b32.xlu1 %v489_v12, %s1495_s27  ;;  %362 = vrot.lane.b32.xlu0 %v360_v13, %s1495_s27  ;;  %v550_v26 = vadd.f32 %v548_v14, %v546_v19 }
 0x11f   : > { %v403_v15 = vpop.permute.xlu0 %402  ;;  %v534_v20 = vpop.permute.xlu1 %533 }
 0x120   : > { %v405_v23 = vadd.f32 %v403_v15, %v399_v18  ;;  %v536_v32 = vadd.f32 %v534_v20, %v526_v28 }
 0x122   : > { %348 = vrot.lane.b32.xlu1 %v346_v16, %s1497_s29  ;;  %501 = vrot.lane.b32.xlu0 %v499_v17, %s1497_s29  ;;  %v1687_v29 = vadd.f32 %v550_v26, %v405_v23 }
 0x123   : > { %v462_v21 = vpop.permute.xlu0 %461  ;;  %v390_v31 = vpop.permute.xlu1 %389 }
 0x124   : > { %v464_v24 = vadd.f32 %v462_v21, %v393_v1  ;;  %v629_v36 = vmul.f32 %v1687_v29, %v1687_v29 }
 0x126   : > { %515 = vrot.lane.b32.xlu1 %v513_v22, %s1495_s27  ;;  %366 = vrot.lane.b32.xlu0 %v360_v13, %s1497_s29 }
 0x127   : > { %v381_v27 = vpop.permute.xlu0 %380  ;;  %v438_v39 = vpop.permute.xlu1 %437 }
 0x128   : > { %v383_v30 = vadd.f32 %v381_v27, %v373_v25 }
 0x12a   : > { %519 = vrot.lane.b32.xlu1 %v513_v22, %s1497_s29  ;;  %v392_v34 = vadd.f32 %v390_v31, %v383_v30 }
 0x12b   : > { %v543_v33 = vpop.permute.xlu0 %542  ;;  %v583_v47 = vpop.permute.xlu1 %582 }
 0x12c   : > { %v545_v35 = vadd.f32 %v543_v33, %v536_v32  ;;  %v355_v33 = vmul.f32 %v1647_v58, %v1573_v11  ;;  %v484_v58 = vmul.f32 %v1642_v54, %v1563_v10 }
 0x12e   : > { %v1694_v38 = vadd.f32 %v545_v35, %v392_v34  ;;  %631 = vrot.lane.b32.xlu1 %v629_v36, %s1495_s27  ;;  %v508_v34 = vmul.f32 %v1649_v59, %v1563_v10 }
 0x12f   : > { %v432_v41 = vpop.permute.xlu0 %431 }
 0x130   : > { %v623_v43 = vmul.f32 %v1694_v38, %v1694_v38  ;;  %v434_v44 = vadd.f32 %v432_v41, %v425_v37 }
 0x132   : > { %625 = vrot.lane.b32.xlu0 %v623_v43, %s1495_s27  ;;  %v440_v48 = vadd.f32 %v438_v39, %v434_v44  ;;  %v316_v44 = vmul.f32 %v1573_v11, %v1563_v10 }
 0x133   : > { %v577_v45 = vpop.permute.xlu0 %576 }
 0x134   : > { %v579_v46 = vadd.f32 %v577_v45, %v570_v42  ;;  %v331_v45 = vmul.f32 %v1631_v40, %v1573_v11 }
 0x136   : > { %v585_v49 = vadd.f32 %v583_v47, %v579_v46 }
 0x138   : > { %v1702_v50 = vadd.f32 %v585_v49, %v440_v48 }
 0x13a   : > { %v641_v51 = vmul.f32 %v1702_v50, %v1702_v50 }
 0x13c   : > { %643 = vrot.lane.b32.xlu1 %v641_v51, %s1497_s29 }
 0x16c   : > { %v413_v52 = vpop.permute.xlu1 %412 }
 0x16d   : > { %v415_v60 = vadd.f32 %v413_v52, %v406_v56 }
 0x170   : > { %v422_v53 = vpop.permute.xlu1 %421  ;;  %v558_v55 = vpop.permute.xlu0 %557 }
 0x171   : > { %v560_v62 = vadd.f32 %v558_v55, %v551_v57  ;;  %v424_v0 = vadd.f32 %v422_v53, %v415_v60 }
 0x174   : > { %v567_v63 = vpop.permute.xlu1 %566 }
 0x175   : > { %v569_v1 = vadd.f32 %v567_v63, %v560_v62 }
 0x177   : > { %v1711_v2 = vadd.f32 %v569_v1, %v424_v0 }
 0x178   : > { %v447_v3 = vpop.permute.xlu0 %446 }
 0x179   : > { %v635_v4 = vmul.f32 %v1711_v2, %v1711_v2  ;;  %v449_v7 = vadd.f32 %v447_v3, %v373_v25 }
 0x17b   : > { %637 = vrot.lane.b32.xlu0 %v635_v4, %s1495_s27 }
 0x17c   : > { %v456_v5 = vpop.permute.xlu1 %455  ;;  %v592_v6 = vpop.permute.xlu0 %591 }
 0x17d   : > { %v594_v9 = vadd.f32 %v592_v6, %v526_v28  ;;  %v458_v8 = vadd.f32 %v456_v5, %v449_v7 }
 0x180   : > { %v601_v12 = vpop.permute.xlu1 %600  ;;  %v605_v13 = vpop.permute.xlu0 %604 }
 0x181   : > { %v603_v14 = vadd.f32 %v601_v12, %v594_v9  ;;  %v607_v16 = vadd.f32 %v605_v13, %v1656_v61 }
 0x183   : > { %v1716_v15 = vadd.f32 %v603_v14, %v458_v8  ;;  %v756_v8 = vld [vmem:[%s2244_s4 + $0x170] sm:$0xff]  ;;  %v755_v14 = vld [vmem:[%s2244_s4 + $0x168] sm:$0xff] }
 0x184   : > { %v468_v17 = vpop.permute.xlu1 %467  ;;  %v320_v18 = vpop.permute.xlu0 %319  ;;  %820 = vmatprep.subr.mxu0 %v756_v8  ;;  %v786_v8 = vld [vmem:[%s2244_s4 + $0x260] sm:$0xff] }
 0x185   : > { %v470_v19 = vadd.f32 %v468_v17, %v464_v24  ;;  %v608_v20 = vadd.f32 %v607_v16, %v468_v17  ;;  %v647_v21 = vmul.f32 %v1716_v15, %v1716_v15  ;;  %v322_v46 = vadd.f32 %v320_v18, %v316_v44  ;;  %v753_v16 = vld [vmem:[%s2244_s4 + $0x158] sm:$0xff]  ;;  %v752_v17 = vld [vmem:[%s2244_s4 + $0x150] sm:$0xff]  ;;  %821 = vmatpush1.msra.mxu0 %v755_v14 }
 0x186   : > { %v1498_v18 = vmov 0.0   ;;  %822 = vmatprep.subr.mxu0 %v753_v16  ;;  %v785_v14 = vld [vmem:[%s2244_s4 + $0x258] sm:$0xff]  ;;  %v783_v16 = vld [vmem:[%s2244_s4 + $0x248] sm:$0xff] }
 0x187   : > { %v1721_v22 = vadd.f32 %v608_v20, %v470_v19  ;;  %649 = vrot.lane.b32.xlu0 %v647_v21, %s1497_s29  ;;  %955 = vmatprep.mubr.f32.mxu1 %v1498_v18  ;;  %v750_v19 = vld [vmem:[%s2244_s4 + $0x140] sm:$0xff]  ;;  %v749_v20 = vld [vmem:[%s2244_s4 + $0x138] sm:$0xff] }
 0x188   : > { %v477_v23 = vpop.permute.xlu1 %476  ;;  %v473_v25 = vpop.permute.xlu0 %472  ;;  %823 = vmatpush1.msra.mxu0 %v752_v17  ;;  %v782_v17 = vld [vmem:[%s2244_s4 + $0x240] sm:$0xff] }
 0x189   : > { %v653_v26 = vmul.f32 %v1721_v22, %v1721_v22  ;;  %v475_v47 = vadd.f32 %v473_v25, %v316_v44  ;;  %824 = vmatprep.subr.mxu0 %v750_v19  ;;  %v746_v25 = vld [vmem:[%s2244_s4 + $0x120] sm:$0xff]  ;;  %v780_v19 = vld [vmem:[%s2244_s4 + $0x230] sm:$0xff] }
 0x18a   : > { %825 = vmatpush1.msra.mxu0 %v749_v20  ;;  %v810_v44 = vld [vmem:[%s2244_s4 + $0x320] sm:$0xff]  ;;  %v779_v20 = vld [vmem:[%s2244_s4 + $0x228] sm:$0xff] }
 0x18b   : > { %655 = vrot.lane.b32.xlu1 %v653_v26, %s1497_s29  ;;  %v479_v49 = vadd.f32 %v477_v23, %v475_v47  ;;  %v747_v23 = vld [vmem:[%s2244_s4 + $0x128] sm:$0xff]  ;;  %v744_v26 = vld [vmem:[%s2244_s4 + $0x110] sm:$0xff] }
 0x18c   : > { %v339_v27 = vpop.permute.xlu1 %338  ;;  %v324_v61 = vpop.permute.xlu0 %323  ;;  %826 = vmatprep.subr.mxu0 %v747_v23  ;;  %v807_v47 = vld [vmem:[%s2244_s4 + $0x308] sm:$0xff]  ;;  %v777_v23 = vld [vmem:[%s2244_s4 + $0x218] sm:$0xff] }
 0x18d   : > { %v341_v59 = vadd.f32 %v339_v27, %v331_v45  ;;  %v326_v51 = vadd.f32 %v324_v61, %v322_v46  ;;  %v743_v27 = vld [vmem:[%s2244_s4 + $0x108] sm:$0xff]  ;;  %827 = vmatpush1.msra.mxu0 %v746_v25  ;;  %v741_v61 = vld [vmem:[%s2244_s4 + $0xf8] sm:$0xff]  ;;  %v726_v45 = vld [vmem:[%s2244_s4 + $0x80] sm:$0xff] }
 0x18e   : > { %828 = vmatprep.subr.mxu0 %v744_v26  ;;  %v725_v46 = vld [vmem:[%s2244_s4 + $0x78] sm:$0xff]  ;;  %v776_v25 = vld [vmem:[%s2244_s4 + $0x210] sm:$0xff]  ;;  %v774_v26 = vld [vmem:[%s2244_s4 + $0x200] sm:$0xff] }
 0x18f   : > { %v1739_v55 = vadd.f32 %v479_v49, %v326_v51  ;;  %829 = vmatpush1.msra.mxu0 %v743_v27  ;;  %v722_v49 = vld [vmem:[%s2244_s4 + $0x60] sm:$0xff]  ;;  %v805_v51 = vld [vmem:[%s2244_s4 + $0x2f8] sm:$0xff] }
 0x190   : > { %v492_v28 = vpop.permute.xlu1 %491  ;;  %v363_v30 = vpop.permute.xlu0 %362  ;;  %830 = vmatprep.subr.mxu0 %v741_v61  ;;  %v773_v27 = vld [vmem:[%s2244_s4 + $0x1f8] sm:$0xff]  ;;  %v771_v61 = vld [vmem:[%s2244_s4 + $0x1e8] sm:$0xff] }
 0x191   : > { %v365_v36 = vadd.f32 %v363_v30, %v355_v33  ;;  %v494_v48 = vadd.f32 %v492_v28, %v484_v58  ;;  %v618_v57 = vmul.f32 %v1739_v55, %v1739_v55  ;;  %v740_v28 = vld [vmem:[%s2244_s4 + $0xf0] sm:$0xff]  ;;  %v738_v30 = vld [vmem:[%s2244_s4 + $0xe0] sm:$0xff]  ;;  %v809_v58 = vld [vmem:[%s2244_s4 + $0x318] sm:$0xff] }
 0x192   : > { %831 = vmatpush1.msra.mxu0 %v740_v28  ;;  %v732_v33 = vld [vmem:[%s2244_s4 + $0xb0] sm:$0xff]  ;;  %v770_v28 = vld [vmem:[%s2244_s4 + $0x1e0] sm:$0xff] }
 0x193   : > { %832 = vmatprep.subr.mxu0 %v738_v30  ;;  %v768_v30 = vld [vmem:[%s2244_s4 + $0x1d0] sm:$0xff] }
 0x194   : > { %v349_v24 = vpop.permute.xlu1 %348  ;;  %v502_v31 = vpop.permute.xlu0 %501 }
 0x195   : > { %v351_v52 = vadd.f32 %v349_v24, %v341_v59  ;;  %v504_v53 = vadd.f32 %v502_v31, %v494_v48  ;;  %v737_v24 = vld [vmem:[%s2244_s4 + $0xd8] sm:$0xff]  ;;  %v735_v31 = vld [vmem:[%s2244_s4 + $0xc8] sm:$0xff]  ;;  %v806_v48 = vld [vmem:[%s2244_s4 + $0x300] sm:$0xff] }
 0x196   : > { %833 = vmatpush1.msra.mxu0 %v737_v24  ;;  %v723_v59 = vld [vmem:[%s2244_s4 + $0x68] sm:$0xff] }
 0x197   : > { %v1741_v56 = vadd.f32 %v504_v53, %v351_v52  ;;  %834 = vmatprep.subr.mxu0 %v735_v31  ;;  %v720_v52 = vld [vmem:[%s2244_s4 + $0x50] sm:$0xff]  ;;  %v719_v53 = vld [vmem:[%s2244_s4 + $0x48] sm:$0xff]  ;;  %v765_v31 = vld [vmem:[%s2244_s4 + $0x1b8] sm:$0xff] }
 0x198   : > { %v516_v32 = vpop.permute.xlu1 %515  ;;  %v367_v35 = vpop.permute.xlu0 %366  ;;  %v767_v24 = vld [vmem:[%s2244_s4 + $0x1c8] sm:$0xff] }
 0x199   : > { %v518_v37 = vadd.f32 %v516_v32, %v508_v34  ;;  %v369_v41 = vadd.f32 %v367_v35, %v365_v36  ;;  %v619_v11 = vmul.f32 %v1741_v56, %v1741_v56  ;;  %v734_v32 = vld [vmem:[%s2244_s4 + $0xc0] sm:$0xff]  ;;  %v731_v34 = vld [vmem:[%s2244_s4 + $0xa8] sm:$0xff]  ;;  %v816_v35 = vld [vmem:[%s2244_s4 + $0x350] sm:$0xff] }
 0x19a   : > { %v815_v36 = vld [vmem:[%s2244_s4 + $0x348] sm:$0xff]  ;;  %835 = vmatpush1.msra.mxu0 %v734_v32  ;;  %915 = vmatprep.subr.mxu1 %v816_v35  ;;  %v764_v32 = vld [vmem:[%s2244_s4 + $0x1b0] sm:$0xff] }
 0x19b   : > { %v620_v40 = vadd.f32 %v619_v11, %v618_v57  ;;  %836 = vmatprep.subr.mxu0 %v732_v33  ;;  %916 = vmatpush1.msra.mxu1 %v815_v36  ;;  %v717_v57 = vld [vmem:[%s2244_s4 + $0x38] sm:$0xff]  ;;  %v716_v11 = vld [vmem:[%s2244_s4 + $0x30] sm:$0xff]  ;;  %v762_v33 = vld [vmem:[%s2244_s4 + $0x1a0] sm:$0xff] }
 0x19c   : > { %v520_v39 = vpop.permute.xlu1 %519  ;;  %837 = vmatpush1.msra.mxu0 %v731_v34  ;;  %v761_v34 = vld [vmem:[%s2244_s4 + $0x198] sm:$0xff]  ;;  %v759_v35 = vld [vmem:[%s2244_s4 + $0x188] sm:$0xff]  ;;  %v758_v36 = vld [vmem:[%s2244_s4 + $0x180] sm:$0xff] }
 0x19d   : > { %v522_v42 = vadd.f32 %v520_v39, %v518_v37  ;;  %v729_v37 = vld [vmem:[%s2244_s4 + $0x98] sm:$0xff] }
 0x19e   : > { %v813_v39 = vld [vmem:[%s2244_s4 + $0x338] sm:$0xff]  ;;  %838 = vmatprep.subr.mxu0 %v729_v37 }
 0x19f   : > { %v1731_v43 = vadd.f32 %v522_v42, %v369_v41  ;;  %v728_v41 = vld [vmem:[%s2244_s4 + $0x90] sm:$0xff]  ;;  %917 = vmatprep.subr.mxu1 %v813_v39 }
 0x1a0   : > { %v632_v63 = vpop.permute.xlu1 %631  ;;  %v812_v42 = vld [vmem:[%s2244_s4 + $0x330] sm:$0xff]  ;;  %839 = vmatpush1.msra.mxu0 %v728_v41 }
 0x1a1   : > { %v621_v10 = vmul.f32 %v1731_v43, %v1731_v43  ;;  %918 = vmatpush1.msra.mxu1 %v812_v42  ;;  %840 = vmatprep.subr.mxu0 %v726_v45 }
 0x1a2   : > { %919 = vmatprep.subr.mxu1 %v810_v44  ;;  %841 = vmatpush1.msra.mxu0 %v725_v46 }
 0x1a3   : > { %v622_v54 = vadd.f32 %v621_v10, %v620_v40  ;;  %920 = vmatpush1.msra.mxu1 %v809_v58  ;;  %842 = vmatprep.subr.mxu0 %v723_v59  ;;  %v714_v10 = vld [vmem:[%s2244_s4 + $0x20] sm:$0xff]  ;;  %v713_v40 = vld [vmem:[%s2244_s4 + $0x18] sm:$0xff] }
 0x1a4   : > { %v626_v60 = vpop.permute.xlu0 %625  ;;  %921 = vmatprep.subr.mxu1 %v807_v47  ;;  %843 = vmatpush1.msra.mxu0 %v722_v49 }
 0x1a5   : > { %v628_v62 = vadd.f32 %v626_v60, %v622_v54  ;;  %922 = vmatpush1.msra.mxu1 %v806_v48  ;;  %844 = vmatprep.subr.mxu0 %v720_v52  ;;  %v711_v54 = vld [vmem:[%s2244_s4 + $0x8] sm:$0xff]  ;;  %v710_v60 = vld [vmem:[%s2244_s4] sm:$0xff] }
 0x1a6   : > { %1410 = vmatprep.subr.mxu1 %v805_v51  ;;  %845 = vmatpush1.msra.mxu0 %v719_v53  ;;  %v799_v48 = vld [vmem:[%s2244_s4 + $0x2c8] sm:$0xff] }
 0x1a7   : > { %v634_v1 = vadd.f32 %v632_v63, %v628_v62  ;;  %846 = vmatprep.subr.mxu0 %v717_v57  ;;  %v804_v62 = vld [vmem:[%s2244_s4 + $0x2f0] sm:$0xff]  ;;  %v803_v63 = vld [vmem:[%s2244_s4 + $0x2e8] sm:$0xff] }
 0x1a8   : > { %847 = vmatpush1.msra.mxu0 %v716_v11  ;;  %v796_v11 = vld [vmem:[%s2244_s4 + $0x2b0] sm:$0xff] }
 0x1a9   : > { %848 = vmatprep.subr.mxu0 %v714_v10 }
 0x1aa   : > { %849 = vmatpush1.msra.mxu0 %v713_v40 }
 0x1ab   : > { %850 = vmatprep.subr.mxu0 %v711_v54  ;;  %v748_v54 = vld [vmem:[%s2244_s4 + $0x130] sm:$0xff] }
 0x1ac   : > { %851 = vmatpush1.msra.mxu0 %v710_v60 }
 0x1ad   : > { %852 = vmatprep.subr.mxu0 %v804_v62  ;;  %v793_v62 = vld [vmem:[%s2244_s4 + $0x298] sm:$0xff] }
 0x1ae   : > { %v644_v4 = vpop.permute.xlu1 %643  ;;  %853 = vmatpush2.msra.mxu0 %v803_v63 }
 0x1ed   : > { %v638_v0 = vpop.permute.xlu0 %637 }
 0x1ee   : > { %v640_v3 = vadd.f32 %v638_v0, %v634_v1  ;;  %v801_v0 = vld [vmem:[%s2244_s4 + $0x2d8] sm:$0xff]  ;;  %v800_v1 = vld [vmem:[%s2244_s4 + $0x2d0] sm:$0xff] }
 0x1ef   : > { %854 = vmatprep.subr.mxu0 %v801_v0 }
 0x1f0   : > { %v646_v6 = vadd.f32 %v644_v4, %v640_v3  ;;  %v798_v3 = vld [vmem:[%s2244_s4 + $0x2c0] sm:$0xff]  ;;  %v797_v4 = vld [vmem:[%s2244_s4 + $0x2b8] sm:$0xff]  ;;  %855 = vmatpush2.msra.mxu0 %v800_v1 }
 0x1f1   : > { %856 = vmatprep.subr.mxu0 %v798_v3  ;;  %v745_v1 = vld [vmem:[%s2244_s4 + $0x118] sm:$0xff] }
 0x1f2   : > { %857 = vmatpush2.msra.mxu0 %v797_v4 }
 0x1f9   : > { %v650_v5 = vpop.permute.xlu0 %649 }
 0x1fa   : > { %v652_v7 = vadd.f32 %v650_v5, %v646_v6  ;;  %v795_v5 = vld [vmem:[%s2244_s4 + $0x2a8] sm:$0xff]  ;;  %v794_v6 = vld [vmem:[%s2244_s4 + $0x2a0] sm:$0xff] }
 0x1fb   : > { %858 = vmatprep.subr.mxu0 %v795_v5  ;;  %v742_v5 = vld [vmem:[%s2244_s4 + $0x100] sm:$0xff] }
 0x1fc   : > { %859 = vmatpush2.msra.mxu0 %v794_v6  ;;  %v787_v6 = vld [vmem:[%s2244_s4 + $0x268] sm:$0xff] }
 0x1fd   : > { %v656_v9 = vpop.permute.xlu1 %655 }
 0x1fe   : > { %v658_v12 = vadd.f32 %v656_v9, %v652_v7  ;;  %v792_v7 = vld [vmem:[%s2244_s4 + $0x290] sm:$0xff]  ;;  %v791_v9 = vld [vmem:[%s2244_s4 + $0x288] sm:$0xff] }
 0x1ff   : > { %860 = vmatprep.subr.mxu0 %v792_v7  ;;  %v739_v7 = vld [vmem:[%s2244_s4 + $0xe8] sm:$0xff] }
 0x200   : > { %v659_v13 = vadd.f32 1.0, %v658_v12  ;;  %v789_v12 = vld [vmem:[%s2244_s4 + $0x278] sm:$0xff]  ;;  %861 = vmatpush2.msra.mxu0 %v791_v9  ;;  %v784_v9 = vld [vmem:[%s2244_s4 + $0x250] sm:$0xff] }
 0x201   : > { %862 = vmatprep.subr.mxu0 %v789_v12  ;;  %v736_v12 = vld [vmem:[%s2244_s4 + $0xd0] sm:$0xff] }
 0x202   : > { %1485 = vrcp.f32 %v659_v13  ;;  %v788_v13 = vld [vmem:[%s2244_s4 + $0x270] sm:$0xff] }
 0x203   : > { %863 = vmatpush2.msra.mxu0 %v788_v13  ;;  %v781_v13 = vld [vmem:[%s2244_s4 + $0x238] sm:$0xff] }
 0x204   : > { %864 = vmatprep.subr.mxu0 %v786_v8  ;;  %v733_v8 = vld [vmem:[%s2244_s4 + $0xb8] sm:$0xff] }
 0x205   : > { %865 = vmatpush2.msra.mxu0 %v785_v14  ;;  %v778_v14 = vld [vmem:[%s2244_s4 + $0x220] sm:$0xff] }
 0x206   : > { %866 = vmatprep.subr.mxu0 %v783_v16  ;;  %v730_v16 = vld [vmem:[%s2244_s4 + $0xa0] sm:$0xff] }
 0x207   : > { %867 = vmatpush2.msra.mxu0 %v782_v17  ;;  %v775_v17 = vld [vmem:[%s2244_s4 + $0x208] sm:$0xff] }
 0x208   : > { %868 = vmatprep.subr.mxu0 %v780_v19  ;;  %v727_v19 = vld [vmem:[%s2244_s4 + $0x88] sm:$0xff] }
 0x209   : > { %869 = vmatpush2.msra.mxu0 %v779_v20  ;;  %v772_v20 = vld [vmem:[%s2244_s4 + $0x1f0] sm:$0xff] }
 0x20a   : > { %870 = vmatprep.subr.mxu0 %v777_v23  ;;  %v724_v23 = vld [vmem:[%s2244_s4 + $0x70] sm:$0xff] }
 0x20b   : > { %871 = vmatpush2.msra.mxu0 %v776_v25  ;;  %v769_v25 = vld [vmem:[%s2244_s4 + $0x1d8] sm:$0xff] }
 0x20c   : > { %872 = vmatprep.subr.mxu0 %v774_v26  ;;  %v721_v26 = vld [vmem:[%s2244_s4 + $0x58] sm:$0xff] }
 0x20d   : > { %873 = vmatpush2.msra.mxu0 %v773_v27  ;;  %v766_v27 = vld [vmem:[%s2244_s4 + $0x1c0] sm:$0xff] }
 0x20e   : > { %874 = vmatprep.subr.mxu0 %v771_v61  ;;  %v718_v61 = vld [vmem:[%s2244_s4 + $0x40] sm:$0xff] }
 0x20f   : > { %v1768_v21 = vpop.eup %1485  ;;  %875 = vmatpush2.msra.mxu0 %v770_v28  ;;  %v763_v28 = vld [vmem:[%s2244_s4 + $0x1a8] sm:$0xff] }
 0x210   : > { %666 = vrot.lane.b32.xlu1 %v1768_v21, %s1496_s28  ;;  %672 = vrot.lane.b32.xlu0 %v1768_v21, %s1497_s29  ;;  %v664_v58 = vmul.f32 %v1768_v21, %v1731_v43  ;;  %v663_v46 = vmul.f32 %v1768_v21, %v1741_v56  ;;  %v754_v56 = vld [vmem:[%s2244_s4 + $0x160] sm:$0xff]  ;;  %v662_v60 = vmul.f32 %v1768_v21, %v1739_v55 }
 0x211   : > { %876 = vmatprep.subr.mxu0 %v768_v30  ;;  %v790_v21 = vld [vmem:[%s2244_s4 + $0x280] sm:$0xff]  ;;  %v715_v30 = vld [vmem:[%s2244_s4 + $0x28] sm:$0xff] }
 0x212   : > { %877 = vmatpush2.msra.mxu0 %v767_v24  ;;  %v760_v24 = vld [vmem:[%s2244_s4 + $0x190] sm:$0xff] }
 0x213   : > { %878 = vmatprep.subr.mxu0 %v765_v31  ;;  %v712_v31 = vld [vmem:[%s2244_s4 + $0x10] sm:$0xff] }
 0x214   : > { %879 = vmatpush2.msra.mxu0 %v764_v32  ;;  %v817_v32 = vld [vmem:[%s2244_s4 + $0x358] sm:$0xff] }
 0x215   : > { %880 = vmatprep.subr.mxu0 %v762_v33  ;;  %v814_v33 = vld [vmem:[%s2244_s4 + $0x340] sm:$0xff] }
 0x216   : > { %881 = vmatpush2.msra.mxu0 %v761_v34  ;;  %v811_v34 = vld [vmem:[%s2244_s4 + $0x328] sm:$0xff] }
 0x217   : > { %882 = vmatprep.subr.mxu0 %v759_v35  ;;  %v808_v35 = vld [vmem:[%s2244_s4 + $0x310] sm:$0xff] }
 0x218   : > { %883 = vmatpush2.msra.mxu0 %v758_v36 }
 0x282   : > { %v667_v37 = vpop.permute.xlu1 %666  ;;  %v673_v39 = vpop.permute.xlu0 %672 }
 0x283   : > { %v669_v41 = vmul.f32 %v667_v37, %v1694_v38  ;;  %v670_v42 = vmul.f32 %v667_v37, %v1687_v29  ;;  %v676_v44 = vmul.f32 %v673_v39, %v1716_v15  ;;  %v677_v45 = vmul.f32 %v673_v39, %v1721_v22  ;;  %v757_v38 = vld [vmem:[%s2244_s4 + $0x178] sm:$0xff]  ;;  %v802_v22 = vld [vmem:[%s2244_s4 + $0x2e0] sm:$0xff] }
 0x284   : > { %v671_v43 = vmul.f32 %v667_v37, %v1711_v2  ;;  %v751_v2 = vld [vmem:[%s2244_s4 + $0x148] sm:$0xff]  ;;  %v675_v52 = vmul.f32 %v673_v39, %v1702_v50 }
 0x285   : > { %691 = vrot.lane.b32.xlu1 %v670_v42, %s1495_s27  ;;  %699 = vrot.lane.b32.xlu0 %v677_v45, %s1497_s29  ;;  %v1480_v47 = vpack.i.bf16 %v669_v41, %v664_v58  ;;  %v1475_v59 = vpack.i.bf16 %v676_v44, %v663_v46 }
 0x289   : > { %1481 = vrot.lane.b32.xlu1 %v1480_v47, %s1497_s29  ;;  %1476 = vrot.lane.b32.xlu0 %v1475_v59, %s1496_s28 }
 0x2f7   : > { %v692_v29 = vpop.permute.xlu1 %691  ;;  %v1990_v15 = vpop.permute.xlu0 %699 }
 0x2f8   : > { %1406 = vmatmul.mubr.msk.f32.vlgmr.msra.gmra.mxu1 %vm701_vm0, %v1990_v15  ;;  %v707_v49 = vsel %vm701_vm0, %v692_v29, %v671_v43 }
 0x2f9   : > { %1411 = vmatpush3.msra.mxu1 %v757_v38  ;;  %v708_v50 = vsel %vm703_vm1, %v707_v49, %v675_v52 }
 0x2fa   : > { %1412 = vmatprep.subr.mxu1 %v802_v22 }
 0x2fb   : > { %v1482_v51 = vpop.permute.xlu1 %1481  ;;  %1413 = vmatpush3.msra.mxu1 %v754_v56  ;;  %v1477_v57 = vpop.permute.xlu0 %1476 }
 0x2fc   : > { %v1483_v53 = vunpack.i.l.bf16 %v1482_v51  ;;  %1414 = vmatprep.subr.mxu1 %v799_v48  ;;  %v1479_v10 = vunpack.i.h.bf16 %v1477_v57  ;;  %v1478_v40 = vunpack.i.l.bf16 %v1477_v57  ;;  %v1484_v63 = vunpack.i.h.bf16 %v1482_v51 }
 0x2fd   : > { %1415 = vmatpush3.msra.mxu1 %v751_v2 }
 0x2fe   : > { %1416 = vmatprep.subr.mxu1 %v796_v11  ;;  %v709_v0 = vsel %vm705_vm2, %v708_v50, %v1479_v10  ;;  %v702_v3 = vsel %vm701_vm0, %v662_v60, %v1478_v40 }
 0x2ff   : > { %1417 = vmatpush3.msra.mxu1 %v748_v54  ;;  %884 = vmatprep.mubr.f32.mxu0 %v709_v0  ;;  %v704_v55 = vsel %vm703_vm1, %v702_v3, %v1483_v53 }
 0x300   : > { %1418 = vmatprep.subr.mxu1 %v793_v62  ;;  %1026 = vmatprep.mubr.f32.mxu1 %v709_v0  ;;  %v706_v4 = vsel %vm705_vm2, %v704_v55, %v1484_v63  ;;  %v2173_v63 = vld [vmem:[%s266_s15] sm:$0xff] }
 0x301   : > { %1419 = vmatpush3.msra.mxu1 %v745_v1  ;;  %885 = vmatmul.mubr.f32.vlgmr.msra.gmra.mxu0 %v706_v4 }
 0x302   : > { %1420 = vmatprep.subr.mxu1 %v790_v21 }
 0x303   : > { %1421 = vmatpush3.msra.mxu1 %v742_v5 }
 0x304   : > { %1422 = vmatprep.subr.mxu1 %v787_v6 }
 0x305   : > { %1423 = vmatpush3.msra.mxu1 %v739_v7 }
 0x306   : > { %1424 = vmatprep.subr.mxu1 %v784_v9 }
 0x307   : > { %1425 = vmatpush3.msra.mxu1 %v736_v12 }
 0x308   : > { %1426 = vmatprep.subr.mxu1 %v781_v13 }
 0x309   : > { %1427 = vmatpush3.msra.mxu1 %v733_v8 }
 0x30a   : > { %1428 = vmatprep.subr.mxu1 %v778_v14 }
 0x30b   : > { %1429 = vmatpush3.msra.mxu1 %v730_v16 }
 0x30c   : > { %1430 = vmatprep.subr.mxu1 %v775_v17 }
 0x30d   : > { %1431 = vmatpush3.msra.mxu1 %v727_v19 }
 0x30e   : > { %1432 = vmatprep.subr.mxu1 %v772_v20  ;;  %v1223_v20 = vld [vmem:[%s2193_s17] sm:$0xff] }
 0x30f   : > { %1433 = vmatpush3.msra.mxu1 %v724_v23 }
 0x310   : > { %1434 = vmatprep.subr.mxu1 %v769_v25 }
 0x311   : > { %1435 = vmatpush3.msra.mxu1 %v721_v26 }
 0x312   : > { %1436 = vmatprep.subr.mxu1 %v766_v27 }
 0x313   : > { %1437 = vmatpush3.msra.mxu1 %v718_v61 }
 0x314   : > { %1438 = vmatprep.subr.mxu1 %v763_v28 }
 0x315   : > { %1439 = vmatpush3.msra.mxu1 %v715_v30 }
 0x316   : > { %1440 = vmatprep.subr.mxu1 %v760_v24  ;;  %v1224_v24 = vmul.f32 %v1223_v20, %v2173_v63 }
 0x317   : > { %1441 = vmatpush3.msra.mxu1 %v712_v31 }
 0x318   : > { %1027 = vmatmul.mubr.f32.vlgmr.msra.gmra.mxu1 %v706_v4  ;;  %1450 = vmatprep.subr.mxu1 %v1498_v18 }
 0x319   : > { %1451 = vmatpush3.msra.mxu1 %v817_v32  ;;  %1458 = vmatprep.mubr.msk.f32.mxu1 %vm1499_vm3, %v1498_v18 }
 0x31a   : > { %1452 = vmatprep.subr.mxu1 %v1498_v18 }
 0x31b   : > { %1453 = vmatpush3.msra.mxu1 %v814_v33 }
 0x31c   : > { %1454 = vmatprep.subr.mxu1 %v1498_v18 }
 0x31d   : > { %1455 = vmatpush3.msra.mxu1 %v811_v34 }
 0x31e   : > { %1456 = vmatprep.subr.mxu1 %v1498_v18 }
 0x31f   : > { %1457 = vmatpush3.msra.mxu1 %v808_v35 }
 0x320   : > { %1459 = vmatmul.mubr.msk.f32.vlgmr.msra.gmra.mxu1 %vm701_vm0, %v1990_v15 }
 0x3b8   : > { %v957_v36 = vpop.f32.mrf.mxu1 }
 0x3ba   : > { %v959_v39 = vpop.f32.mrf.mxu1 }
 0x3c1   : > { %v886_v37 = vpop.f32.mrf.mxu0 }
 0x3c2   : > { %v2127_v59 = vadd.f32 %v957_v36, %v886_v37 }
 0x3c3   : > { %v888_v41 = vpop.f32.mrf.mxu0 }
 0x3c4   : > { %v2113_v42 = vadd.f32 %v959_v39, %v888_v41  ;;  %v1102_v28 = vmul.f32 %v2127_v59, %v2127_v59  ;;  %v1225_v36 = vadd.f32 %v1224_v24, %v2127_v59 }
 0x3c6   : > { %1133 = vrot.lane.b32.xlu1 %v2113_v42, %s1495_s27  ;;  %1124 = vrot.lane.b32.xlu0 %v2113_v42, %s1496_s28  ;;  %v1171_v29 = vmul.f32 %v2113_v42, %v2113_v42  ;;  %v2140_v38 = vmul.f32 %v2113_v42, %v2127_v59 }
 0x3ca   : > { %1177 = vrot.lane.b32.xlu0 %v2113_v42, %s1497_s29 }
 0x3d8   : > { %v1442_v18 = vpop.f32.mrf.mxu1 }
 0x3da   : > { %v1443_v44 = vpop.f32.mrf.mxu1 }
 0x3db   : > { %v1444_v45 = vadd.f32 %v1443_v44, %v1442_v18 }
 0x3e0   : > { %v1098_v58 = vpop.f32.mrf.mxu1 }
 0x3e1   : > { %v2121_v46 = vadd.f32 %v1444_v45, %v1098_v58  ;;  %v1273_v45 = vld [vmem:[%s2193_s17 + $0x8] sm:$0xff] }
 0x3e2   : > { %v1460_v47 = vpop.f32.mrf.mxu1 }
 0x3e3   : > { %1187 = vrot.lane.b32.xlu1 %v2121_v46, %s1496_s28  ;;  %1147 = vrot.lane.b32.xlu0 %v2121_v46, %s1497_s29  ;;  %v1216_v54 = vmul.f32 %v2121_v46, %v2121_v46 }
 0x3e7   : > { %1104 = vrot.lane.b32.xlu1 %v2127_v59, %s1497_s29  ;;  %1119 = vrot.lane.b32.xlu0 %v2127_v59, %s1495_s27 }
 0x3eb   : > { %1156 = vrot.lane.b32.xlu1 %v2127_v59, %s1496_s28  ;;  %1173 = vrot.lane.b32.xlu0 %v1171_v29, %s1496_s28 }
 0x3ef   : > { %1142 = vrot.lane.b32.xlu1 %v2140_v38, %s1495_s27 }
 0x438   : > { %v1134_v15 = vpop.permute.xlu1 %1133  ;;  %v1125_v22 = vpop.permute.xlu0 %1124 }
 0x439   : > { %v1165_v43 = vmul.f32 %v1134_v15, %v2113_v42  ;;  %v1127_v56 = vmul.f32 %v1125_v22, %v2127_v59  ;;  %v1136_v48 = vmul.f32 %v1134_v15, %v2127_v59  ;;  %v1205_v2 = vmul.f32 %v1125_v22, %v2121_v46 }
 0x43b   : > { %1183 = vrot.lane.b32.xlu0 %v1165_v43, %s1495_s27  ;;  %1129 = vrot.lane.b32.xlu1 %v1127_v56, %s1495_s27 }
 0x43c   : > { %v1178_v49 = vpop.permute.xlu0 %1177 }
 0x43d   : > { %v1180_v51 = vmul.f32 %v1178_v49, %v2113_v42  ;;  %v1198_v0 = vmul.f32 %v1178_v49, %v2121_v46 }
 0x43f   : > { %1138 = vrot.lane.b32.xlu0 %v1136_v48, %s1497_s29 }
 0x443   : > { %1212 = vrot.lane.b32.xlu0 %v1180_v51, %s1496_s28 }
 0x447   : > { %1207 = vrot.lane.b32.xlu0 %v1205_v2, %s1497_s29 }
 0x455   : > { %v1188_v52 = vpop.permute.xlu1 %1187  ;;  %v1148_v57 = vpop.permute.xlu0 %1147 }
 0x456   : > { %v1190_v53 = vmul.f32 %v1188_v52, %v2113_v42  ;;  %v1150_v10 = vmul.f32 %v1148_v57, %v2127_v59 }
 0x458   : > { %1192 = vrot.lane.b32.xlu1 %v1190_v53, %s1497_s29 }
 0x459   : > { %v2156_v11 = vpop.permute.xlu1 %1104  ;;  %v1120_v50 = vpop.permute.xlu0 %1119 }
 0x45a   : > { %v1107_v40 = vmul.f32 %v2156_v11, %v2127_v59  ;;  %v1122_v6 = vmul.f32 %v1120_v50, %v2127_v59  ;;  %v1196_v44 = vmul.f32 %v2156_v11, %v2113_v42 }
 0x45c   : > { %1109 = vrot.lane.b32.xlu0 %v1107_v40, %s1495_s27  ;;  %1152 = vrot.lane.b32.xlu1 %v1150_v10, %s1497_s29 }
 0x45d   : > { %v1157_v60 = vpop.permute.xlu1 %1156  ;;  %v1174_v1 = vpop.permute.xlu0 %1173 }
 0x45e   : > { %v1159_v62 = vmul.f32 %v1157_v60, %v2113_v42  ;;  %v1176_v3 = vadd.f32 %v1174_v1, %v1107_v40  ;;  %v1182_v8 = vmul.f32 %v1157_v60, %v2127_v59 }
 0x460   : > { %1115 = vrot.lane.b32.xlu0 %v2140_v38, %s1497_s29  ;;  %1218 = vrot.lane.b32.xlu1 %v1216_v54, %s1497_s29  ;;  %v1181_v55 = vadd.f32 %v1180_v51, %v1176_v3 }
 0x461   : > { %v1143_v21 = vpop.permute.xlu1 %1142 }
 0x462   : > { %v1145_v23 = vadd.f32 %v1143_v21, %v1107_v40  ;;  %v1197_v29 = vadd.f32 %v1196_v44, %v1143_v21 }
 0x464   : > { %1161 = vrot.lane.b32.xlu0 %v1159_v62, %s1495_s27  ;;  %1230 = vrot.lane.b32.xlu1 %v2173_v63, %s1496_s28 }
 0x468   : > { %1200 = vrot.lane.b32.xlu0 %v1198_v0, %s1497_s29  ;;  %1243 = vrot.lane.b32.xlu1 %v2173_v63, %s1497_s29 }
 0x46c   : > { %1167 = vrot.lane.b32.xlu0 %v1165_v43, %s1497_s29  ;;  %1256 = vrot.lane.b32.xlu1 %v2173_v63, %s1495_s27  ;;  %v1265_v43 = vmul.f32 %v1273_v45, %v2173_v63 }
 0x46e   : > { %v1266_v57 = vadd.f32 %v1265_v43, %v2113_v42 }
 0x470   : > { %1268 = vrot.lane.b32.xlu1 %v1181_v55, %s1495_s27 }
 0x4ad   : > { %v1184_v4 = vpop.permute.xlu0 %1183  ;;  %v1130_v5 = vpop.permute.xlu1 %1129 }
 0x4ae   : > { %v1132_v7 = vadd.f32 %v1130_v5, %v1122_v6  ;;  %v1186_v14 = vadd.f32 %v1184_v4, %v1182_v8  ;;  %v1204_v25 = vadd.f32 %v1184_v4, %v1159_v62  ;;  %v1296_v4 = vld [vmem:[%s2193_s17 + $0x10] sm:$0xff] }
 0x4b1   : > { %v1139_v9 = vpop.permute.xlu0 %1138 }
 0x4b2   : > { %v1141_v12 = vadd.f32 %v1139_v9, %v1132_v7  ;;  %v1297_v9 = vmul.f32 %v1296_v4, %v2173_v63 }
 0x4b4   : > { %1236 = vrot.lane.b32.xlu1 %v1141_v12, %s1496_s28 }
 0x4b5   : > { %v1213_v13 = vpop.permute.xlu0 %1212 }
 0x4b6   : > { %v1215_v31 = vadd.f32 %v1213_v13, %v2140_v38 }
 0x4b9   : > { %v1208_v16 = vpop.permute.xlu0 %1207 }
 0x4ba   : > { %v1210_v61 = vadd.f32 %v1208_v16, %v1204_v25  ;;  %v1298_v16 = vadd.f32 %v1297_v9, %v2121_v46 }
 0x4ca   : > { %v1193_v17 = vpop.permute.xlu1 %1192 }
 0x4cb   : > { %v1195_v19 = vadd.f32 %v1193_v17, %v1186_v14 }
 0x4cd   : > { %1277 = vrot.lane.b32.xlu0 %v1195_v19, %s1497_s29 }
 0x4ce   : > { %v1110_v26 = vpop.permute.xlu0 %1109  ;;  %v1153_v27 = vpop.permute.xlu1 %1152 }
 0x4cf   : > { %v1155_v30 = vadd.f32 %v1153_v27, %v1145_v23  ;;  %v1112_v32 = vadd.f32 %v1110_v26, %v1102_v28 }
 0x4d1   : > { %1291 = vrot.lane.b32.xlu0 %v1210_v61, %s1496_s28  ;;  %1249 = vrot.lane.b32.xlu1 %v1155_v30, %s1497_s29 }
 0x4d2   : > { %v1116_v33 = vpop.permute.xlu0 %1115  ;;  %v1219_v34 = vpop.permute.xlu1 %1218 }
 0x4d3   : > { %v1118_v35 = vadd.f32 %v1116_v33, %v1112_v32  ;;  %v1221_v37 = vadd.f32 %v1219_v34, %v1215_v31 }
 0x4d5   : > { %v1226_v39 = vadd.f32 %v1225_v36, %v1118_v35  ;;  %1300 = vrot.lane.b32.xlu1 %v1221_v37, %s1497_s29 }
 0x4d6   : > { %v1162_v41 = vpop.permute.xlu0 %1161  ;;  %v1231_v18 = vpop.permute.xlu1 %1230 }
 0x4d7   : > { %1227 = vst.msk [vmem:[%s2208_s22] sm:$0xff] %vm701_vm0, %v1226_v39  ;;  %v1164_v49 = vadd.f32 %v1162_v41, %v1122_v6  ;;  %v1233_v54 = vmul.f32 %v1231_v18, %v1223_v20  ;;  %v1274_v0 = vmul.f32 %v1273_v45, %v1231_v18 }
 0x4d9   : > { %v1234_v60 = vadd.f32 %v1233_v54, %v2127_v59  ;;  %v1275_v55 = vadd.f32 %v1274_v0, %v2113_v42 }
 0x4da   : > { %v1201_v58 = vpop.permute.xlu0 %1200  ;;  %v1244_v47 = vpop.permute.xlu1 %1243 }
 0x4db   : > { %v1283_v38 = vmul.f32 %v1273_v45, %v1244_v47  ;;  %v1203_v15 = vadd.f32 %v1201_v58, %v1197_v29  ;;  %v1246_v1 = vmul.f32 %v1244_v47, %v1223_v20 }
 0x4dd   : > { %v1284_v22 = vadd.f32 %v1283_v38, %v2113_v42  ;;  %v1247_v7 = vadd.f32 %v1246_v1, %v2127_v59 }
 0x4de   : > { %v1168_v56 = vpop.permute.xlu0 %1167  ;;  %v1257_v48 = vpop.permute.xlu1 %1256 }
 0x4df   : > { %v1285_v51 = vadd.f32 %v1284_v22, %v1203_v15  ;;  %v1259_v2 = vmul.f32 %v1257_v48, %v1223_v20  ;;  %v1170_v52 = vadd.f32 %v1168_v56, %v1164_v49  ;;  %v1288_v3 = vmul.f32 %v1273_v45, %v1257_v48 }
 0x4e1   : > { %v1260_v53 = vadd.f32 %v1259_v2, %v2127_v59  ;;  %v1289_v6 = vadd.f32 %v1288_v3, %v2113_v42 }
 0x4e2   : > { %v1269_v11 = vpop.permute.xlu1 %1268 }
 0x4e3   : > { %v1261_v10 = vadd.f32 %v1260_v53, %v1170_v52  ;;  %v1271_v40 = vadd.f32 %v1269_v11, %v1266_v57 }
 0x4e5   : > { %1272 = vst.msk [vmem:[%s2208_s22 + $0x8] sm:$0xff] %vm701_vm0, %v1271_v40 }
 0x526   : > { %v1237_v50 = vpop.permute.xlu1 %1236 }
 0x527   : > { %v1239_v62 = vadd.f32 %v1237_v50, %v1234_v60 }
 0x529   : > { %1241 = vst.msk [vmem:[%s2208_s22] sm:$0xff] %vm1240_vm4, %v1239_v62 }
 0x53f   : > { %v1278_v21 = vpop.permute.xlu0 %1277 }
 0x540   : > { %v1280_v5 = vadd.f32 %v1278_v21, %v1275_v55 }
 0x542   : > { %1281 = vst.msk [vmem:[%s2208_s22 + $0x8] sm:$0xff] %vm1240_vm4, %v1280_v5 }
 0x543   : > { %v1292_v12 = vpop.permute.xlu0 %1291  ;;  %1286 = vst.msk [vmem:[%s2208_s22 + $0x8] sm:$0xff] %vm1253_vm5, %v1285_v51  ;;  %v1250_v13 = vpop.permute.xlu1 %1249 }
 0x544   : > { %v1294_v8 = vadd.f32 %v1292_v12, %v1289_v6  ;;  %v1252_v14 = vadd.f32 %v1250_v13, %v1247_v7 }
 0x546   : > { %1295 = vst.msk [vmem:[%s2208_s22 + $0x8] sm:$0xff] %vm1262_vm6, %v1294_v8 }
 0x547   : > { %1254 = vst.msk [vmem:[%s2208_s22] sm:$0xff] %vm1253_vm5, %v1252_v14  ;;  %v1301_v17 = vpop.permute.xlu1 %1300 }
 0x548   : > { %1263 = vst.msk [vmem:[%s2208_s22] sm:$0xff] %vm1262_vm6, %v1261_v10  ;;  %v1303_v19 = vadd.f32 %v1301_v17, %v1298_v16 }
 0x54a   : > { %1304 = vst.msk [vmem:[%s2208_s22 + $0x10] sm:$0xff] %vm701_vm0, %v1303_v19 }
 0x54b PF: > { %s15_s18 = sadd.s32 1, %s1493_s18  }
 0x54c   : > { %p12_p4 = scmp.ge.s32.totalorder %s15_s18, 4  }
 0x54e   :  { %14 = sbr.rel (!%p12_p4) target bundleno = 1 (0x1), region = 79 }

</bundles_post_ra>
